<compile_context>
chip_gen: v7x
topology: tpu7x:2x2x1
jax: 0.10.0
libtpu: 0.0.40
codegen_flags: <defaults>
</compile_context>

<pallas_src>
import functools

import jax
import jax.numpy as jnp
from jax.experimental import pallas as pl
from jax.experimental.pallas import tpu as pltpu

EPS = 1e-5


def _resnet_block_kernel(x_ref, w1_ref, w2_ref, cmask_ref, out_ref, ext_ref, *,
                         width):
    # x_ref    : (1, C, H*W)         one image; channels on sublanes, spatial on lanes
    # w*_ref   : (9, Cin, Cout, 1)   conv weights, tap-major (tap = ky*3 + kx)
    # cmask_ref: (2, H*W)            column-validity masks for kx == 0 and kx == 2
    # out_ref  : (1, C, H*W)
    # ext_ref  : (C, H*W + 2*(W+1))  VMEM scratch: zero-extended flat activation
    C, HW = x_ref.shape[1], x_ref.shape[2]
    pad = width + 1

    x = x_ref[0]                       # (C, HW)
    mask_left = cmask_ref[0:1, :]      # (1, HW): valid where x-coord >= 1
    mask_right = cmask_ref[1:2, :]     # (1, HW): valid where x-coord <= W-2

    # Zero only the two border strips; the interior is fully overwritten below.
    zeros_border = jnp.zeros((C, pad), jnp.float32)
    ext_ref[:, pl.ds(0, pad)] = zeros_border
    ext_ref[:, pl.ds(pad + HW, pad)] = zeros_border

    def conv3x3_instancenorm(h, w_ref):
        # 3x3 "SAME" conv followed by affine-free InstanceNorm2d.
        # The conv bias is intentionally omitted: it is mathematically removed
        # by the mean subtraction of the InstanceNorm that follows.
        ext_ref[:, pl.ds(pad, HW)] = h          # activation between zero borders
        acc = jnp.zeros((C, HW), jnp.float32)
        for tap in range(9):
            ky, kx = divmod(tap, 3)
            # Output pixel p needs input pixel p + (ky-1)*W + (kx-1); in the
            # zero-extended buffer that is a static load at lane offset ky*W+kx.
            t = ext_ref[:, pl.ds(ky * width + kx, HW)]          # (C, HW)
            if kx == 0:                 # tap reads across the left image edge
                t = t * mask_left
            elif kx == 2:               # tap reads across the right image edge
                t = t * mask_right
            # Row-invalid taps land in the zeroed border strips -> already zero.
            for ci in range(C):
                # (Cout, 1) * (1, HW) broadcast FMA on the VPU (MXU skipped: tiny C).
                acc = acc + w_ref[tap, ci] * t[ci:ci + 1, :]
        mean = jnp.mean(acc, axis=1, keepdims=True)             # (C, 1)
        centered = acc - mean                                   # reused twice
        var = jnp.mean(centered * centered, axis=1, keepdims=True)
        return centered * jax.lax.rsqrt(var + EPS)

    h1 = jnp.maximum(conv3x3_instancenorm(x, w1_ref), 0.0)      # conv1 + IN + ReLU
    h2 = conv3x3_instancenorm(h1, w2_ref)                       # conv2 + IN
    out_ref[0] = x + h2                                         # residual add


@jax.jit
def resnet_block(x_nchw, w1, b1, w2, b2):
    """x_nchw: (N, C, H, W) f32; w*: (C, C, 3, 3) f32; b*: (C,) f32 (unused)."""
    # Per-channel conv bias is exactly cancelled by the affine-free InstanceNorm
    # (mean subtraction) that follows each conv -> not passed to the kernel.
    del b1, b2
    N, C, H, W = x_nchw.shape
    HW = H * W

    # Free reshape: NCHW is already channels-on-sublanes / flat-spatial-on-lanes.
    x_flat = x_nchw.reshape(N, C, HW)

    # (Cout, Cin, ky, kx) -> (tap, Cin, Cout, 1) with tap = ky*3 + kx, so the
    # kernel can broadcast a (Cout, 1) weight column against a (1, HW) row.
    def prep_w(w):
        return jnp.transpose(w, (2, 3, 1, 0)).reshape(9, C, C)[..., None]

    w1_k, w2_k = prep_w(w1), prep_w(w2)

    # Column-validity masks (compile-time constants of the shape).
    xx = jnp.arange(HW, dtype=jnp.int32) % W
    col_masks = jnp.stack([(xx >= 1).astype(jnp.float32),
                           (xx <= W - 2).astype(jnp.float32)], axis=0)  # (2, HW)

    kernel = functools.partial(_resnet_block_kernel, width=W)
    out_flat = pl.pallas_call(
        kernel,
        out_shape=jax.ShapeDtypeStruct((N, C, HW), jnp.float32),
        grid_spec=pltpu.PrefetchScalarGridSpec(
            num_scalar_prefetch=0,
            grid=(N,),
            in_specs=[
                pl.BlockSpec((1, C, HW), lambda b: (b, 0, 0)),
                pl.BlockSpec((9, C, C, 1), lambda b: (0, 0, 0, 0)),
                pl.BlockSpec((9, C, C, 1), lambda b: (0, 0, 0, 0)),
                pl.BlockSpec((2, HW), lambda b: (0, 0)),
            ],
            out_specs=pl.BlockSpec((1, C, HW), lambda b: (b, 0, 0)),
            scratch_shapes=[pltpu.VMEM((C, HW + 2 * (W + 1)), jnp.float32)],
        ),
        compiler_params=pltpu.CompilerParams(
            dimension_semantics=("parallel",)),
    )(x_flat, w1_k, w2_k, col_masks)

    return out_flat.reshape(N, C, H, W)


def _reference(x_nchw, w1, b1, w2, b2):
    """Pure-JAX reference matching the PyTorch module (NCHW, biases included)."""
    def conv(x, w, b):
        y = jax.lax.conv_general_dilated(
            x, w, window_strides=(1, 1), padding="SAME",
            dimension_numbers=("NCHW", "OIHW", "NCHW"))
        return y + b[None, :, None, None]

    def inorm(x):
        m = x.mean(axis=(2, 3), keepdims=True)
        v = ((x - m) ** 2).mean(axis=(2, 3), keepdims=True)
        return (x - m) * jax.lax.rsqrt(v + EPS)

    h = jnp.maximum(inorm(conv(x_nchw, w1, b1)), 0.0)
    h = inorm(conv(h, w2, b2))
    return x_nchw + h


if __name__ == "__main__":
    key = jax.random.PRNGKey(0)
    N, C, H, W = 2, 4, 16, 16  # x: [2, 4, 16, 16] (NCHW, dim=4)

    kx, kw1, kb1, kw2, kb2 = jax.random.split(key, 5)
    x = jax.random.normal(kx, (N, C, H, W), jnp.float32)
    fan_in = C * 3 * 3
    bound = 1.0 / (fan_in ** 0.5)
    w1 = jax.random.uniform(kw1, (C, C, 3, 3), jnp.float32, -bound, bound)
    b1 = jax.random.uniform(kb1, (C,), jnp.float32, -bound, bound)
    w2 = jax.random.uniform(kw2, (C, C, 3, 3), jnp.float32, -bound, bound)
    b2 = jax.random.uniform(kb2, (C,), jnp.float32, -bound, bound)

    out = resnet_block(x, w1, b1, w2, b2)
    out = jax.block_until_ready(out)

    ref = jax.block_until_ready(_reference(x, w1, b1, w2, b2))
    assert out.shape == (N, C, H, W) and out.dtype == jnp.float32
    assert jnp.allclose(out, ref, atol=1e-3, rtol=1e-3), (
        float(jnp.max(jnp.abs(out - ref))))

    print("KERNEL_OK")
</pallas_src>

<mosaic_0001>
module attributes {stable_mosaic.version = 11 : i64} {
  func.func @_resnet_block_kernel(%arg0: i32, %arg1: memref<1x4x256xf32, #tpu.memory_space<vmem>>, %arg2: memref<9x4x4x1xf32, #tpu.memory_space<vmem>>, %arg3: memref<9x4x4x1xf32, #tpu.memory_space<vmem>>, %arg4: memref<2x256xf32, #tpu.memory_space<vmem>>, %arg5: memref<1x4x256xf32, #tpu.memory_space<vmem>>, %arg6: memref<4x290xf32, #tpu.memory_space<vmem>>) attributes {dimension_semantics = [#tpu.dimension_semantics<parallel>], iteration_bounds = array<i64: 2>, scalar_prefetch = 0 : i64, scratch_operands = 1 : i64, tpu.core_type = #tpu.core_type<tc>, window_params = [{transform_indices = @transform_0, window_bounds = array<i64: 1, 4, 256>}, {pipeline_mode = #tpu.pipeline_mode<synchronous>, transform_indices = @transform_1, window_bounds = array<i64: 9, 4, 4, 1>}, {pipeline_mode = #tpu.pipeline_mode<synchronous>, transform_indices = @transform_2, window_bounds = array<i64: 9, 4, 4, 1>}, {pipeline_mode = #tpu.pipeline_mode<synchronous>, transform_indices = @transform_3, window_bounds = array<i64: 2, 256>}, {transform_indices = @transform_4, window_bounds = array<i64: 1, 4, 256>}]} {
    %c0 = arith.constant 0 : index
    %c0_0 = arith.constant 0 : index
    %c0_1 = arith.constant 0 : index
    %0 = vector.load %arg1[%c0, %c0_0, %c0_1] : memref<1x4x256xf32, #tpu.memory_space<vmem>>, vector<1x4x256xf32>
    %1 = vector.shape_cast %0 : vector<1x4x256xf32> to vector<4x256xf32>
    %c0_2 = arith.constant 0 : index
    %c0_3 = arith.constant 0 : index
    %2 = vector.load %arg4[%c0_2, %c0_3] : memref<2x256xf32, #tpu.memory_space<vmem>>, vector<1x256xf32>
    %c1 = arith.constant 1 : index
    %c0_4 = arith.constant 0 : index
    %3 = vector.load %arg4[%c1, %c0_4] : memref<2x256xf32, #tpu.memory_space<vmem>>, vector<1x256xf32>
    %cst = arith.constant 0.000000e+00 : f32
    %4 = vector.broadcast %cst : f32 to vector<4x17xf32>
    %c0_5 = arith.constant 0 : index
    %c0_6 = arith.constant 0 : index
    %5 = vector.load %arg6[%c0_5, %c0_6] : memref<4x290xf32, #tpu.memory_space<vmem>>, vector<4x17xf32>
    tpu.vector_store %arg6[%c0_5, %c0_6], %4 {strides = array<i32>} : memref<4x290xf32, #tpu.memory_space<vmem>>, vector<4x17xf32>,
    %c0_7 = arith.constant 0 : index
    %c273 = arith.constant 273 : index
    %6 = vector.load %arg6[%c0_7, %c273] : memref<4x290xf32, #tpu.memory_space<vmem>>, vector<4x17xf32>
    tpu.vector_store %arg6[%c0_7, %c273], %4 {strides = array<i32>} : memref<4x290xf32, #tpu.memory_space<vmem>>, vector<4x17xf32>,
    %c0_8 = arith.constant 0 : index
    %c17 = arith.constant 17 : index
    %7 = vector.load %arg6[%c0_8, %c17] : memref<4x290xf32, #tpu.memory_space<vmem>>, vector<4x256xf32>
    tpu.vector_store %arg6[%c0_8, %c17], %1 {strides = array<i32>} : memref<4x290xf32, #tpu.memory_space<vmem>>, vector<4x256xf32>,
    %cst_9 = arith.constant 0.000000e+00 : f32
    %8 = vector.broadcast %cst_9 : f32 to vector<4x256xf32>
    %c0_10 = arith.constant 0 : index
    %c0_11 = arith.constant 0 : index
    %9 = vector.load %arg6[%c0_10, %c0_11] : memref<4x290xf32, #tpu.memory_space<vmem>>, vector<4x256xf32>
    %10 = vector.broadcast %2 : vector<1x256xf32> to vector<4x256xf32>
    %11 = arith.mulf %9, %10 : vector<4x256xf32>
    %c0_12 = arith.constant 0 : index
    %c0_13 = arith.constant 0 : index
    %c0_14 = arith.constant 0 : index
    %c0_15 = arith.constant 0 : index
    %12 = vector.load %arg2[%c0_12, %c0_13, %c0_14, %c0_15] : memref<9x4x4x1xf32, #tpu.memory_space<vmem>>, vector<1x1x4x1xf32>
    %13 = vector.shape_cast %12 : vector<1x1x4x1xf32> to vector<4x1xf32>
    %14 = vector.extract_strided_slice %11 {offsets = [0, 0], sizes = [1, 256], strides = [1, 1]} : vector<4x256xf32> to vector<1x256xf32>
    %15 = vector.broadcast %13 : vector<4x1xf32> to vector<4x256xf32>
    %16 = vector.broadcast %14 : vector<1x256xf32> to vector<4x256xf32>
    %17 = arith.mulf %15, %16 : vector<4x256xf32>
    %18 = arith.addf %8, %17 : vector<4x256xf32>
    %c0_16 = arith.constant 0 : index
    %c1_17 = arith.constant 1 : index
    %c0_18 = arith.constant 0 : index
    %c0_19 = arith.constant 0 : index
    %19 = vector.load %arg2[%c0_16, %c1_17, %c0_18, %c0_19] : memref<9x4x4x1xf32, #tpu.memory_space<vmem>>, vector<1x1x4x1xf32>
    %20 = vector.shape_cast %19 : vector<1x1x4x1xf32> to vector<4x1xf32>
    %21 = vector.extract_strided_slice %11 {offsets = [1, 0], sizes = [1, 256], strides = [1, 1]} : vector<4x256xf32> to vector<1x256xf32>
    %22 = vector.broadcast %20 : vector<4x1xf32> to vector<4x256xf32>
    %23 = vector.broadcast %21 : vector<1x256xf32> to vector<4x256xf32>
    %24 = arith.mulf %22, %23 : vector<4x256xf32>
    %25 = arith.addf %18, %24 : vector<4x256xf32>
    %c0_20 = arith.constant 0 : index
    %c2 = arith.constant 2 : index
    %c0_21 = arith.constant 0 : index
    %c0_22 = arith.constant 0 : index
    %26 = vector.load %arg2[%c0_20, %c2, %c0_21, %c0_22] : memref<9x4x4x1xf32, #tpu.memory_space<vmem>>, vector<1x1x4x1xf32>
    %27 = vector.shape_cast %26 : vector<1x1x4x1xf32> to vector<4x1xf32>
    %28 = vector.extract_strided_slice %11 {offsets = [2, 0], sizes = [1, 256], strides = [1, 1]} : vector<4x256xf32> to vector<1x256xf32>
    %29 = vector.broadcast %27 : vector<4x1xf32> to vector<4x256xf32>
    %30 = vector.broadcast %28 : vector<1x256xf32> to vector<4x256xf32>
    %31 = arith.mulf %29, %30 : vector<4x256xf32>
    %32 = arith.addf %25, %31 : vector<4x256xf32>
    %c0_23 = arith.constant 0 : index
    %c3 = arith.constant 3 : index
    %c0_24 = arith.constant 0 : index
    %c0_25 = arith.constant 0 : index
    %33 = vector.load %arg2[%c0_23, %c3, %c0_24, %c0_25] : memref<9x4x4x1xf32, #tpu.memory_space<vmem>>, vector<1x1x4x1xf32>
    %34 = vector.shape_cast %33 : vector<1x1x4x1xf32> to vector<4x1xf32>
    %35 = vector.extract_strided_slice %11 {offsets = [3, 0], sizes = [1, 256], strides = [1, 1]} : vector<4x256xf32> to vector<1x256xf32>
    %36 = vector.broadcast %34 : vector<4x1xf32> to vector<4x256xf32>
    %37 = vector.broadcast %35 : vector<1x256xf32> to vector<4x256xf32>
    %38 = arith.mulf %36, %37 : vector<4x256xf32>
    %39 = arith.addf %32, %38 : vector<4x256xf32>
    %c0_26 = arith.constant 0 : index
    %c1_27 = arith.constant 1 : index
    %40 = vector.load %arg6[%c0_26, %c1_27] : memref<4x290xf32, #tpu.memory_space<vmem>>, vector<4x256xf32>
    %c1_28 = arith.constant 1 : index
    %c0_29 = arith.constant 0 : index
    %c0_30 = arith.constant 0 : index
    %c0_31 = arith.constant 0 : index
    %41 = vector.load %arg2[%c1_28, %c0_29, %c0_30, %c0_31] : memref<9x4x4x1xf32, #tpu.memory_space<vmem>>, vector<1x1x4x1xf32>
    %42 = vector.shape_cast %41 : vector<1x1x4x1xf32> to vector<4x1xf32>
    %43 = vector.extract_strided_slice %40 {offsets = [0, 0], sizes = [1, 256], strides = [1, 1]} : vector<4x256xf32> to vector<1x256xf32>
    %44 = vector.broadcast %42 : vector<4x1xf32> to vector<4x256xf32>
    %45 = vector.broadcast %43 : vector<1x256xf32> to vector<4x256xf32>
    %46 = arith.mulf %44, %45 : vector<4x256xf32>
    %47 = arith.addf %39, %46 : vector<4x256xf32>
    %c1_32 = arith.constant 1 : index
    %c1_33 = arith.constant 1 : index
    %c0_34 = arith.constant 0 : index
    %c0_35 = arith.constant 0 : index
    %48 = vector.load %arg2[%c1_32, %c1_33, %c0_34, %c0_35] : memref<9x4x4x1xf32, #tpu.memory_space<vmem>>, vector<1x1x4x1xf32>
    %49 = vector.shape_cast %48 : vector<1x1x4x1xf32> to vector<4x1xf32>
    %50 = vector.extract_strided_slice %40 {offsets = [1, 0], sizes = [1, 256], strides = [1, 1]} : vector<4x256xf32> to vector<1x256xf32>
    %51 = vector.broadcast %49 : vector<4x1xf32> to vector<4x256xf32>
    %52 = vector.broadcast %50 : vector<1x256xf32> to vector<4x256xf32>
    %53 = arith.mulf %51, %52 : vector<4x256xf32>
    %54 = arith.addf %47, %53 : vector<4x256xf32>
    %c1_36 = arith.constant 1 : index
    %c2_37 = arith.constant 2 : index
    %c0_38 = arith.constant 0 : index
    %c0_39 = arith.constant 0 : index
    %55 = vector.load %arg2[%c1_36, %c2_37, %c0_38, %c0_39] : memref<9x4x4x1xf32, #tpu.memory_space<vmem>>, vector<1x1x4x1xf32>
    %56 = vector.shape_cast %55 : vector<1x1x4x1xf32> to vector<4x1xf32>
    %57 = vector.extract_strided_slice %40 {offsets = [2, 0], sizes = [1, 256], strides = [1, 1]} : vector<4x256xf32> to vector<1x256xf32>
    %58 = vector.broadcast %56 : vector<4x1xf32> to vector<4x256xf32>
    %59 = vector.broadcast %57 : vector<1x256xf32> to vector<4x256xf32>
    %60 = arith.mulf %58, %59 : vector<4x256xf32>
    %61 = arith.addf %54, %60 : vector<4x256xf32>
    %c1_40 = arith.constant 1 : index
    %c3_41 = arith.constant 3 : index
    %c0_42 = arith.constant 0 : index
    %c0_43 = arith.constant 0 : index
    %62 = vector.load %arg2[%c1_40, %c3_41, %c0_42, %c0_43] : memref<9x4x4x1xf32, #tpu.memory_space<vmem>>, vector<1x1x4x1xf32>
    %63 = vector.shape_cast %62 : vector<1x1x4x1xf32> to vector<4x1xf32>
    %64 = vector.extract_strided_slice %40 {offsets = [3, 0], sizes = [1, 256], strides = [1, 1]} : vector<4x256xf32> to vector<1x256xf32>
    %65 = vector.broadcast %63 : vector<4x1xf32> to vector<4x256xf32>
    %66 = vector.broadcast %64 : vector<1x256xf32> to vector<4x256xf32>
    %67 = arith.mulf %65, %66 : vector<4x256xf32>
    %68 = arith.addf %61, %67 : vector<4x256xf32>
    %c0_44 = arith.constant 0 : index
    %c2_45 = arith.constant 2 : index
    %69 = vector.load %arg6[%c0_44, %c2_45] : memref<4x290xf32, #tpu.memory_space<vmem>>, vector<4x256xf32>
    %70 = vector.broadcast %3 : vector<1x256xf32> to vector<4x256xf32>
    %71 = arith.mulf %69, %70 : vector<4x256xf32>
    %c2_46 = arith.constant 2 : index
    %c0_47 = arith.constant 0 : index
    %c0_48 = arith.constant 0 : index
    %c0_49 = arith.constant 0 : index
    %72 = vector.load %arg2[%c2_46, %c0_47, %c0_48, %c0_49] : memref<9x4x4x1xf32, #tpu.memory_space<vmem>>, vector<1x1x4x1xf32>
    %73 = vector.shape_cast %72 : vector<1x1x4x1xf32> to vector<4x1xf32>
    %74 = vector.extract_strided_slice %71 {offsets = [0, 0], sizes = [1, 256], strides = [1, 1]} : vector<4x256xf32> to vector<1x256xf32>
    %75 = vector.broadcast %73 : vector<4x1xf32> to vector<4x256xf32>
    %76 = vector.broadcast %74 : vector<1x256xf32> to vector<4x256xf32>
    %77 = arith.mulf %75, %76 : vector<4x256xf32>
    %78 = arith.addf %68, %77 : vector<4x256xf32>
    %c2_50 = arith.constant 2 : index
    %c1_51 = arith.constant 1 : index
    %c0_52 = arith.constant 0 : index
    %c0_53 = arith.constant 0 : index
    %79 = vector.load %arg2[%c2_50, %c1_51, %c0_52, %c0_53] : memref<9x4x4x1xf32, #tpu.memory_space<vmem>>, vector<1x1x4x1xf32>
    %80 = vector.shape_cast %79 : vector<1x1x4x1xf32> to vector<4x1xf32>
    %81 = vector.extract_strided_slice %71 {offsets = [1, 0], sizes = [1, 256], strides = [1, 1]} : vector<4x256xf32> to vector<1x256xf32>
    %82 = vector.broadcast %80 : vector<4x1xf32> to vector<4x256xf32>
    %83 = vector.broadcast %81 : vector<1x256xf32> to vector<4x256xf32>
    %84 = arith.mulf %82, %83 : vector<4x256xf32>
    %85 = arith.addf %78, %84 : vector<4x256xf32>
    %c2_54 = arith.constant 2 : index
    %c2_55 = arith.constant 2 : index
    %c0_56 = arith.constant 0 : index
    %c0_57 = arith.constant 0 : index
    %86 = vector.load %arg2[%c2_54, %c2_55, %c0_56, %c0_57] : memref<9x4x4x1xf32, #tpu.memory_space<vmem>>, vector<1x1x4x1xf32>
    %87 = vector.shape_cast %86 : vector<1x1x4x1xf32> to vector<4x1xf32>
    %88 = vector.extract_strided_slice %71 {offsets = [2, 0], sizes = [1, 256], strides = [1, 1]} : vector<4x256xf32> to vector<1x256xf32>
    %89 = vector.broadcast %87 : vector<4x1xf32> to vector<4x256xf32>
    %90 = vector.broadcast %88 : vector<1x256xf32> to vector<4x256xf32>
    %91 = arith.mulf %89, %90 : vector<4x256xf32>
    %92 = arith.addf %85, %91 : vector<4x256xf32>
    %c2_58 = arith.constant 2 : index
    %c3_59 = arith.constant 3 : index
    %c0_60 = arith.constant 0 : index
    %c0_61 = arith.constant 0 : index
    %93 = vector.load %arg2[%c2_58, %c3_59, %c0_60, %c0_61] : memref<9x4x4x1xf32, #tpu.memory_space<vmem>>, vector<1x1x4x1xf32>
    %94 = vector.shape_cast %93 : vector<1x1x4x1xf32> to vector<4x1xf32>
    %95 = vector.extract_strided_slice %71 {offsets = [3, 0], sizes = [1, 256], strides = [1, 1]} : vector<4x256xf32> to vector<1x256xf32>
    %96 = vector.broadcast %94 : vector<4x1xf32> to vector<4x256xf32>
    %97 = vector.broadcast %95 : vector<1x256xf32> to vector<4x256xf32>
    %98 = arith.mulf %96, %97 : vector<4x256xf32>
    %99 = arith.addf %92, %98 : vector<4x256xf32>
    %c0_62 = arith.constant 0 : index
    %c16 = arith.constant 16 : index
    %100 = vector.load %arg6[%c0_62, %c16] : memref<4x290xf32, #tpu.memory_space<vmem>>, vector<4x256xf32>
    %101 = vector.broadcast %2 : vector<1x256xf32> to vector<4x256xf32>
    %102 = arith.mulf %100, %101 : vector<4x256xf32>
    %c3_63 = arith.constant 3 : index
    %c0_64 = arith.constant 0 : index
    %c0_65 = arith.constant 0 : index
    %c0_66 = arith.constant 0 : index
    %103 = vector.load %arg2[%c3_63, %c0_64, %c0_65, %c0_66] : memref<9x4x4x1xf32, #tpu.memory_space<vmem>>, vector<1x1x4x1xf32>
    %104 = vector.shape_cast %103 : vector<1x1x4x1xf32> to vector<4x1xf32>
    %105 = vector.extract_strided_slice %102 {offsets = [0, 0], sizes = [1, 256], strides = [1, 1]} : vector<4x256xf32> to vector<1x256xf32>
    %106 = vector.broadcast %104 : vector<4x1xf32> to vector<4x256xf32>
    %107 = vector.broadcast %105 : vector<1x256xf32> to vector<4x256xf32>
    %108 = arith.mulf %106, %107 : vector<4x256xf32>
    %109 = arith.addf %99, %108 : vector<4x256xf32>
    %c3_67 = arith.constant 3 : index
    %c1_68 = arith.constant 1 : index
    %c0_69 = arith.constant 0 : index
    %c0_70 = arith.constant 0 : index
    %110 = vector.load %arg2[%c3_67, %c1_68, %c0_69, %c0_70] : memref<9x4x4x1xf32, #tpu.memory_space<vmem>>, vector<1x1x4x1xf32>
    %111 = vector.shape_cast %110 : vector<1x1x4x1xf32> to vector<4x1xf32>
    %112 = vector.extract_strided_slice %102 {offsets = [1, 0], sizes = [1, 256], strides = [1, 1]} : vector<4x256xf32> to vector<1x256xf32>
    %113 = vector.broadcast %111 : vector<4x1xf32> to vector<4x256xf32>
    %114 = vector.broadcast %112 : vector<1x256xf32> to vector<4x256xf32>
    %115 = arith.mulf %113, %114 : vector<4x256xf32>
    %116 = arith.addf %109, %115 : vector<4x256xf32>
    %c3_71 = arith.constant 3 : index
    %c2_72 = arith.constant 2 : index
    %c0_73 = arith.constant 0 : index
    %c0_74 = arith.constant 0 : index
    %117 = vector.load %arg2[%c3_71, %c2_72, %c0_73, %c0_74] : memref<9x4x4x1xf32, #tpu.memory_space<vmem>>, vector<1x1x4x1xf32>
    %118 = vector.shape_cast %117 : vector<1x1x4x1xf32> to vector<4x1xf32>
    %119 = vector.extract_strided_slice %102 {offsets = [2, 0], sizes = [1, 256], strides = [1, 1]} : vector<4x256xf32> to vector<1x256xf32>
    %120 = vector.broadcast %118 : vector<4x1xf32> to vector<4x256xf32>
    %121 = vector.broadcast %119 : vector<1x256xf32> to vector<4x256xf32>
    %122 = arith.mulf %120, %121 : vector<4x256xf32>
    %123 = arith.addf %116, %122 : vector<4x256xf32>
    %c3_75 = arith.constant 3 : index
    %c3_76 = arith.constant 3 : index
    %c0_77 = arith.constant 0 : index
    %c0_78 = arith.constant 0 : index
    %124 = vector.load %arg2[%c3_75, %c3_76, %c0_77, %c0_78] : memref<9x4x4x1xf32, #tpu.memory_space<vmem>>, vector<1x1x4x1xf32>
    %125 = vector.shape_cast %124 : vector<1x1x4x1xf32> to vector<4x1xf32>
    %126 = vector.extract_strided_slice %102 {offsets = [3, 0], sizes = [1, 256], strides = [1, 1]} : vector<4x256xf32> to vector<1x256xf32>
    %127 = vector.broadcast %125 : vector<4x1xf32> to vector<4x256xf32>
    %128 = vector.broadcast %126 : vector<1x256xf32> to vector<4x256xf32>
    %129 = arith.mulf %127, %128 : vector<4x256xf32>
    %130 = arith.addf %123, %129 : vector<4x256xf32>
    %c0_79 = arith.constant 0 : index
    %c17_80 = arith.constant 17 : index
    %131 = vector.load %arg6[%c0_79, %c17_80] : memref<4x290xf32, #tpu.memory_space<vmem>>, vector<4x256xf32>
    %c4 = arith.constant 4 : index
    %c0_81 = arith.constant 0 : index
    %c0_82 = arith.constant 0 : index
    %c0_83 = arith.constant 0 : index
    %132 = vector.load %arg2[%c4, %c0_81, %c0_82, %c0_83] : memref<9x4x4x1xf32, #tpu.memory_space<vmem>>, vector<1x1x4x1xf32>
    %133 = vector.shape_cast %132 : vector<1x1x4x1xf32> to vector<4x1xf32>
    %134 = vector.extract_strided_slice %131 {offsets = [0, 0], sizes = [1, 256], strides = [1, 1]} : vector<4x256xf32> to vector<1x256xf32>
    %135 = vector.broadcast %133 : vector<4x1xf32> to vector<4x256xf32>
    %136 = vector.broadcast %134 : vector<1x256xf32> to vector<4x256xf32>
    %137 = arith.mulf %135, %136 : vector<4x256xf32>
    %138 = arith.addf %130, %137 : vector<4x256xf32>
    %c4_84 = arith.constant 4 : index
    %c1_85 = arith.constant 1 : index
    %c0_86 = arith.constant 0 : index
    %c0_87 = arith.constant 0 : index
    %139 = vector.load %arg2[%c4_84, %c1_85, %c0_86, %c0_87] : memref<9x4x4x1xf32, #tpu.memory_space<vmem>>, vector<1x1x4x1xf32>
    %140 = vector.shape_cast %139 : vector<1x1x4x1xf32> to vector<4x1xf32>
    %141 = vector.extract_strided_slice %131 {offsets = [1, 0], sizes = [1, 256], strides = [1, 1]} : vector<4x256xf32> to vector<1x256xf32>
    %142 = vector.broadcast %140 : vector<4x1xf32> to vector<4x256xf32>
    %143 = vector.broadcast %141 : vector<1x256xf32> to vector<4x256xf32>
    %144 = arith.mulf %142, %143 : vector<4x256xf32>
    %145 = arith.addf %138, %144 : vector<4x256xf32>
    %c4_88 = arith.constant 4 : index
    %c2_89 = arith.constant 2 : index
    %c0_90 = arith.constant 0 : index
    %c0_91 = arith.constant 0 : index
    %146 = vector.load %arg2[%c4_88, %c2_89, %c0_90, %c0_91] : memref<9x4x4x1xf32, #tpu.memory_space<vmem>>, vector<1x1x4x1xf32>
    %147 = vector.shape_cast %146 : vector<1x1x4x1xf32> to vector<4x1xf32>
    %148 = vector.extract_strided_slice %131 {offsets = [2, 0], sizes = [1, 256], strides = [1, 1]} : vector<4x256xf32> to vector<1x256xf32>
    %149 = vector.broadcast %147 : vector<4x1xf32> to vector<4x256xf32>
    %150 = vector.broadcast %148 : vector<1x256xf32> to vector<4x256xf32>
    %151 = arith.mulf %149, %150 : vector<4x256xf32>
    %152 = arith.addf %145, %151 : vector<4x256xf32>
    %c4_92 = arith.constant 4 : index
    %c3_93 = arith.constant 3 : index
    %c0_94 = arith.constant 0 : index
    %c0_95 = arith.constant 0 : index
    %153 = vector.load %arg2[%c4_92, %c3_93, %c0_94, %c0_95] : memref<9x4x4x1xf32, #tpu.memory_space<vmem>>, vector<1x1x4x1xf32>
    %154 = vector.shape_cast %153 : vector<1x1x4x1xf32> to vector<4x1xf32>
    %155 = vector.extract_strided_slice %131 {offsets = [3, 0], sizes = [1, 256], strides = [1, 1]} : vector<4x256xf32> to vector<1x256xf32>
    %156 = vector.broadcast %154 : vector<4x1xf32> to vector<4x256xf32>
    %157 = vector.broadcast %155 : vector<1x256xf32> to vector<4x256xf32>
    %158 = arith.mulf %156, %157 : vector<4x256xf32>
    %159 = arith.addf %152, %158 : vector<4x256xf32>
    %c0_96 = arith.constant 0 : index
    %c18 = arith.constant 18 : index
    %160 = vector.load %arg6[%c0_96, %c18] : memref<4x290xf32, #tpu.memory_space<vmem>>, vector<4x256xf32>
    %161 = vector.broadcast %3 : vector<1x256xf32> to vector<4x256xf32>
    %162 = arith.mulf %160, %161 : vector<4x256xf32>
    %c5 = arith.constant 5 : index
    %c0_97 = arith.constant 0 : index
    %c0_98 = arith.constant 0 : index
    %c0_99 = arith.constant 0 : index
    %163 = vector.load %arg2[%c5, %c0_97, %c0_98, %c0_99] : memref<9x4x4x1xf32, #tpu.memory_space<vmem>>, vector<1x1x4x1xf32>
    %164 = vector.shape_cast %163 : vector<1x1x4x1xf32> to vector<4x1xf32>
    %165 = vector.extract_strided_slice %162 {offsets = [0, 0], sizes = [1, 256], strides = [1, 1]} : vector<4x256xf32> to vector<1x256xf32>
    %166 = vector.broadcast %164 : vector<4x1xf32> to vector<4x256xf32>
    %167 = vector.broadcast %165 : vector<1x256xf32> to vector<4x256xf32>
    %168 = arith.mulf %166, %167 : vector<4x256xf32>
    %169 = arith.addf %159, %168 : vector<4x256xf32>
    %c5_100 = arith.constant 5 : index
    %c1_101 = arith.constant 1 : index
    %c0_102 = arith.constant 0 : index
    %c0_103 = arith.constant 0 : index
    %170 = vector.load %arg2[%c5_100, %c1_101, %c0_102, %c0_103] : memref<9x4x4x1xf32, #tpu.memory_space<vmem>>, vector<1x1x4x1xf32>
    %171 = vector.shape_cast %170 : vector<1x1x4x1xf32> to vector<4x1xf32>
    %172 = vector.extract_strided_slice %162 {offsets = [1, 0], sizes = [1, 256], strides = [1, 1]} : vector<4x256xf32> to vector<1x256xf32>
    %173 = vector.broadcast %171 : vector<4x1xf32> to vector<4x256xf32>
    %174 = vector.broadcast %172 : vector<1x256xf32> to vector<4x256xf32>
    %175 = arith.mulf %173, %174 : vector<4x256xf32>
    %176 = arith.addf %169, %175 : vector<4x256xf32>
    %c5_104 = arith.constant 5 : index
    %c2_105 = arith.constant 2 : index
    %c0_106 = arith.constant 0 : index
    %c0_107 = arith.constant 0 : index
    %177 = vector.load %arg2[%c5_104, %c2_105, %c0_106, %c0_107] : memref<9x4x4x1xf32, #tpu.memory_space<vmem>>, vector<1x1x4x1xf32>
    %178 = vector.shape_cast %177 : vector<1x1x4x1xf32> to vector<4x1xf32>
    %179 = vector.extract_strided_slice %162 {offsets = [2, 0], sizes = [1, 256], strides = [1, 1]} : vector<4x256xf32> to vector<1x256xf32>
    %180 = vector.broadcast %178 : vector<4x1xf32> to vector<4x256xf32>
    %181 = vector.broadcast %179 : vector<1x256xf32> to vector<4x256xf32>
    %182 = arith.mulf %180, %181 : vector<4x256xf32>
    %183 = arith.addf %176, %182 : vector<4x256xf32>
    %c5_108 = arith.constant 5 : index
    %c3_109 = arith.constant 3 : index
    %c0_110 = arith.constant 0 : index
    %c0_111 = arith.constant 0 : index
    %184 = vector.load %arg2[%c5_108, %c3_109, %c0_110, %c0_111] : memref<9x4x4x1xf32, #tpu.memory_space<vmem>>, vector<1x1x4x1xf32>
    %185 = vector.shape_cast %184 : vector<1x1x4x1xf32> to vector<4x1xf32>
    %186 = vector.extract_strided_slice %162 {offsets = [3, 0], sizes = [1, 256], strides = [1, 1]} : vector<4x256xf32> to vector<1x256xf32>
    %187 = vector.broadcast %185 : vector<4x1xf32> to vector<4x256xf32>
    %188 = vector.broadcast %186 : vector<1x256xf32> to vector<4x256xf32>
    %189 = arith.mulf %187, %188 : vector<4x256xf32>
    %190 = arith.addf %183, %189 : vector<4x256xf32>
    %c0_112 = arith.constant 0 : index
    %c32 = arith.constant 32 : index
    %191 = vector.load %arg6[%c0_112, %c32] : memref<4x290xf32, #tpu.memory_space<vmem>>, vector<4x256xf32>
    %192 = vector.broadcast %2 : vector<1x256xf32> to vector<4x256xf32>
    %193 = arith.mulf %191, %192 : vector<4x256xf32>
    %c6 = arith.constant 6 : index
    %c0_113 = arith.constant 0 : index
    %c0_114 = arith.constant 0 : index
    %c0_115 = arith.constant 0 : index
    %194 = vector.load %arg2[%c6, %c0_113, %c0_114, %c0_115] : memref<9x4x4x1xf32, #tpu.memory_space<vmem>>, vector<1x1x4x1xf32>
    %195 = vector.shape_cast %194 : vector<1x1x4x1xf32> to vector<4x1xf32>
    %196 = vector.extract_strided_slice %193 {offsets = [0, 0], sizes = [1, 256], strides = [1, 1]} : vector<4x256xf32> to vector<1x256xf32>
    %197 = vector.broadcast %195 : vector<4x1xf32> to vector<4x256xf32>
    %198 = vector.broadcast %196 : vector<1x256xf32> to vector<4x256xf32>
    %199 = arith.mulf %197, %198 : vector<4x256xf32>
    %200 = arith.addf %190, %199 : vector<4x256xf32>
    %c6_116 = arith.constant 6 : index
    %c1_117 = arith.constant 1 : index
    %c0_118 = arith.constant 0 : index
    %c0_119 = arith.constant 0 : index
    %201 = vector.load %arg2[%c6_116, %c1_117, %c0_118, %c0_119] : memref<9x4x4x1xf32, #tpu.memory_space<vmem>>, vector<1x1x4x1xf32>
    %202 = vector.shape_cast %201 : vector<1x1x4x1xf32> to vector<4x1xf32>
    %203 = vector.extract_strided_slice %193 {offsets = [1, 0], sizes = [1, 256], strides = [1, 1]} : vector<4x256xf32> to vector<1x256xf32>
    %204 = vector.broadcast %202 : vector<4x1xf32> to vector<4x256xf32>
    %205 = vector.broadcast %203 : vector<1x256xf32> to vector<4x256xf32>
    %206 = arith.mulf %204, %205 : vector<4x256xf32>
    %207 = arith.addf %200, %206 : vector<4x256xf32>
    %c6_120 = arith.constant 6 : index
    %c2_121 = arith.constant 2 : index
    %c0_122 = arith.constant 0 : index
    %c0_123 = arith.constant 0 : index
    %208 = vector.load %arg2[%c6_120, %c2_121, %c0_122, %c0_123] : memref<9x4x4x1xf32, #tpu.memory_space<vmem>>, vector<1x1x4x1xf32>
    %209 = vector.shape_cast %208 : vector<1x1x4x1xf32> to vector<4x1xf32>
    %210 = vector.extract_strided_slice %193 {offsets = [2, 0], sizes = [1, 256], strides = [1, 1]} : vector<4x256xf32> to vector<1x256xf32>
    %211 = vector.broadcast %209 : vector<4x1xf32> to vector<4x256xf32>
    %212 = vector.broadcast %210 : vector<1x256xf32> to vector<4x256xf32>
    %213 = arith.mulf %211, %212 : vector<4x256xf32>
    %214 = arith.addf %207, %213 : vector<4x256xf32>
    %c6_124 = arith.constant 6 : index
    %c3_125 = arith.constant 3 : index
    %c0_126 = arith.constant 0 : index
    %c0_127 = arith.constant 0 : index
    %215 = vector.load %arg2[%c6_124, %c3_125, %c0_126, %c0_127] : memref<9x4x4x1xf32, #tpu.memory_space<vmem>>, vector<1x1x4x1xf32>
    %216 = vector.shape_cast %215 : vector<1x1x4x1xf32> to vector<4x1xf32>
    %217 = vector.extract_strided_slice %193 {offsets = [3, 0], sizes = [1, 256], strides = [1, 1]} : vector<4x256xf32> to vector<1x256xf32>
    %218 = vector.broadcast %216 : vector<4x1xf32> to vector<4x256xf32>
    %219 = vector.broadcast %217 : vector<1x256xf32> to vector<4x256xf32>
    %220 = arith.mulf %218, %219 : vector<4x256xf32>
    %221 = arith.addf %214, %220 : vector<4x256xf32>
    %c0_128 = arith.constant 0 : index
    %c33 = arith.constant 33 : index
    %222 = vector.load %arg6[%c0_128, %c33] : memref<4x290xf32, #tpu.memory_space<vmem>>, vector<4x256xf32>
    %c7 = arith.constant 7 : index
    %c0_129 = arith.constant 0 : index
    %c0_130 = arith.constant 0 : index
    %c0_131 = arith.constant 0 : index
    %223 = vector.load %arg2[%c7, %c0_129, %c0_130, %c0_131] : memref<9x4x4x1xf32, #tpu.memory_space<vmem>>, vector<1x1x4x1xf32>
    %224 = vector.shape_cast %223 : vector<1x1x4x1xf32> to vector<4x1xf32>
    %225 = vector.extract_strided_slice %222 {offsets = [0, 0], sizes = [1, 256], strides = [1, 1]} : vector<4x256xf32> to vector<1x256xf32>
    %226 = vector.broadcast %224 : vector<4x1xf32> to vector<4x256xf32>
    %227 = vector.broadcast %225 : vector<1x256xf32> to vector<4x256xf32>
    %228 = arith.mulf %226, %227 : vector<4x256xf32>
    %229 = arith.addf %221, %228 : vector<4x256xf32>
    %c7_132 = arith.constant 7 : index
    %c1_133 = arith.constant 1 : index
    %c0_134 = arith.constant 0 : index
    %c0_135 = arith.constant 0 : index
    %230 = vector.load %arg2[%c7_132, %c1_133, %c0_134, %c0_135] : memref<9x4x4x1xf32, #tpu.memory_space<vmem>>, vector<1x1x4x1xf32>
    %231 = vector.shape_cast %230 : vector<1x1x4x1xf32> to vector<4x1xf32>
    %232 = vector.extract_strided_slice %222 {offsets = [1, 0], sizes = [1, 256], strides = [1, 1]} : vector<4x256xf32> to vector<1x256xf32>
    %233 = vector.broadcast %231 : vector<4x1xf32> to vector<4x256xf32>
    %234 = vector.broadcast %232 : vector<1x256xf32> to vector<4x256xf32>
    %235 = arith.mulf %233, %234 : vector<4x256xf32>
    %236 = arith.addf %229, %235 : vector<4x256xf32>
    %c7_136 = arith.constant 7 : index
    %c2_137 = arith.constant 2 : index
    %c0_138 = arith.constant 0 : index
    %c0_139 = arith.constant 0 : index
    %237 = vector.load %arg2[%c7_136, %c2_137, %c0_138, %c0_139] : memref<9x4x4x1xf32, #tpu.memory_space<vmem>>, vector<1x1x4x1xf32>
    %238 = vector.shape_cast %237 : vector<1x1x4x1xf32> to vector<4x1xf32>
    %239 = vector.extract_strided_slice %222 {offsets = [2, 0], sizes = [1, 256], strides = [1, 1]} : vector<4x256xf32> to vector<1x256xf32>
    %240 = vector.broadcast %238 : vector<4x1xf32> to vector<4x256xf32>
    %241 = vector.broadcast %239 : vector<1x256xf32> to vector<4x256xf32>
    %242 = arith.mulf %240, %241 : vector<4x256xf32>
    %243 = arith.addf %236, %242 : vector<4x256xf32>
    %c7_140 = arith.constant 7 : index
    %c3_141 = arith.constant 3 : index
    %c0_142 = arith.constant 0 : index
    %c0_143 = arith.constant 0 : index
    %244 = vector.load %arg2[%c7_140, %c3_141, %c0_142, %c0_143] : memref<9x4x4x1xf32, #tpu.memory_space<vmem>>, vector<1x1x4x1xf32>
    %245 = vector.shape_cast %244 : vector<1x1x4x1xf32> to vector<4x1xf32>
    %246 = vector.extract_strided_slice %222 {offsets = [3, 0], sizes = [1, 256], strides = [1, 1]} : vector<4x256xf32> to vector<1x256xf32>
    %247 = vector.broadcast %245 : vector<4x1xf32> to vector<4x256xf32>
    %248 = vector.broadcast %246 : vector<1x256xf32> to vector<4x256xf32>
    %249 = arith.mulf %247, %248 : vector<4x256xf32>
    %250 = arith.addf %243, %249 : vector<4x256xf32>
    %c0_144 = arith.constant 0 : index
    %c34 = arith.constant 34 : index
    %251 = vector.load %arg6[%c0_144, %c34] : memref<4x290xf32, #tpu.memory_space<vmem>>, vector<4x256xf32>
    %252 = vector.broadcast %3 : vector<1x256xf32> to vector<4x256xf32>
    %253 = arith.mulf %251, %252 : vector<4x256xf32>
    %c8 = arith.constant 8 : index
    %c0_145 = arith.constant 0 : index
    %c0_146 = arith.constant 0 : index
    %c0_147 = arith.constant 0 : index
    %254 = vector.load %arg2[%c8, %c0_145, %c0_146, %c0_147] : memref<9x4x4x1xf32, #tpu.memory_space<vmem>>, vector<1x1x4x1xf32>
    %255 = vector.shape_cast %254 : vector<1x1x4x1xf32> to vector<4x1xf32>
    %256 = vector.extract_strided_slice %253 {offsets = [0, 0], sizes = [1, 256], strides = [1, 1]} : vector<4x256xf32> to vector<1x256xf32>
    %257 = vector.broadcast %255 : vector<4x1xf32> to vector<4x256xf32>
    %258 = vector.broadcast %256 : vector<1x256xf32> to vector<4x256xf32>
    %259 = arith.mulf %257, %258 : vector<4x256xf32>
    %260 = arith.addf %250, %259 : vector<4x256xf32>
    %c8_148 = arith.constant 8 : index
    %c1_149 = arith.constant 1 : index
    %c0_150 = arith.constant 0 : index
    %c0_151 = arith.constant 0 : index
    %261 = vector.load %arg2[%c8_148, %c1_149, %c0_150, %c0_151] : memref<9x4x4x1xf32, #tpu.memory_space<vmem>>, vector<1x1x4x1xf32>
    %262 = vector.shape_cast %261 : vector<1x1x4x1xf32> to vector<4x1xf32>
    %263 = vector.extract_strided_slice %253 {offsets = [1, 0], sizes = [1, 256], strides = [1, 1]} : vector<4x256xf32> to vector<1x256xf32>
    %264 = vector.broadcast %262 : vector<4x1xf32> to vector<4x256xf32>
    %265 = vector.broadcast %263 : vector<1x256xf32> to vector<4x256xf32>
    %266 = arith.mulf %264, %265 : vector<4x256xf32>
    %267 = arith.addf %260, %266 : vector<4x256xf32>
    %c8_152 = arith.constant 8 : index
    %c2_153 = arith.constant 2 : index
    %c0_154 = arith.constant 0 : index
    %c0_155 = arith.constant 0 : index
    %268 = vector.load %arg2[%c8_152, %c2_153, %c0_154, %c0_155] : memref<9x4x4x1xf32, #tpu.memory_space<vmem>>, vector<1x1x4x1xf32>
    %269 = vector.shape_cast %268 : vector<1x1x4x1xf32> to vector<4x1xf32>
    %270 = vector.extract_strided_slice %253 {offsets = [2, 0], sizes = [1, 256], strides = [1, 1]} : vector<4x256xf32> to vector<1x256xf32>
    %271 = vector.broadcast %269 : vector<4x1xf32> to vector<4x256xf32>
    %272 = vector.broadcast %270 : vector<1x256xf32> to vector<4x256xf32>
    %273 = arith.mulf %271, %272 : vector<4x256xf32>
    %274 = arith.addf %267, %273 : vector<4x256xf32>
    %c8_156 = arith.constant 8 : index
    %c3_157 = arith.constant 3 : index
    %c0_158 = arith.constant 0 : index
    %c0_159 = arith.constant 0 : index
    %275 = vector.load %arg2[%c8_156, %c3_157, %c0_158, %c0_159] : memref<9x4x4x1xf32, #tpu.memory_space<vmem>>, vector<1x1x4x1xf32>
    %276 = vector.shape_cast %275 : vector<1x1x4x1xf32> to vector<4x1xf32>
    %277 = vector.extract_strided_slice %253 {offsets = [3, 0], sizes = [1, 256], strides = [1, 1]} : vector<4x256xf32> to vector<1x256xf32>
    %278 = vector.broadcast %276 : vector<4x1xf32> to vector<4x256xf32>
    %279 = vector.broadcast %277 : vector<1x256xf32> to vector<4x256xf32>
    %280 = arith.mulf %278, %279 : vector<4x256xf32>
    %281 = arith.addf %274, %280 : vector<4x256xf32>
    %cst_160 = arith.constant dense<0.000000e+00> : vector<4xf32>
    %282 = vector.multi_reduction <add>, %281, %cst_160 [1] : vector<4x256xf32> to vector<4xf32>
    %283 = vector.shape_cast %282 : vector<4xf32> to vector<4x1xf32>
    %cst_161 = arith.constant 2.560000e+02 : f32
    %284 = vector.broadcast %cst_161 : f32 to vector<4x1xf32>
    %285 = arith.divf %283, %284 : vector<4x1xf32>
    %286 = vector.broadcast %285 : vector<4x1xf32> to vector<4x256xf32>
    %287 = arith.subf %281, %286 : vector<4x256xf32>
    %288 = arith.mulf %287, %287 : vector<4x256xf32>
    %cst_162 = arith.constant dense<0.000000e+00> : vector<4xf32>
    %289 = vector.multi_reduction <add>, %288, %cst_162 [1] : vector<4x256xf32> to vector<4xf32>
    %290 = vector.shape_cast %289 : vector<4xf32> to vector<4x1xf32>
    %cst_163 = arith.constant 2.560000e+02 : f32
    %291 = vector.broadcast %cst_163 : f32 to vector<4x1xf32>
    %292 = arith.divf %290, %291 : vector<4x1xf32>
    %cst_164 = arith.constant 9.99999974E-6 : f32
    %293 = vector.broadcast %cst_164 : f32 to vector<4x1xf32>
    %294 = arith.addf %292, %293 : vector<4x1xf32>
    %295 = math.rsqrt %294 : vector<4x1xf32>
    %296 = vector.broadcast %295 : vector<4x1xf32> to vector<4x256xf32>
    %297 = arith.mulf %287, %296 : vector<4x256xf32>
    %cst_165 = arith.constant 0.000000e+00 : f32
    %298 = vector.broadcast %cst_165 : f32 to vector<4x256xf32>
    %299 = arith.maximumf %297, %298 : vector<4x256xf32>
    %c0_166 = arith.constant 0 : index
    %c17_167 = arith.constant 17 : index
    %300 = vector.load %arg6[%c0_166, %c17_167] : memref<4x290xf32, #tpu.memory_space<vmem>>, vector<4x256xf32>
    tpu.vector_store %arg6[%c0_166, %c17_167], %299 {strides = array<i32>} : memref<4x290xf32, #tpu.memory_space<vmem>>, vector<4x256xf32>,
    %cst_168 = arith.constant 0.000000e+00 : f32
    %301 = vector.broadcast %cst_168 : f32 to vector<4x256xf32>
    %c0_169 = arith.constant 0 : index
    %c0_170 = arith.constant 0 : index
    %302 = vector.load %arg6[%c0_169, %c0_170] : memref<4x290xf32, #tpu.memory_space<vmem>>, vector<4x256xf32>
    %303 = vector.broadcast %2 : vector<1x256xf32> to vector<4x256xf32>
    %304 = arith.mulf %302, %303 : vector<4x256xf32>
    %c0_171 = arith.constant 0 : index
    %c0_172 = arith.constant 0 : index
    %c0_173 = arith.constant 0 : index
    %c0_174 = arith.constant 0 : index
    %305 = vector.load %arg3[%c0_171, %c0_172, %c0_173, %c0_174] : memref<9x4x4x1xf32, #tpu.memory_space<vmem>>, vector<1x1x4x1xf32>
    %306 = vector.shape_cast %305 : vector<1x1x4x1xf32> to vector<4x1xf32>
    %307 = vector.extract_strided_slice %304 {offsets = [0, 0], sizes = [1, 256], strides = [1, 1]} : vector<4x256xf32> to vector<1x256xf32>
    %308 = vector.broadcast %306 : vector<4x1xf32> to vector<4x256xf32>
    %309 = vector.broadcast %307 : vector<1x256xf32> to vector<4x256xf32>
    %310 = arith.mulf %308, %309 : vector<4x256xf32>
    %311 = arith.addf %301, %310 : vector<4x256xf32>
    %c0_175 = arith.constant 0 : index
    %c1_176 = arith.constant 1 : index
    %c0_177 = arith.constant 0 : index
    %c0_178 = arith.constant 0 : index
    %312 = vector.load %arg3[%c0_175, %c1_176, %c0_177, %c0_178] : memref<9x4x4x1xf32, #tpu.memory_space<vmem>>, vector<1x1x4x1xf32>
    %313 = vector.shape_cast %312 : vector<1x1x4x1xf32> to vector<4x1xf32>
    %314 = vector.extract_strided_slice %304 {offsets = [1, 0], sizes = [1, 256], strides = [1, 1]} : vector<4x256xf32> to vector<1x256xf32>
    %315 = vector.broadcast %313 : vector<4x1xf32> to vector<4x256xf32>
    %316 = vector.broadcast %314 : vector<1x256xf32> to vector<4x256xf32>
    %317 = arith.mulf %315, %316 : vector<4x256xf32>
    %318 = arith.addf %311, %317 : vector<4x256xf32>
    %c0_179 = arith.constant 0 : index
    %c2_180 = arith.constant 2 : index
    %c0_181 = arith.constant 0 : index
    %c0_182 = arith.constant 0 : index
    %319 = vector.load %arg3[%c0_179, %c2_180, %c0_181, %c0_182] : memref<9x4x4x1xf32, #tpu.memory_space<vmem>>, vector<1x1x4x1xf32>
    %320 = vector.shape_cast %319 : vector<1x1x4x1xf32> to vector<4x1xf32>
    %321 = vector.extract_strided_slice %304 {offsets = [2, 0], sizes = [1, 256], strides = [1, 1]} : vector<4x256xf32> to vector<1x256xf32>
    %322 = vector.broadcast %320 : vector<4x1xf32> to vector<4x256xf32>
    %323 = vector.broadcast %321 : vector<1x256xf32> to vector<4x256xf32>
    %324 = arith.mulf %322, %323 : vector<4x256xf32>
    %325 = arith.addf %318, %324 : vector<4x256xf32>
    %c0_183 = arith.constant 0 : index
    %c3_184 = arith.constant 3 : index
    %c0_185 = arith.constant 0 : index
    %c0_186 = arith.constant 0 : index
    %326 = vector.load %arg3[%c0_183, %c3_184, %c0_185, %c0_186] : memref<9x4x4x1xf32, #tpu.memory_space<vmem>>, vector<1x1x4x1xf32>
    %327 = vector.shape_cast %326 : vector<1x1x4x1xf32> to vector<4x1xf32>
    %328 = vector.extract_strided_slice %304 {offsets = [3, 0], sizes = [1, 256], strides = [1, 1]} : vector<4x256xf32> to vector<1x256xf32>
    %329 = vector.broadcast %327 : vector<4x1xf32> to vector<4x256xf32>
    %330 = vector.broadcast %328 : vector<1x256xf32> to vector<4x256xf32>
    %331 = arith.mulf %329, %330 : vector<4x256xf32>
    %332 = arith.addf %325, %331 : vector<4x256xf32>
    %c0_187 = arith.constant 0 : index
    %c1_188 = arith.constant 1 : index
    %333 = vector.load %arg6[%c0_187, %c1_188] : memref<4x290xf32, #tpu.memory_space<vmem>>, vector<4x256xf32>
    %c1_189 = arith.constant 1 : index
    %c0_190 = arith.constant 0 : index
    %c0_191 = arith.constant 0 : index
    %c0_192 = arith.constant 0 : index
    %334 = vector.load %arg3[%c1_189, %c0_190, %c0_191, %c0_192] : memref<9x4x4x1xf32, #tpu.memory_space<vmem>>, vector<1x1x4x1xf32>
    %335 = vector.shape_cast %334 : vector<1x1x4x1xf32> to vector<4x1xf32>
    %336 = vector.extract_strided_slice %333 {offsets = [0, 0], sizes = [1, 256], strides = [1, 1]} : vector<4x256xf32> to vector<1x256xf32>
    %337 = vector.broadcast %335 : vector<4x1xf32> to vector<4x256xf32>
    %338 = vector.broadcast %336 : vector<1x256xf32> to vector<4x256xf32>
    %339 = arith.mulf %337, %338 : vector<4x256xf32>
    %340 = arith.addf %332, %339 : vector<4x256xf32>
    %c1_193 = arith.constant 1 : index
    %c1_194 = arith.constant 1 : index
    %c0_195 = arith.constant 0 : index
    %c0_196 = arith.constant 0 : index
    %341 = vector.load %arg3[%c1_193, %c1_194, %c0_195, %c0_196] : memref<9x4x4x1xf32, #tpu.memory_space<vmem>>, vector<1x1x4x1xf32>
    %342 = vector.shape_cast %341 : vector<1x1x4x1xf32> to vector<4x1xf32>
    %343 = vector.extract_strided_slice %333 {offsets = [1, 0], sizes = [1, 256], strides = [1, 1]} : vector<4x256xf32> to vector<1x256xf32>
    %344 = vector.broadcast %342 : vector<4x1xf32> to vector<4x256xf32>
    %345 = vector.broadcast %343 : vector<1x256xf32> to vector<4x256xf32>
    %346 = arith.mulf %344, %345 : vector<4x256xf32>
    %347 = arith.addf %340, %346 : vector<4x256xf32>
    %c1_197 = arith.constant 1 : index
    %c2_198 = arith.constant 2 : index
    %c0_199 = arith.constant 0 : index
    %c0_200 = arith.constant 0 : index
    %348 = vector.load %arg3[%c1_197, %c2_198, %c0_199, %c0_200] : memref<9x4x4x1xf32, #tpu.memory_space<vmem>>, vector<1x1x4x1xf32>
    %349 = vector.shape_cast %348 : vector<1x1x4x1xf32> to vector<4x1xf32>
    %350 = vector.extract_strided_slice %333 {offsets = [2, 0], sizes = [1, 256], strides = [1, 1]} : vector<4x256xf32> to vector<1x256xf32>
    %351 = vector.broadcast %349 : vector<4x1xf32> to vector<4x256xf32>
    %352 = vector.broadcast %350 : vector<1x256xf32> to vector<4x256xf32>
    %353 = arith.mulf %351, %352 : vector<4x256xf32>
    %354 = arith.addf %347, %353 : vector<4x256xf32>
    %c1_201 = arith.constant 1 : index
    %c3_202 = arith.constant 3 : index
    %c0_203 = arith.constant 0 : index
    %c0_204 = arith.constant 0 : index
    %355 = vector.load %arg3[%c1_201, %c3_202, %c0_203, %c0_204] : memref<9x4x4x1xf32, #tpu.memory_space<vmem>>, vector<1x1x4x1xf32>
    %356 = vector.shape_cast %355 : vector<1x1x4x1xf32> to vector<4x1xf32>
    %357 = vector.extract_strided_slice %333 {offsets = [3, 0], sizes = [1, 256], strides = [1, 1]} : vector<4x256xf32> to vector<1x256xf32>
    %358 = vector.broadcast %356 : vector<4x1xf32> to vector<4x256xf32>
    %359 = vector.broadcast %357 : vector<1x256xf32> to vector<4x256xf32>
    %360 = arith.mulf %358, %359 : vector<4x256xf32>
    %361 = arith.addf %354, %360 : vector<4x256xf32>
    %c0_205 = arith.constant 0 : index
    %c2_206 = arith.constant 2 : index
    %362 = vector.load %arg6[%c0_205, %c2_206] : memref<4x290xf32, #tpu.memory_space<vmem>>, vector<4x256xf32>
    %363 = vector.broadcast %3 : vector<1x256xf32> to vector<4x256xf32>
    %364 = arith.mulf %362, %363 : vector<4x256xf32>
    %c2_207 = arith.constant 2 : index
    %c0_208 = arith.constant 0 : index
    %c0_209 = arith.constant 0 : index
    %c0_210 = arith.constant 0 : index
    %365 = vector.load %arg3[%c2_207, %c0_208, %c0_209, %c0_210] : memref<9x4x4x1xf32, #tpu.memory_space<vmem>>, vector<1x1x4x1xf32>
    %366 = vector.shape_cast %365 : vector<1x1x4x1xf32> to vector<4x1xf32>
    %367 = vector.extract_strided_slice %364 {offsets = [0, 0], sizes = [1, 256], strides = [1, 1]} : vector<4x256xf32> to vector<1x256xf32>
    %368 = vector.broadcast %366 : vector<4x1xf32> to vector<4x256xf32>
    %369 = vector.broadcast %367 : vector<1x256xf32> to vector<4x256xf32>
    %370 = arith.mulf %368, %369 : vector<4x256xf32>
    %371 = arith.addf %361, %370 : vector<4x256xf32>
    %c2_211 = arith.constant 2 : index
    %c1_212 = arith.constant 1 : index
    %c0_213 = arith.constant 0 : index
    %c0_214 = arith.constant 0 : index
    %372 = vector.load %arg3[%c2_211, %c1_212, %c0_213, %c0_214] : memref<9x4x4x1xf32, #tpu.memory_space<vmem>>, vector<1x1x4x1xf32>
    %373 = vector.shape_cast %372 : vector<1x1x4x1xf32> to vector<4x1xf32>
    %374 = vector.extract_strided_slice %364 {offsets = [1, 0], sizes = [1, 256], strides = [1, 1]} : vector<4x256xf32> to vector<1x256xf32>
    %375 = vector.broadcast %373 : vector<4x1xf32> to vector<4x256xf32>
    %376 = vector.broadcast %374 : vector<1x256xf32> to vector<4x256xf32>
    %377 = arith.mulf %375, %376 : vector<4x256xf32>
    %378 = arith.addf %371, %377 : vector<4x256xf32>
    %c2_215 = arith.constant 2 : index
    %c2_216 = arith.constant 2 : index
    %c0_217 = arith.constant 0 : index
    %c0_218 = arith.constant 0 : index
    %379 = vector.load %arg3[%c2_215, %c2_216, %c0_217, %c0_218] : memref<9x4x4x1xf32, #tpu.memory_space<vmem>>, vector<1x1x4x1xf32>
    %380 = vector.shape_cast %379 : vector<1x1x4x1xf32> to vector<4x1xf32>
    %381 = vector.extract_strided_slice %364 {offsets = [2, 0], sizes = [1, 256], strides = [1, 1]} : vector<4x256xf32> to vector<1x256xf32>
    %382 = vector.broadcast %380 : vector<4x1xf32> to vector<4x256xf32>
    %383 = vector.broadcast %381 : vector<1x256xf32> to vector<4x256xf32>
    %384 = arith.mulf %382, %383 : vector<4x256xf32>
    %385 = arith.addf %378, %384 : vector<4x256xf32>
    %c2_219 = arith.constant 2 : index
    %c3_220 = arith.constant 3 : index
    %c0_221 = arith.constant 0 : index
    %c0_222 = arith.constant 0 : index
    %386 = vector.load %arg3[%c2_219, %c3_220, %c0_221, %c0_222] : memref<9x4x4x1xf32, #tpu.memory_space<vmem>>, vector<1x1x4x1xf32>
    %387 = vector.shape_cast %386 : vector<1x1x4x1xf32> to vector<4x1xf32>
    %388 = vector.extract_strided_slice %364 {offsets = [3, 0], sizes = [1, 256], strides = [1, 1]} : vector<4x256xf32> to vector<1x256xf32>
    %389 = vector.broadcast %387 : vector<4x1xf32> to vector<4x256xf32>
    %390 = vector.broadcast %388 : vector<1x256xf32> to vector<4x256xf32>
    %391 = arith.mulf %389, %390 : vector<4x256xf32>
    %392 = arith.addf %385, %391 : vector<4x256xf32>
    %c0_223 = arith.constant 0 : index
    %c16_224 = arith.constant 16 : index
    %393 = vector.load %arg6[%c0_223, %c16_224] : memref<4x290xf32, #tpu.memory_space<vmem>>, vector<4x256xf32>
    %394 = vector.broadcast %2 : vector<1x256xf32> to vector<4x256xf32>
    %395 = arith.mulf %393, %394 : vector<4x256xf32>
    %c3_225 = arith.constant 3 : index
    %c0_226 = arith.constant 0 : index
    %c0_227 = arith.constant 0 : index
    %c0_228 = arith.constant 0 : index
    %396 = vector.load %arg3[%c3_225, %c0_226, %c0_227, %c0_228] : memref<9x4x4x1xf32, #tpu.memory_space<vmem>>, vector<1x1x4x1xf32>
    %397 = vector.shape_cast %396 : vector<1x1x4x1xf32> to vector<4x1xf32>
    %398 = vector.extract_strided_slice %395 {offsets = [0, 0], sizes = [1, 256], strides = [1, 1]} : vector<4x256xf32> to vector<1x256xf32>
    %399 = vector.broadcast %397 : vector<4x1xf32> to vector<4x256xf32>
    %400 = vector.broadcast %398 : vector<1x256xf32> to vector<4x256xf32>
    %401 = arith.mulf %399, %400 : vector<4x256xf32>
    %402 = arith.addf %392, %401 : vector<4x256xf32>
    %c3_229 = arith.constant 3 : index
    %c1_230 = arith.constant 1 : index
    %c0_231 = arith.constant 0 : index
    %c0_232 = arith.constant 0 : index
    %403 = vector.load %arg3[%c3_229, %c1_230, %c0_231, %c0_232] : memref<9x4x4x1xf32, #tpu.memory_space<vmem>>, vector<1x1x4x1xf32>
    %404 = vector.shape_cast %403 : vector<1x1x4x1xf32> to vector<4x1xf32>
    %405 = vector.extract_strided_slice %395 {offsets = [1, 0], sizes = [1, 256], strides = [1, 1]} : vector<4x256xf32> to vector<1x256xf32>
    %406 = vector.broadcast %404 : vector<4x1xf32> to vector<4x256xf32>
    %407 = vector.broadcast %405 : vector<1x256xf32> to vector<4x256xf32>
    %408 = arith.mulf %406, %407 : vector<4x256xf32>
    %409 = arith.addf %402, %408 : vector<4x256xf32>
    %c3_233 = arith.constant 3 : index
    %c2_234 = arith.constant 2 : index
    %c0_235 = arith.constant 0 : index
    %c0_236 = arith.constant 0 : index
    %410 = vector.load %arg3[%c3_233, %c2_234, %c0_235, %c0_236] : memref<9x4x4x1xf32, #tpu.memory_space<vmem>>, vector<1x1x4x1xf32>
    %411 = vector.shape_cast %410 : vector<1x1x4x1xf32> to vector<4x1xf32>
    %412 = vector.extract_strided_slice %395 {offsets = [2, 0], sizes = [1, 256], strides = [1, 1]} : vector<4x256xf32> to vector<1x256xf32>
    %413 = vector.broadcast %411 : vector<4x1xf32> to vector<4x256xf32>
    %414 = vector.broadcast %412 : vector<1x256xf32> to vector<4x256xf32>
    %415 = arith.mulf %413, %414 : vector<4x256xf32>
    %416 = arith.addf %409, %415 : vector<4x256xf32>
    %c3_237 = arith.constant 3 : index
    %c3_238 = arith.constant 3 : index
    %c0_239 = arith.constant 0 : index
    %c0_240 = arith.constant 0 : index
    %417 = vector.load %arg3[%c3_237, %c3_238, %c0_239, %c0_240] : memref<9x4x4x1xf32, #tpu.memory_space<vmem>>, vector<1x1x4x1xf32>
    %418 = vector.shape_cast %417 : vector<1x1x4x1xf32> to vector<4x1xf32>
    %419 = vector.extract_strided_slice %395 {offsets = [3, 0], sizes = [1, 256], strides = [1, 1]} : vector<4x256xf32> to vector<1x256xf32>
    %420 = vector.broadcast %418 : vector<4x1xf32> to vector<4x256xf32>
    %421 = vector.broadcast %419 : vector<1x256xf32> to vector<4x256xf32>
    %422 = arith.mulf %420, %421 : vector<4x256xf32>
    %423 = arith.addf %416, %422 : vector<4x256xf32>
    %c0_241 = arith.constant 0 : index
    %c17_242 = arith.constant 17 : index
    %424 = vector.load %arg6[%c0_241, %c17_242] : memref<4x290xf32, #tpu.memory_space<vmem>>, vector<4x256xf32>
    %c4_243 = arith.constant 4 : index
    %c0_244 = arith.constant 0 : index
    %c0_245 = arith.constant 0 : index
    %c0_246 = arith.constant 0 : index
    %425 = vector.load %arg3[%c4_243, %c0_244, %c0_245, %c0_246] : memref<9x4x4x1xf32, #tpu.memory_space<vmem>>, vector<1x1x4x1xf32>
    %426 = vector.shape_cast %425 : vector<1x1x4x1xf32> to vector<4x1xf32>
    %427 = vector.extract_strided_slice %424 {offsets = [0, 0], sizes = [1, 256], strides = [1, 1]} : vector<4x256xf32> to vector<1x256xf32>
    %428 = vector.broadcast %426 : vector<4x1xf32> to vector<4x256xf32>
    %429 = vector.broadcast %427 : vector<1x256xf32> to vector<4x256xf32>
    %430 = arith.mulf %428, %429 : vector<4x256xf32>
    %431 = arith.addf %423, %430 : vector<4x256xf32>
    %c4_247 = arith.constant 4 : index
    %c1_248 = arith.constant 1 : index
    %c0_249 = arith.constant 0 : index
    %c0_250 = arith.constant 0 : index
    %432 = vector.load %arg3[%c4_247, %c1_248, %c0_249, %c0_250] : memref<9x4x4x1xf32, #tpu.memory_space<vmem>>, vector<1x1x4x1xf32>
    %433 = vector.shape_cast %432 : vector<1x1x4x1xf32> to vector<4x1xf32>
    %434 = vector.extract_strided_slice %424 {offsets = [1, 0], sizes = [1, 256], strides = [1, 1]} : vector<4x256xf32> to vector<1x256xf32>
    %435 = vector.broadcast %433 : vector<4x1xf32> to vector<4x256xf32>
    %436 = vector.broadcast %434 : vector<1x256xf32> to vector<4x256xf32>
    %437 = arith.mulf %435, %436 : vector<4x256xf32>
    %438 = arith.addf %431, %437 : vector<4x256xf32>
    %c4_251 = arith.constant 4 : index
    %c2_252 = arith.constant 2 : index
    %c0_253 = arith.constant 0 : index
    %c0_254 = arith.constant 0 : index
    %439 = vector.load %arg3[%c4_251, %c2_252, %c0_253, %c0_254] : memref<9x4x4x1xf32, #tpu.memory_space<vmem>>, vector<1x1x4x1xf32>
    %440 = vector.shape_cast %439 : vector<1x1x4x1xf32> to vector<4x1xf32>
    %441 = vector.extract_strided_slice %424 {offsets = [2, 0], sizes = [1, 256], strides = [1, 1]} : vector<4x256xf32> to vector<1x256xf32>
    %442 = vector.broadcast %440 : vector<4x1xf32> to vector<4x256xf32>
    %443 = vector.broadcast %441 : vector<1x256xf32> to vector<4x256xf32>
    %444 = arith.mulf %442, %443 : vector<4x256xf32>
    %445 = arith.addf %438, %444 : vector<4x256xf32>
    %c4_255 = arith.constant 4 : index
    %c3_256 = arith.constant 3 : index
    %c0_257 = arith.constant 0 : index
    %c0_258 = arith.constant 0 : index
    %446 = vector.load %arg3[%c4_255, %c3_256, %c0_257, %c0_258] : memref<9x4x4x1xf32, #tpu.memory_space<vmem>>, vector<1x1x4x1xf32>
    %447 = vector.shape_cast %446 : vector<1x1x4x1xf32> to vector<4x1xf32>
    %448 = vector.extract_strided_slice %424 {offsets = [3, 0], sizes = [1, 256], strides = [1, 1]} : vector<4x256xf32> to vector<1x256xf32>
    %449 = vector.broadcast %447 : vector<4x1xf32> to vector<4x256xf32>
    %450 = vector.broadcast %448 : vector<1x256xf32> to vector<4x256xf32>
    %451 = arith.mulf %449, %450 : vector<4x256xf32>
    %452 = arith.addf %445, %451 : vector<4x256xf32>
    %c0_259 = arith.constant 0 : index
    %c18_260 = arith.constant 18 : index
    %453 = vector.load %arg6[%c0_259, %c18_260] : memref<4x290xf32, #tpu.memory_space<vmem>>, vector<4x256xf32>
    %454 = vector.broadcast %3 : vector<1x256xf32> to vector<4x256xf32>
    %455 = arith.mulf %453, %454 : vector<4x256xf32>
    %c5_261 = arith.constant 5 : index
    %c0_262 = arith.constant 0 : index
    %c0_263 = arith.constant 0 : index
    %c0_264 = arith.constant 0 : index
    %456 = vector.load %arg3[%c5_261, %c0_262, %c0_263, %c0_264] : memref<9x4x4x1xf32, #tpu.memory_space<vmem>>, vector<1x1x4x1xf32>
    %457 = vector.shape_cast %456 : vector<1x1x4x1xf32> to vector<4x1xf32>
    %458 = vector.extract_strided_slice %455 {offsets = [0, 0], sizes = [1, 256], strides = [1, 1]} : vector<4x256xf32> to vector<1x256xf32>
    %459 = vector.broadcast %457 : vector<4x1xf32> to vector<4x256xf32>
    %460 = vector.broadcast %458 : vector<1x256xf32> to vector<4x256xf32>
    %461 = arith.mulf %459, %460 : vector<4x256xf32>
    %462 = arith.addf %452, %461 : vector<4x256xf32>
    %c5_265 = arith.constant 5 : index
    %c1_266 = arith.constant 1 : index
    %c0_267 = arith.constant 0 : index
    %c0_268 = arith.constant 0 : index
    %463 = vector.load %arg3[%c5_265, %c1_266, %c0_267, %c0_268] : memref<9x4x4x1xf32, #tpu.memory_space<vmem>>, vector<1x1x4x1xf32>
    %464 = vector.shape_cast %463 : vector<1x1x4x1xf32> to vector<4x1xf32>
    %465 = vector.extract_strided_slice %455 {offsets = [1, 0], sizes = [1, 256], strides = [1, 1]} : vector<4x256xf32> to vector<1x256xf32>
    %466 = vector.broadcast %464 : vector<4x1xf32> to vector<4x256xf32>
    %467 = vector.broadcast %465 : vector<1x256xf32> to vector<4x256xf32>
    %468 = arith.mulf %466, %467 : vector<4x256xf32>
    %469 = arith.addf %462, %468 : vector<4x256xf32>
    %c5_269 = arith.constant 5 : index
    %c2_270 = arith.constant 2 : index
    %c0_271 = arith.constant 0 : index
    %c0_272 = arith.constant 0 : index
    %470 = vector.load %arg3[%c5_269, %c2_270, %c0_271, %c0_272] : memref<9x4x4x1xf32, #tpu.memory_space<vmem>>, vector<1x1x4x1xf32>
    %471 = vector.shape_cast %470 : vector<1x1x4x1xf32> to vector<4x1xf32>
    %472 = vector.extract_strided_slice %455 {offsets = [2, 0], sizes = [1, 256], strides = [1, 1]} : vector<4x256xf32> to vector<1x256xf32>
    %473 = vector.broadcast %471 : vector<4x1xf32> to vector<4x256xf32>
    %474 = vector.broadcast %472 : vector<1x256xf32> to vector<4x256xf32>
    %475 = arith.mulf %473, %474 : vector<4x256xf32>
    %476 = arith.addf %469, %475 : vector<4x256xf32>
    %c5_273 = arith.constant 5 : index
    %c3_274 = arith.constant 3 : index
    %c0_275 = arith.constant 0 : index
    %c0_276 = arith.constant 0 : index
    %477 = vector.load %arg3[%c5_273, %c3_274, %c0_275, %c0_276] : memref<9x4x4x1xf32, #tpu.memory_space<vmem>>, vector<1x1x4x1xf32>
    %478 = vector.shape_cast %477 : vector<1x1x4x1xf32> to vector<4x1xf32>
    %479 = vector.extract_strided_slice %455 {offsets = [3, 0], sizes = [1, 256], strides = [1, 1]} : vector<4x256xf32> to vector<1x256xf32>
    %480 = vector.broadcast %478 : vector<4x1xf32> to vector<4x256xf32>
    %481 = vector.broadcast %479 : vector<1x256xf32> to vector<4x256xf32>
    %482 = arith.mulf %480, %481 : vector<4x256xf32>
    %483 = arith.addf %476, %482 : vector<4x256xf32>
    %c0_277 = arith.constant 0 : index
    %c32_278 = arith.constant 32 : index
    %484 = vector.load %arg6[%c0_277, %c32_278] : memref<4x290xf32, #tpu.memory_space<vmem>>, vector<4x256xf32>
    %485 = vector.broadcast %2 : vector<1x256xf32> to vector<4x256xf32>
    %486 = arith.mulf %484, %485 : vector<4x256xf32>
    %c6_279 = arith.constant 6 : index
    %c0_280 = arith.constant 0 : index
    %c0_281 = arith.constant 0 : index
    %c0_282 = arith.constant 0 : index
    %487 = vector.load %arg3[%c6_279, %c0_280, %c0_281, %c0_282] : memref<9x4x4x1xf32, #tpu.memory_space<vmem>>, vector<1x1x4x1xf32>
    %488 = vector.shape_cast %487 : vector<1x1x4x1xf32> to vector<4x1xf32>
    %489 = vector.extract_strided_slice %486 {offsets = [0, 0], sizes = [1, 256], strides = [1, 1]} : vector<4x256xf32> to vector<1x256xf32>
    %490 = vector.broadcast %488 : vector<4x1xf32> to vector<4x256xf32>
    %491 = vector.broadcast %489 : vector<1x256xf32> to vector<4x256xf32>
    %492 = arith.mulf %490, %491 : vector<4x256xf32>
    %493 = arith.addf %483, %492 : vector<4x256xf32>
    %c6_283 = arith.constant 6 : index
    %c1_284 = arith.constant 1 : index
    %c0_285 = arith.constant 0 : index
    %c0_286 = arith.constant 0 : index
    %494 = vector.load %arg3[%c6_283, %c1_284, %c0_285, %c0_286] : memref<9x4x4x1xf32, #tpu.memory_space<vmem>>, vector<1x1x4x1xf32>
    %495 = vector.shape_cast %494 : vector<1x1x4x1xf32> to vector<4x1xf32>
    %496 = vector.extract_strided_slice %486 {offsets = [1, 0], sizes = [1, 256], strides = [1, 1]} : vector<4x256xf32> to vector<1x256xf32>
    %497 = vector.broadcast %495 : vector<4x1xf32> to vector<4x256xf32>
    %498 = vector.broadcast %496 : vector<1x256xf32> to vector<4x256xf32>
    %499 = arith.mulf %497, %498 : vector<4x256xf32>
    %500 = arith.addf %493, %499 : vector<4x256xf32>
    %c6_287 = arith.constant 6 : index
    %c2_288 = arith.constant 2 : index
    %c0_289 = arith.constant 0 : index
    %c0_290 = arith.constant 0 : index
    %501 = vector.load %arg3[%c6_287, %c2_288, %c0_289, %c0_290] : memref<9x4x4x1xf32, #tpu.memory_space<vmem>>, vector<1x1x4x1xf32>
    %502 = vector.shape_cast %501 : vector<1x1x4x1xf32> to vector<4x1xf32>
    %503 = vector.extract_strided_slice %486 {offsets = [2, 0], sizes = [1, 256], strides = [1, 1]} : vector<4x256xf32> to vector<1x256xf32>
    %504 = vector.broadcast %502 : vector<4x1xf32> to vector<4x256xf32>
    %505 = vector.broadcast %503 : vector<1x256xf32> to vector<4x256xf32>
    %506 = arith.mulf %504, %505 : vector<4x256xf32>
    %507 = arith.addf %500, %506 : vector<4x256xf32>
    %c6_291 = arith.constant 6 : index
    %c3_292 = arith.constant 3 : index
    %c0_293 = arith.constant 0 : index
    %c0_294 = arith.constant 0 : index
    %508 = vector.load %arg3[%c6_291, %c3_292, %c0_293, %c0_294] : memref<9x4x4x1xf32, #tpu.memory_space<vmem>>, vector<1x1x4x1xf32>
    %509 = vector.shape_cast %508 : vector<1x1x4x1xf32> to vector<4x1xf32>
    %510 = vector.extract_strided_slice %486 {offsets = [3, 0], sizes = [1, 256], strides = [1, 1]} : vector<4x256xf32> to vector<1x256xf32>
    %511 = vector.broadcast %509 : vector<4x1xf32> to vector<4x256xf32>
    %512 = vector.broadcast %510 : vector<1x256xf32> to vector<4x256xf32>
    %513 = arith.mulf %511, %512 : vector<4x256xf32>
    %514 = arith.addf %507, %513 : vector<4x256xf32>
    %c0_295 = arith.constant 0 : index
    %c33_296 = arith.constant 33 : index
    %515 = vector.load %arg6[%c0_295, %c33_296] : memref<4x290xf32, #tpu.memory_space<vmem>>, vector<4x256xf32>
    %c7_297 = arith.constant 7 : index
    %c0_298 = arith.constant 0 : index
    %c0_299 = arith.constant 0 : index
    %c0_300 = arith.constant 0 : index
    %516 = vector.load %arg3[%c7_297, %c0_298, %c0_299, %c0_300] : memref<9x4x4x1xf32, #tpu.memory_space<vmem>>, vector<1x1x4x1xf32>
    %517 = vector.shape_cast %516 : vector<1x1x4x1xf32> to vector<4x1xf32>
    %518 = vector.extract_strided_slice %515 {offsets = [0, 0], sizes = [1, 256], strides = [1, 1]} : vector<4x256xf32> to vector<1x256xf32>
    %519 = vector.broadcast %517 : vector<4x1xf32> to vector<4x256xf32>
    %520 = vector.broadcast %518 : vector<1x256xf32> to vector<4x256xf32>
    %521 = arith.mulf %519, %520 : vector<4x256xf32>
    %522 = arith.addf %514, %521 : vector<4x256xf32>
    %c7_301 = arith.constant 7 : index
    %c1_302 = arith.constant 1 : index
    %c0_303 = arith.constant 0 : index
    %c0_304 = arith.constant 0 : index
    %523 = vector.load %arg3[%c7_301, %c1_302, %c0_303, %c0_304] : memref<9x4x4x1xf32, #tpu.memory_space<vmem>>, vector<1x1x4x1xf32>
    %524 = vector.shape_cast %523 : vector<1x1x4x1xf32> to vector<4x1xf32>
    %525 = vector.extract_strided_slice %515 {offsets = [1, 0], sizes = [1, 256], strides = [1, 1]} : vector<4x256xf32> to vector<1x256xf32>
    %526 = vector.broadcast %524 : vector<4x1xf32> to vector<4x256xf32>
    %527 = vector.broadcast %525 : vector<1x256xf32> to vector<4x256xf32>
    %528 = arith.mulf %526, %527 : vector<4x256xf32>
    %529 = arith.addf %522, %528 : vector<4x256xf32>
    %c7_305 = arith.constant 7 : index
    %c2_306 = arith.constant 2 : index
    %c0_307 = arith.constant 0 : index
    %c0_308 = arith.constant 0 : index
    %530 = vector.load %arg3[%c7_305, %c2_306, %c0_307, %c0_308] : memref<9x4x4x1xf32, #tpu.memory_space<vmem>>, vector<1x1x4x1xf32>
    %531 = vector.shape_cast %530 : vector<1x1x4x1xf32> to vector<4x1xf32>
    %532 = vector.extract_strided_slice %515 {offsets = [2, 0], sizes = [1, 256], strides = [1, 1]} : vector<4x256xf32> to vector<1x256xf32>
    %533 = vector.broadcast %531 : vector<4x1xf32> to vector<4x256xf32>
    %534 = vector.broadcast %532 : vector<1x256xf32> to vector<4x256xf32>
    %535 = arith.mulf %533, %534 : vector<4x256xf32>
    %536 = arith.addf %529, %535 : vector<4x256xf32>
    %c7_309 = arith.constant 7 : index
    %c3_310 = arith.constant 3 : index
    %c0_311 = arith.constant 0 : index
    %c0_312 = arith.constant 0 : index
    %537 = vector.load %arg3[%c7_309, %c3_310, %c0_311, %c0_312] : memref<9x4x4x1xf32, #tpu.memory_space<vmem>>, vector<1x1x4x1xf32>
    %538 = vector.shape_cast %537 : vector<1x1x4x1xf32> to vector<4x1xf32>
    %539 = vector.extract_strided_slice %515 {offsets = [3, 0], sizes = [1, 256], strides = [1, 1]} : vector<4x256xf32> to vector<1x256xf32>
    %540 = vector.broadcast %538 : vector<4x1xf32> to vector<4x256xf32>
    %541 = vector.broadcast %539 : vector<1x256xf32> to vector<4x256xf32>
    %542 = arith.mulf %540, %541 : vector<4x256xf32>
    %543 = arith.addf %536, %542 : vector<4x256xf32>
    %c0_313 = arith.constant 0 : index
    %c34_314 = arith.constant 34 : index
    %544 = vector.load %arg6[%c0_313, %c34_314] : memref<4x290xf32, #tpu.memory_space<vmem>>, vector<4x256xf32>
    %545 = vector.broadcast %3 : vector<1x256xf32> to vector<4x256xf32>
    %546 = arith.mulf %544, %545 : vector<4x256xf32>
    %c8_315 = arith.constant 8 : index
    %c0_316 = arith.constant 0 : index
    %c0_317 = arith.constant 0 : index
    %c0_318 = arith.constant 0 : index
    %547 = vector.load %arg3[%c8_315, %c0_316, %c0_317, %c0_318] : memref<9x4x4x1xf32, #tpu.memory_space<vmem>>, vector<1x1x4x1xf32>
    %548 = vector.shape_cast %547 : vector<1x1x4x1xf32> to vector<4x1xf32>
    %549 = vector.extract_strided_slice %546 {offsets = [0, 0], sizes = [1, 256], strides = [1, 1]} : vector<4x256xf32> to vector<1x256xf32>
    %550 = vector.broadcast %548 : vector<4x1xf32> to vector<4x256xf32>
    %551 = vector.broadcast %549 : vector<1x256xf32> to vector<4x256xf32>
    %552 = arith.mulf %550, %551 : vector<4x256xf32>
    %553 = arith.addf %543, %552 : vector<4x256xf32>
    %c8_319 = arith.constant 8 : index
    %c1_320 = arith.constant 1 : index
    %c0_321 = arith.constant 0 : index
    %c0_322 = arith.constant 0 : index
    %554 = vector.load %arg3[%c8_319, %c1_320, %c0_321, %c0_322] : memref<9x4x4x1xf32, #tpu.memory_space<vmem>>, vector<1x1x4x1xf32>
    %555 = vector.shape_cast %554 : vector<1x1x4x1xf32> to vector<4x1xf32>
    %556 = vector.extract_strided_slice %546 {offsets = [1, 0], sizes = [1, 256], strides = [1, 1]} : vector<4x256xf32> to vector<1x256xf32>
    %557 = vector.broadcast %555 : vector<4x1xf32> to vector<4x256xf32>
    %558 = vector.broadcast %556 : vector<1x256xf32> to vector<4x256xf32>
    %559 = arith.mulf %557, %558 : vector<4x256xf32>
    %560 = arith.addf %553, %559 : vector<4x256xf32>
    %c8_323 = arith.constant 8 : index
    %c2_324 = arith.constant 2 : index
    %c0_325 = arith.constant 0 : index
    %c0_326 = arith.constant 0 : index
    %561 = vector.load %arg3[%c8_323, %c2_324, %c0_325, %c0_326] : memref<9x4x4x1xf32, #tpu.memory_space<vmem>>, vector<1x1x4x1xf32>
    %562 = vector.shape_cast %561 : vector<1x1x4x1xf32> to vector<4x1xf32>
    %563 = vector.extract_strided_slice %546 {offsets = [2, 0], sizes = [1, 256], strides = [1, 1]} : vector<4x256xf32> to vector<1x256xf32>
    %564 = vector.broadcast %562 : vector<4x1xf32> to vector<4x256xf32>
    %565 = vector.broadcast %563 : vector<1x256xf32> to vector<4x256xf32>
    %566 = arith.mulf %564, %565 : vector<4x256xf32>
    %567 = arith.addf %560, %566 : vector<4x256xf32>
    %c8_327 = arith.constant 8 : index
    %c3_328 = arith.constant 3 : index
    %c0_329 = arith.constant 0 : index
    %c0_330 = arith.constant 0 : index
    %568 = vector.load %arg3[%c8_327, %c3_328, %c0_329, %c0_330] : memref<9x4x4x1xf32, #tpu.memory_space<vmem>>, vector<1x1x4x1xf32>
    %569 = vector.shape_cast %568 : vector<1x1x4x1xf32> to vector<4x1xf32>
    %570 = vector.extract_strided_slice %546 {offsets = [3, 0], sizes = [1, 256], strides = [1, 1]} : vector<4x256xf32> to vector<1x256xf32>
    %571 = vector.broadcast %569 : vector<4x1xf32> to vector<4x256xf32>
    %572 = vector.broadcast %570 : vector<1x256xf32> to vector<4x256xf32>
    %573 = arith.mulf %571, %572 : vector<4x256xf32>
    %574 = arith.addf %567, %573 : vector<4x256xf32>
    %cst_331 = arith.constant dense<0.000000e+00> : vector<4xf32>
    %575 = vector.multi_reduction <add>, %574, %cst_331 [1] : vector<4x256xf32> to vector<4xf32>
    %576 = vector.shape_cast %575 : vector<4xf32> to vector<4x1xf32>
    %cst_332 = arith.constant 2.560000e+02 : f32
    %577 = vector.broadcast %cst_332 : f32 to vector<4x1xf32>
    %578 = arith.divf %576, %577 : vector<4x1xf32>
    %579 = vector.broadcast %578 : vector<4x1xf32> to vector<4x256xf32>
    %580 = arith.subf %574, %579 : vector<4x256xf32>
    %581 = arith.mulf %580, %580 : vector<4x256xf32>
    %cst_333 = arith.constant dense<0.000000e+00> : vector<4xf32>
    %582 = vector.multi_reduction <add>, %581, %cst_333 [1] : vector<4x256xf32> to vector<4xf32>
    %583 = vector.shape_cast %582 : vector<4xf32> to vector<4x1xf32>
    %cst_334 = arith.constant 2.560000e+02 : f32
    %584 = vector.broadcast %cst_334 : f32 to vector<4x1xf32>
    %585 = arith.divf %583, %584 : vector<4x1xf32>
    %cst_335 = arith.constant 9.99999974E-6 : f32
    %586 = vector.broadcast %cst_335 : f32 to vector<4x1xf32>
    %587 = arith.addf %585, %586 : vector<4x1xf32>
    %588 = math.rsqrt %587 : vector<4x1xf32>
    %589 = vector.broadcast %588 : vector<4x1xf32> to vector<4x256xf32>
    %590 = arith.mulf %580, %589 : vector<4x256xf32>
    %591 = arith.addf %1, %590 : vector<4x256xf32>
    %c0_336 = arith.constant 0 : index
    %c0_337 = arith.constant 0 : index
    %c0_338 = arith.constant 0 : index
    %592 = vector.load %arg5[%c0_336, %c0_337, %c0_338] : memref<1x4x256xf32, #tpu.memory_space<vmem>>, vector<1x4x256xf32>
    %593 = vector.shape_cast %592 : vector<1x4x256xf32> to vector<4x256xf32>
    %594 = vector.shape_cast %591 : vector<4x256xf32> to vector<1x4x256xf32>
    tpu.vector_store %arg5[%c0_336, %c0_337, %c0_338], %594 {strides = array<i32>} : memref<1x4x256xf32, #tpu.memory_space<vmem>>, vector<1x4x256xf32>,
    return
  }
  func.func @transform_0(%arg0: i32) -> (i32, i32, i32) {
    %c0_i32 = arith.constant 0 : i32
    %c0_i32_0 = arith.constant 0 : i32
    %c0_i32_1 = arith.constant 0 : i32
    return %arg0, %c0_i32, %c0_i32_0 : i32, i32, i32
  }
  func.func @transform_1(%arg0: i32) -> (i32, i32, i32, i32) {
    %c0_i32 = arith.constant 0 : i32
    %c0_i32_0 = arith.constant 0 : i32
    %c0_i32_1 = arith.constant 0 : i32
    %c0_i32_2 = arith.constant 0 : i32
    %c0_i32_3 = arith.constant 0 : i32
    return %c0_i32, %c0_i32_0, %c0_i32_1, %c0_i32_2 : i32, i32, i32, i32
  }
  func.func @transform_2(%arg0: i32) -> (i32, i32, i32, i32) {
    %c0_i32 = arith.constant 0 : i32
    %c0_i32_0 = arith.constant 0 : i32
    %c0_i32_1 = arith.constant 0 : i32
    %c0_i32_2 = arith.constant 0 : i32
    %c0_i32_3 = arith.constant 0 : i32
    return %c0_i32, %c0_i32_0, %c0_i32_1, %c0_i32_2 : i32, i32, i32, i32
  }
  func.func @transform_3(%arg0: i32) -> (i32, i32) {
    %c0_i32 = arith.constant 0 : i32
    %c0_i32_0 = arith.constant 0 : i32
    %c0_i32_1 = arith.constant 0 : i32
    return %c0_i32, %c0_i32_0 : i32, i32
  }
  func.func @transform_4(%arg0: i32) -> (i32, i32, i32) {
    %c0_i32 = arith.constant 0 : i32
    %c0_i32_0 = arith.constant 0 : i32
    %c0_i32_1 = arith.constant 0 : i32
    return %arg0, %c0_i32, %c0_i32_0 : i32, i32, i32
  }
}

</mosaic_0001>

<bundles_post_ra>
// kernel: resnet_block.1
= control target key start
LH: loop header
LB: loop body
LE: loop exit
PB: predicated region body
PF: predicated region fallthrough
CT: control target
= control target key end

     0   :  { %s4199_s15 = smov 0   ;;  %s6167_s0 = inlined_call_operand.vmem [shape: f32[2,4,256], index: 0, kind: input, shape index: {}]   ;;  %s6168_s1 = inlined_call_operand.vmem [shape: f32[9,4,4,1], index: 1, kind: input, shape index: {}]   ;;  %s6169_s2 = inlined_call_operand.vmem [shape: f32[9,4,4,1], index: 2, kind: input, shape index: {}]   ;;  %s6170_s3 = inlined_call_operand.vmem [shape: f32[2,256], index: 3, kind: input, shape index: {}]   ;;  %s6171_s4 = inlined_call_operand.vmem [shape: f32[2,4,256], index: 4, kind: output, shape index: {}]  }
   0x1 LB: > { %s4035_s16 = sadd.s32 4294967295, %s4156_s15   ;;  %p4039_p0 = scmp.ge.s32.totalorder %s4156_s15, 1  ;;  %s4156_s15 = sphi %s4199_s15, %s14_s15  }
   0x2   : > { %p162_p1 = scmp.lt.s32.totalorder %s4156_s15, 3 }
   0x4   : > { %p163_p2 = pnand %p4039_p0, %p162_p1 }
   0x6   : > { %166 = sbr.rel (%p163_p2) target bundleno = 1531 (0x5fb), region = 36 }
   0xd   : > { %v4049_v0 = vld [vmem:[%s6168_s1 + $0x14] sm:$0xf]  ;;  %p188_p3 = scmp.lt.s32.totalorder %s4035_s16, 1  ;;  %v221_v1 = vlaneseq  ;;  %v4158_v2 = vmov 0   ;;  %v4050_v3 = vld [vmem:[%s6168_s1 + $0x18] sm:$0xf] }
   0xe   : > { %4144 = vset.pattern.permute.xlu1 %v4158_v2  ;;  %4143 = vset.pattern.permute.xlu0 %v4158_v2  ;;  %v4044_v5 = vld [vmem:[%s6170_s3 + $0x1] ss:$2 sm:$0x3]  ;;  %s4159_s27 = smov 17   ;;  %v4051_v9 = vld [vmem:[%s6168_s1 + $0x1c] sm:$0xf] }
   0xf   : > { %409 = vperm.xlu1 %4144, %v4049_v0   ;;  %s6275_s16 = smov (!%p188_p3, %s4035_s16), 1  ;;  %v4215_v4 = vshrl.u32 %v221_v1, 7  ;;  %v4048_v12 = vld [vmem:[%s6168_s1 + $0x10] sm:$0xf]  ;;  %v4052_v13 = vld [vmem:[%s6168_s1 + $0x20] sm:$0xf] }
  0x10   : > { %s4117_s21 = sshll.u32 %s6275_s16, 3  ;;  %v199_v15 = vld [vmem:[%s6170_s3] ss:$2 sm:$0x3]  ;;  %s4160_s10 = smov 2   ;;  %vm202_vm0 = vcmask 134144  }
  0x11   : > { %s4226_s26 = scalar_lea.vmem %s6167_s0, %s4117_s21  ;;  %v4229_v6 = vsub.s32 0, %v4215_v4  ;;  %v4232_v7 = vsub.s32 1, %v4215_v4  ;;  %v4054_v18 = vld [vmem:[%s6168_s1 + $0x28] sm:$0xf]  ;;  %vm204_vm1 = vcmask 273544   ;;  %v4161_v20 = vmov 0.0  }
  0x12   : > { %v198_v8 = vld [vmem:[%s4226_s26] sm:$0xff]  ;;  %203 = vst.msk [vmem:[#allocation2] sm:$0xf] %vm202_vm0, %v4161_v20  ;;  %v4055_v22 = vld [vmem:[%s6168_s1 + $0x2c] sm:$0xf]  ;;  %s4162_s19 = smov 16  }
  0x13   : > { %461 = vperm.xlu1 %4144, %v4050_v3   ;;  %207 = vrot.lane.b32.xlu0 %v198_v8, %s4159_s27  ;;  %v565_v10 = vrot.slane %v4044_v5, %v4229_v6  ;;  %v569_v11 = vrot.slane %v4044_v5, %v4232_v7  ;;  %v224_v16 = vrot.slane %v199_v15, %v4229_v6  ;;  %v4053_v19 = vld [vmem:[%s6168_s1 + $0x24] sm:$0xf]  ;;  %v4057_v23 = vld [vmem:[%s6168_s1 + $0x34] sm:$0xf]  ;;  %v4056_v24 = vld [vmem:[%s6168_s1 + $0x30] sm:$0xf] }
  0x14   : > { %v228_v17 = vrot.slane %v199_v15, %v4232_v7  ;;  %205 = vst.msk [vmem:[#allocation2 + $0x8] sm:$0xf] %vm204_vm1, %v4161_v20  ;;  %v4059_v25 = vld [vmem:[%s6168_s1 + $0x3c] sm:$0xf]  ;;  %v4058_v26 = vld [vmem:[%s6168_s1 + $0x38] sm:$0xf] }
  0x15   : > { %v4247_v14 = vcombine.low %v565_v10, %v569_v11  ;;  %v4061_v27 = vld [vmem:[%s6168_s1 + $0x44] sm:$0xf]  ;;  %v4060_v28 = vld [vmem:[%s6168_s1 + $0x40] sm:$0xf]  ;;  %v4063_v29 = vld [vmem:[%s6168_s1 + $0x4c] sm:$0xf] }
  0x16   : > { %v4262_v21 = vcombine.low %v224_v16, %v228_v17  ;;  %v4062_v30 = vld [vmem:[%s6168_s1 + $0x48] sm:$0xf]  ;;  %v4064_v31 = vld [vmem:[%s6168_s1 + $0x50] sm:$0xf]  ;;  %s4163_s17 = smov 18   ;;  %s4164_s25 = smov 32  }
  0x17   : > { %513 = vperm.xlu1 %4144, %v4051_v9   ;;  %354 = vperm.xlu0 %4143, %v4048_v12   ;;  %v4066_v32 = vld [vmem:[%s6168_s1 + $0x58] sm:$0xf]  ;;  %v4065_v33 = vld [vmem:[%s6168_s1 + $0x54] sm:$0xf]  ;;  %v4067_v34 = vld [vmem:[%s6168_s1 + $0x5c] sm:$0xf] }
  0x18   : > { %6198 = vst [vmem:[#allocation3_spill] sm:$0xff] %v4262_v21  ;;  %v4069_v35 = vld [vmem:[%s6168_s1 + $0x64] sm:$0xf]  ;;  %v4068_v36 = vld [vmem:[%s6168_s1 + $0x60] sm:$0xf]  ;;  %s4165_s29 = smov 34  }
  0x19   : > { %v4071_v37 = vld [vmem:[%s6168_s1 + $0x6c] sm:$0xf]  ;;  %v4070_v38 = vld [vmem:[%s6168_s1 + $0x68] sm:$0xf]  ;;  %v4073_v39 = vld [vmem:[%s6168_s1 + $0x74] sm:$0xf] }
  0x1a   : > { %v4072_v40 = vld [vmem:[%s6168_s1 + $0x70] sm:$0xf]  ;;  %v232_v41 = vld [vmem:[%s6168_s1] sm:$0xf]  ;;  %v4074_v42 = vld [vmem:[%s6168_s1 + $0x78] sm:$0xf] }
  0x1b   : > { %584 = vperm.xlu1 %4144, %v4052_v13   ;;  %571 = vrot.lane.b32.xlu0 %v4247_v14, %s4160_s10  ;;  %v4075_v43 = vld [vmem:[%s6168_s1 + $0x7c] sm:$0xf]  ;;  %v4045_v44 = vld [vmem:[%s6168_s1 + $0x4] sm:$0xf]  ;;  %v4046_v45 = vld [vmem:[%s6168_s1 + $0x8] sm:$0xf] }
  0x1c   : > { %v4047_v46 = vld [vmem:[%s6168_s1 + $0xc] sm:$0xf]  ;;  %v4076_v47 = vld [vmem:[%s6168_s1 + $0x80] sm:$0xf]  ;;  %v4078_v48 = vld [vmem:[%s6168_s1 + $0x88] sm:$0xf] }
  0x1d   : > { %v4077_v49 = vld [vmem:[%s6168_s1 + $0x84] sm:$0xf]  ;;  %v4079_v50 = vld [vmem:[%s6168_s1 + $0x8c] sm:$0xf]  ;;  %vm214_vm2 = vcmask 1043592   ;;  %vm215_vm3 = vcmask 1047556  }
  0x1e   : > { %vm210_vm4 = vcmask 138240   ;;  %vm4355_vm5 = vmor %vm215_vm3, %vm214_vm2  ;;  %v6199_v52 = vmov 0  ;;  %v4364_v56 = vsub.s32 3, %v4215_v4  ;;  %v4367_v58 = vsub.s32 2, %v4215_v4  ;;  %s4166_s14 = smov 127   ;;  %s4168_s18 = smov 112  }
  0x1f   : > { %691 = vperm.xlu1 %4144, %v4054_v18   ;;  %639 = vperm.xlu0 %4143, %v4053_v19   ;;  %v6200_v52 = vsel %vm4355_vm5, 4294967295, %v6199_v52  ;;  %v4374_v0 = vsub.s32 4, %v4215_v4  ;;  %v4394_v17 = vsub.s32 6, %v4215_v4  ;;  %vm574_vm6 = vcmask 15360   ;;  %s4170_s20 = smov 110   ;;  %s4171_s22 = smov 96  }
  0x20   : > { %6201 = vst [vmem:[#allocation4_spill] sm:$0xff] %v6200_v52  ;;  %vm796_vm7 = vcmask 130048   ;;  %vm1229_vm8 = vcmask 146432   ;;  %vm1451_vm9 = vcmask 261120   ;;  %s4172_s23 = smov 95   ;;  %vm1884_vm10 = vcmask 277504  }
  0x21   : > { %6202 = vst [vmem:[#allocation5_spill] sm:$0xff] %v4374_v0  ;;  %6204 = vst [vmem:[#allocation7_spill] sm:$0xff] %v4394_v17  ;;  %s4173_s24 = smov 94   ;;  %vm398_vm11 = vcmask 1039360   ;;  %vm628_vm12 = vcmask 1031168   ;;  %vm850_vm13 = vcmask 916480  }
  0x22   : > { %vm1063_vm14 = vcmask 908288   ;;  %vm1283_vm15 = vcmask 900096   ;;  %vm1505_vm1 = vcmask 785408   ;;  %vm1718_vm2 = vcmask 777216  }
  0x23   : > { %793 = vrot.lane.b32.xlu1 %v4262_v21, %s4162_s19  ;;  %743 = vperm.xlu0 %4143, %v4055_v22   ;;  %s4169_s19 = smov 111   ;;  %vm1938_vm3 = vcmask 769024  }
  0x27   : > { %861 = vperm.xlu1 %4144, %v4057_v23   ;;  %806 = vperm.xlu0 %4143, %v4056_v24  }
  0x2b   : > { %965 = vperm.xlu1 %4144, %v4059_v25   ;;  %913 = vperm.xlu0 %4143, %v4058_v26  }
  0x2f   : > { %1074 = vperm.xlu1 %4144, %v4061_v27   ;;  %1019 = vperm.xlu0 %4143, %v4060_v28  }
  0x33   : > { %1178 = vperm.xlu1 %4144, %v4063_v29   ;;  %1126 = vperm.xlu0 %4143, %v4062_v30  }
  0x37   : > { %1239 = vperm.xlu1 %4144, %v4064_v31   ;;  %1226 = vrot.lane.b32.xlu0 %v4247_v14, %s4163_s17  ;;  %s4167_s17 = smov 126  }
  0x3b   : > { %1346 = vperm.xlu1 %4144, %v4066_v32   ;;  %1294 = vperm.xlu0 %4143, %v4065_v33  }
  0x3f   : > { %1448 = vrot.lane.b32.xlu1 %v4262_v21, %s4164_s25  ;;  %1398 = vperm.xlu0 %4143, %v4067_v34  }
  0x43   : > { %1516 = vperm.xlu1 %4144, %v4069_v35   ;;  %1461 = vperm.xlu0 %4143, %v4068_v36   ;;  %v4431_v35 = vsub.s32 7, %v4215_v4 }
  0x45   : > { %6206 = vst [vmem:[#allocation9_spill] sm:$0xff] %v4431_v35 }
  0x47   : > { %1620 = vperm.xlu1 %4144, %v4071_v37   ;;  %1568 = vperm.xlu0 %4143, %v4070_v38  }
  0x4b   : > { %1729 = vperm.xlu1 %4144, %v4073_v39   ;;  %1674 = vperm.xlu0 %4143, %v4072_v40  }
  0x4f   : > { %235 = vperm.xlu1 %4144, %v232_v41   ;;  %1781 = vperm.xlu0 %4143, %v4074_v42  }
  0x53   : > { %1833 = vperm.xlu1 %4144, %v4075_v43   ;;  %265 = vperm.xlu0 %4143, %v4045_v44  }
  0x57   : > { %294 = vperm.xlu1 %4144, %v4046_v45   ;;  %1881 = vrot.lane.b32.xlu0 %v4247_v14, %s4165_s29  ;;  %v4388_v14 = vsub.s32 5, %v4215_v4 }
  0x59   : > { %6203 = vst [vmem:[#allocation6_spill] sm:$0xff] %v4388_v14 }
  0x5b   : > { %323 = vperm.xlu1 %4144, %v4047_v46   ;;  %1894 = vperm.xlu0 %4143, %v4076_v47  }
  0x5f   : > { %2001 = vperm.xlu1 %4144, %v4078_v48   ;;  %1949 = vperm.xlu0 %4143, %v4077_v49  }
  0x63   : > { %2053 = vperm.xlu0 %4143, %v4079_v50  }
  0x85   : > { %v208_v51 = vpop.permute.xlu0 %207 }
  0x86   : > { %v209_v53 = vrot.slane %v208_v51, 4 }
  0x88   : > { %v211_v54 = vsel %vm210_vm4, %v209_v53, %v208_v51  ;;  %218 = vst.msk [vmem:[#allocation2 + $0x8] sm:$0xf] %vm202_vm0, %v209_v53 }
  0x89   : > { %217 = vst.msk [vmem:[#allocation2] sm:$0xff] %vm4355_vm5, %v211_v54 }
  0x8e   : > { %v410_v55 = vpop.permute.xlu1 %409 }
  0x8f   : > { %v349_v57 = vld [vmem:[#allocation2 + $0x8] sm:$0xf] }
  0x90   : > { %v423_v59 = vrot.slane %v349_v57, %v4232_v7  ;;  %v370_v61 = vrot.slane %v349_v57, %v4229_v6  ;;  %v527_v63 = vrot.slane %v349_v57, %v4364_v56  ;;  %v4376_v1 = vld [vmem:[#allocation2] sm:$0xff]  ;;  %v475_v2 = vrot.slane %v349_v57, %v4367_v58 }
  0x91   : > { %v366_v11 = vrot.slane %v4376_v1, %v4374_v0  ;;  %v415_v16 = vrot.slane %v4376_v1, %v4232_v7  ;;  %v362_v19 = vrot.slane %v4376_v1, %v4229_v6  ;;  %v419_v24 = vrot.slane %v4376_v1, %v4388_v14 }
  0x92   : > { %v462_v60 = vpop.permute.xlu1 %461  ;;  %v438_v62 = vrot.slane %v423_v59, %v4232_v7  ;;  %v385_v8 = vrot.slane %v370_v61, %v4229_v6  ;;  %v542_v10 = vrot.slane %v527_v63, %v4364_v56  ;;  %v490_v13 = vrot.slane %v475_v2, %v4367_v58  ;;  %v792_v59 = vld [vmem:[#allocation2 + $0x8] sm:$0xf] }
  0x93   : > { %v4403_v22 = vrot.slane %v366_v11, %v4229_v6  ;;  %v4411_v27 = vrot.slane %v415_v16, %v4232_v7  ;;  %v471_v28 = vrot.slane %v4376_v1, %v4394_v17  ;;  %v4417_v29 = vrot.slane %v362_v19, %v4229_v6 }
  0x94   : > { %v441_v3 = vmul.f32 %v438_v62, %v410_v55  ;;  %v493_v23 = vmul.f32 %v490_v13, %v462_v60  ;;  %v4426_v33 = vrot.slane %v419_v24, %v4232_v7  ;;  %v467_v34 = vrot.slane %v4376_v1, %v4367_v58 }
  0x95   : > { %v439_v37 = vmul.f32 %v4411_v27, %v410_v55  ;;  %v4436_v38 = vrot.slane %v471_v28, %v4367_v58  ;;  %v519_v39 = vrot.slane %v4376_v1, %v4364_v56  ;;  %v523_v41 = vrot.slane %v4376_v1, %v4431_v35 }
  0x96   : > { %v4379_v5 = vpop.permute.xlu1 %513  ;;  %449 = vrot.lane.b32.xlu0 %v441_v3, %s4166_s14  ;;  %v355_v9 = vpop.permute.xlu0 %354  ;;  %v440_v40 = vmul.f32 %v4426_v33, %v410_v55  ;;  %v4444_v4 = vrot.slane %v467_v34, %v4367_v58 }
  0x97   : > { %v388_v12 = vmul.f32 %v385_v8, %v355_v9  ;;  %v545_v15 = vmul.f32 %v542_v10, %v4379_v5  ;;  %v387_v26 = vmul.f32 %v4403_v22, %v355_v9  ;;  %v386_v32 = vmul.f32 %v4417_v29, %v355_v9 }
  0x98   : > { %v492_v44 = vmul.f32 %v4436_v38, %v462_v60  ;;  %v4452_v45 = vrot.slane %v519_v39, %v4364_v56  ;;  %v491_v49 = vmul.f32 %v4444_v4, %v462_v60  ;;  %v4464_v50 = vrot.slane %v523_v41, %v4364_v56 }
  0x99   : > { %396 = vrot.lane.b32.xlu1 %v388_v12, %s4166_s14 }
  0x9a   : > { %v4396_v18 = vpop.permute.xlu1 %584  ;;  %553 = vrot.lane.b32.xlu0 %v545_v15, %s4166_s14  ;;  %v572_v20 = vpop.permute.xlu0 %571  ;;  %v543_v54 = vmul.f32 %v4452_v45, %v4379_v5  ;;  %v544_v62 = vmul.f32 %v4464_v50, %v4379_v5 }
  0x9b   : > { %v4407_v25 = vrot.slane %v572_v20, 4 }
  0x9d   : > { %6205 = vst [vmem:[#allocation8_spill] sm:$0xff] %v4407_v25  ;;  %501 = vrot.lane.b32.xlu1 %v493_v23, %s4166_s14  ;;  %v579_v36 = vmul.f32 %v4407_v25, %v349_v57  ;;  %v4456_v47 = vsel %vm574_vm6, %v4407_v25, %v572_v20  ;;  %vm2101_vm6 = vcmask 1043456  }
  0x9e   : > { %v4419_v30 = vpop.permute.xlu1 %691  ;;  %394 = vrot.lane.b32.xlu0 %v387_v26, %s4166_s14  ;;  %v4422_v31 = vpop.permute.xlu0 %639  ;;  %6207 = vst [vmem:[#allocation10_spill] sm:$0xff] %v4456_v47  ;;  %v4469_v53 = vmul.f32 %v4456_v47, %v4376_v1 }
  0x9f   : > { %v653_v46 = vrot.slane %v579_v36, %v4232_v7  ;;  %v600_v51 = vrot.slane %v579_v36, %v4229_v6  ;;  %v757_v57 = vrot.slane %v579_v36, %v4364_v56  ;;  %v705_v2 = vrot.slane %v579_v36, %v4367_v58 }
  0xa0   : > { %v596_v9 = vrot.slane %v4469_v53, %v4374_v0  ;;  %v645_v16 = vrot.slane %v4469_v53, %v4232_v7  ;;  %v592_v24 = vrot.slane %v4469_v53, %v4229_v6 }
  0xa1   : > { %392 = vrot.lane.b32.xlu1 %v386_v32, %s4166_s14  ;;  %v668_v55 = vrot.slane %v653_v46, %v4232_v7  ;;  %v615_v63 = vrot.slane %v600_v51, %v4229_v6  ;;  %v772_v8 = vrot.slane %v757_v57, %v4364_v56  ;;  %v720_v5 = vrot.slane %v705_v2, %v4367_v58 }
  0xa2   : > { %445 = vrot.lane.b32.xlu0 %v439_v37, %s4166_s14  ;;  %v794_v42 = vpop.permute.xlu1 %793  ;;  %v4448_v43 = vpop.permute.xlu0 %743  ;;  %v611_v15 = vrot.slane %v596_v9, %v4229_v6  ;;  %v660_v28 = vrot.slane %v645_v16, %v4232_v7  ;;  %v701_v32 = vrot.slane %v4469_v53, %v4394_v17  ;;  %v607_v39 = vrot.slane %v592_v24, %v4229_v6 }
  0xa3   : > { %v4460_v48 = vrot.slane %v794_v42, 4  ;;  %v671_v3 = vmul.f32 %v668_v55, %v4422_v31  ;;  %v618_v10 = vmul.f32 %v615_v63, %v4396_v18  ;;  %v775_v13 = vmul.f32 %v772_v8, %v4448_v43 }
  0xa4   : > { %v723_v20 = vmul.f32 %v720_v5, %v4419_v30  ;;  %v617_v26 = vmul.f32 %v611_v15, %v4396_v18  ;;  %v749_v46 = vrot.slane %v4469_v53, %v4364_v56  ;;  %v616_v51 = vmul.f32 %v607_v39, %v4396_v18 }
  0xa5   : > { %447 = vrot.lane.b32.xlu1 %v440_v40, %s4166_s14  ;;  %6208 = vst [vmem:[#allocation11_spill] sm:$0xff] %v4460_v48  ;;  %v4480_v61 = vmul.f32 %v4460_v48, %v792_v59  ;;  %v4515_v34 = vsel %vm796_vm7, %v4460_v48, %v794_v42  ;;  %v649_v40 = vrot.slane %v4469_v53, %v4388_v14 }
  0xa6   : > { %499 = vrot.lane.b32.xlu0 %v492_v44, %s4166_s14  ;;  %v4476_v60 = vpop.permute.xlu0 %806  ;;  %v4504_v19 = vpop.permute.xlu1 %861  ;;  %6209 = vst [vmem:[#allocation12_spill] sm:$0xff] %v4515_v34  ;;  %v4527_v41 = vmul.f32 %v4515_v34, %v4376_v1  ;;  %v669_v42 = vmul.f32 %v660_v28, %v4422_v31  ;;  %v716_v44 = vrot.slane %v701_v32, %v4367_v58 }
  0xa7   : > { %v822_v11 = vrot.slane %v4480_v61, %v4229_v6  ;;  %v697_v55 = vrot.slane %v4469_v53, %v4367_v58  ;;  %v753_v8 = vrot.slane %v4469_v53, %v4431_v35 }
  0xa8   : > { %v722_v59 = vmul.f32 %v716_v44, %v4419_v30  ;;  %v818_v63 = vrot.slane %v4527_v41, %v4374_v0  ;;  %v867_v5 = vrot.slane %v4527_v41, %v4232_v7  ;;  %v814_v53 = vrot.slane %v4527_v41, %v4229_v6 }
  0xa9   : > { %497 = vrot.lane.b32.xlu1 %v491_v49, %s4166_s14  ;;  %v837_v23 = vrot.slane %v822_v11, %v4229_v6  ;;  %v923_v39 = vrot.slane %v4527_v41, %v4394_v17  ;;  %v919_v44 = vrot.slane %v4527_v41, %v4367_v58 }
  0xaa   : > { %549 = vrot.lane.b32.xlu0 %v543_v54, %s4166_s14  ;;  %v4496_v12 = vpop.permute.xlu0 %913  ;;  %v4533_v49 = vpop.permute.xlu1 %965  ;;  %v664_v54 = vrot.slane %v649_v40, %v4232_v7  ;;  %v882_v16 = vrot.slane %v867_v5, %v4232_v7  ;;  %v829_v24 = vrot.slane %v814_v53, %v4229_v6 }
  0xab   : > { %v840_v37 = vmul.f32 %v837_v23, %v4476_v60 }
  0xac   : > { %v670_v18 = vmul.f32 %v664_v54, %v4422_v31  ;;  %v891_v32 = vmul.f32 %v882_v16, %v4504_v19  ;;  %v971_v54 = vrot.slane %v4527_v41, %v4364_v56 }
  0xad   : > { %551 = vrot.lane.b32.xlu1 %v544_v62, %s4166_s14  ;;  %v764_v62 = vrot.slane %v749_v46, %v4364_v56 }
  0xae   : > { %679 = vrot.lane.b32.xlu0 %v671_v3, %s4167_s17  ;;  %v4518_v36 = vpop.permute.xlu0 %1019  ;;  %v4549_v2 = vpop.permute.xlu1 %1074  ;;  %v712_v3 = vrot.slane %v697_v55, %v4367_v58 }
  0xaf   : > { %v773_v9 = vmul.f32 %v764_v62, %v4448_v43  ;;  %v927_v62 = vrot.slane %v4480_v61, %v4367_v58 }
  0xb0   : > { %v721_v31 = vmul.f32 %v712_v3, %v4419_v30  ;;  %v979_v3 = vrot.slane %v4480_v61, %v4364_v56 }
  0xb1   : > { %626 = vrot.lane.b32.xlu1 %v618_v10, %s4167_s17  ;;  %v833_v10 = vrot.slane %v818_v63, %v4229_v6 }
  0xb2   : > { %783 = vrot.lane.b32.xlu0 %v775_v13, %s4167_s17  ;;  %v4541_v57 = vpop.permute.xlu0 %1126  ;;  %v768_v13 = vrot.slane %v753_v8, %v4364_v56  ;;  %v4571_v23 = vpop.permute.xlu1 %1178 }
  0xb3   : > { %v839_v15 = vmul.f32 %v833_v10, %v4476_v60  ;;  %v975_v10 = vrot.slane %v4527_v41, %v4431_v35 }
  0xb4   : > { %v774_v30 = vmul.f32 %v768_v13, %v4448_v43  ;;  %v838_v43 = vmul.f32 %v829_v24, %v4476_v60  ;;  %v994_v13 = vrot.slane %v979_v3, %v4364_v56  ;;  %v1052_v24 = vmul.f32 %v4518_v36, %v4403_v22 }
  0xb5   : > { %731 = vrot.lane.b32.xlu1 %v723_v20, %s4167_s17  ;;  %v875_v20 = vrot.slane %v4480_v61, %v4232_v7 }
  0xb6   : > { %624 = vrot.lane.b32.xlu0 %v617_v26, %s4167_s17  ;;  %v4560_v11 = vpop.permute.xlu0 %1226  ;;  %v871_v26 = vrot.slane %v4527_v41, %v4388_v14  ;;  %v4587_v40 = vpop.permute.xlu1 %1239  ;;  %v997_v16 = vmul.f32 %v994_v13, %v4533_v49  ;;  %v1014_v41 = vld [vmem:[#allocation2 + $0x8] sm:$0xf] }
  0xb7   : > { %v1192_v3 = vrot.slane %v1014_v41, %v4364_v56 }
  0xb9   : > { %848 = vrot.lane.b32.xlu1 %v840_v37, %s4168_s18  ;;  %v890_v37 = vrot.slane %v875_v20, %v4232_v7  ;;  %v1207_v13 = vrot.slane %v1192_v3, %v4364_v56 }
  0xba   : > { %675 = vrot.lane.b32.xlu0 %v669_v42, %s4167_s17  ;;  %v4579_v28 = vpop.permute.xlu0 %1294  ;;  %v886_v42 = vrot.slane %v871_v26, %v4232_v7  ;;  %v4609_v8 = vpop.permute.xlu1 %1346 }
  0xbb   : > { %v893_v46 = vmul.f32 %v890_v37, %v4504_v19  ;;  %v1051_v37 = vmul.f32 %v4518_v36, %v4417_v29 }
  0xbc   : > { %v892_v60 = vmul.f32 %v886_v42, %v4504_v19 }
  0xbd   : > { %622 = vrot.lane.b32.xlu1 %v616_v51, %s4167_s17  ;;  %v938_v51 = vrot.slane %v923_v39, %v4367_v58 }
  0xbe   : > { %729 = vrot.lane.b32.xlu0 %v722_v59, %s4167_s17  ;;  %v4598_v55 = vpop.permute.xlu0 %1398  ;;  %v934_v59 = vrot.slane %v919_v44, %v4367_v58  ;;  %v4623_v61 = vpop.permute.xlu1 %1448 }
  0xbf   : > { %v944_v63 = vmul.f32 %v938_v51, %v4496_v12 }
  0xc0   : > { %v943_v19 = vmul.f32 %v934_v59, %v4496_v12 }
  0xc1   : > { %677 = vrot.lane.b32.xlu1 %v670_v18, %s4167_s17  ;;  %v986_v18 = vrot.slane %v971_v54, %v4364_v56 }
  0xc2   : > { %779 = vrot.lane.b32.xlu0 %v773_v9, %s4167_s17  ;;  %v942_v9 = vrot.slane %v927_v62, %v4367_v58  ;;  %v4617_v5 = vpop.permute.xlu0 %1461  ;;  %v4635_v26 = vpop.permute.xlu1 %1516  ;;  %v1105_v62 = vmul.f32 %v4549_v2, %v4426_v33 }
  0xc4   : > { %v945_v53 = vmul.f32 %v942_v9, %v4496_v12  ;;  %v1035_v12 = vrot.slane %v1014_v41, %v4229_v6  ;;  %v1208_v9 = vmul.f32 %v4571_v23, %v4452_v45 }
  0xc5   : > { %727 = vrot.lane.b32.xlu1 %v721_v31, %s4167_s17  ;;  %v995_v31 = vmul.f32 %v986_v18, %v4533_v49 }
  0xc6   : > { %846 = vrot.lane.b32.xlu0 %v839_v15, %s4168_s18  ;;  %v990_v15 = vrot.slane %v975_v10, %v4364_v56  ;;  %v4629_v20 = vpop.permute.xlu0 %1568  ;;  %v1050_v42 = vrot.slane %v1035_v12, %v4229_v6 }
  0xc8   : > { %v1053_v51 = vmul.f32 %v1050_v42, %v4518_v36  ;;  %v1157_v36 = vmul.f32 %v4541_v57, %v4436_v38 }
  0xc9   : > { %781 = vrot.lane.b32.xlu1 %v774_v30, %s4167_s17  ;;  %v996_v30 = vmul.f32 %v990_v15, %v4533_v49  ;;  %v1104_v49 = vmul.f32 %v4549_v2, %v4411_v27 }
  0xca   : > { %897 = vrot.lane.b32.xlu0 %v891_v32, %s4168_s18  ;;  %v1088_v32 = vrot.slane %v1014_v41, %v4232_v7  ;;  %v4643_v39 = vpop.permute.xlu0 %1674 }
  0xcc   : > { %v1103_v44 = vrot.slane %v1088_v32, %v4232_v7 }
  0xcd   : > { %844 = vrot.lane.b32.xlu1 %v838_v43, %s4168_s18  ;;  %v4648_v43 = vrot.slane %v4560_v11, 4 }
  0xce   : > { %901 = vrot.lane.b32.xlu0 %v893_v46, %s4168_s18  ;;  %v4654_v46 = vpop.permute.xlu1 %1620  ;;  %v1106_v54 = vmul.f32 %v1103_v44, %v4549_v2  ;;  %v4663_v59 = vpop.permute.xlu0 %1781  ;;  %v1156_v2 = vmul.f32 %v4541_v57, %v4444_v4 }
  0xcf   : > { %6210 = vst [vmem:[#allocation13_spill] sm:$0xff] %v4648_v43 }
  0xd1   : > { %899 = vrot.lane.b32.xlu1 %v892_v60, %s4168_s18  ;;  %v4660_v60 = vsel %vm1229_vm8, %v4648_v43, %v4560_v11  ;;  %v1140_v11 = vrot.slane %v1014_v41, %v4367_v58 }
  0xd2   : > { %951 = vrot.lane.b32.xlu0 %v944_v63, %s4168_s18  ;;  %6211 = vst [vmem:[#allocation14_spill] sm:$0xff] %v4660_v60  ;;  %v4670_v63 = vmul.f32 %v4660_v60, %v4376_v1  ;;  %v4674_v18 = vpop.permute.xlu1 %1729 }
  0xd4   : > { %v1251_v10 = vrot.slane %v4670_v63, %v4374_v0  ;;  %v1300_v32 = vrot.slane %v4670_v63, %v4232_v7 }
  0xd5   : > { %949 = vrot.lane.b32.xlu1 %v943_v19, %s4168_s18  ;;  %v4682_v19 = vpop.permute.xlu0 %265 }
  0xd6   : > { %1001 = vrot.lane.b32.xlu0 %v995_v31, %s4168_s18  ;;  %v1155_v31 = vrot.slane %v1140_v11, %v4367_v58  ;;  %v4693_v15 = vpop.permute.xlu1 %235  ;;  %v1266_v12 = vrot.slane %v1251_v10, %v4229_v6  ;;  %v1315_v44 = vrot.slane %v1300_v32, %v4232_v7  ;;  %v4728_v10 = vrot.slane %v4623_v61, 4 }
  0xd8   : > { %v1272_v42 = vmul.f32 %v1266_v12, %v4587_v40  ;;  %v1324_v3 = vmul.f32 %v1315_v44, %v4579_v28  ;;  %6212 = vst [vmem:[#allocation15_spill] sm:$0xff] %v4728_v10 }
  0xd9   : > { %953 = vrot.lane.b32.xlu1 %v945_v53, %s4168_s18  ;;  %v1234_v53 = vmul.f32 %v4648_v43, %v1014_v41  ;;  %v1209_v41 = vmul.f32 %v4571_v23, %v4464_v50 }
  0xda   : > { %1005 = vrot.lane.b32.xlu0 %v997_v16, %s4168_s18  ;;  %v1158_v16 = vmul.f32 %v1155_v31, %v4541_v57 }
  0xdd   : > { %1003 = vrot.lane.b32.xlu1 %v996_v30, %s4168_s18  ;;  %v1247_v30 = vrot.slane %v4670_v63, %v4229_v6 }
  0xde   : > { %1059 = vrot.lane.b32.xlu0 %v1052_v24, %s4169_s19  ;;  %v1210_v24 = vmul.f32 %v1207_v13, %v4571_v23 }
  0xdf   : > { %v1262_v57 = vrot.slane %v1247_v30, %v4229_v6  ;;  %v1352_v30 = vrot.slane %v4670_v63, %v4367_v58 }
  0xe1   : > { %1057 = vrot.lane.b32.xlu1 %v1051_v37, %s4169_s19  ;;  %v4703_v37 = vpop.permute.xlu0 %1881 }
  0xe2   : > { %1110 = vrot.lane.b32.xlu0 %v1104_v49, %s4169_s19  ;;  %v1255_v49 = vrot.slane %v1234_v53, %v4229_v6 }
  0xe4   : > { %v1270_v23 = vrot.slane %v1255_v49, %v4229_v6 }
  0xe5   : > { %1061 = vrot.lane.b32.xlu1 %v1053_v51, %s4169_s19  ;;  %v1308_v51 = vrot.slane %v1234_v53, %v4232_v7  ;;  %v4721_v11 = vpop.permute.xlu0 %1894 }
  0xe6   : > { %1114 = vrot.lane.b32.xlu0 %v1106_v54, %s4169_s19  ;;  %v4713_v54 = vpop.permute.xlu1 %1833  ;;  %v1273_v13 = vmul.f32 %v1270_v23, %v4587_v40 }
  0xe9   : > { %1112 = vrot.lane.b32.xlu1 %v1105_v62, %s4169_s19  ;;  %v1271_v62 = vmul.f32 %v1262_v57, %v4587_v40  ;;  %v4747_v57 = vpop.permute.xlu0 %1949  ;;  %v1360_v40 = vrot.slane %v1234_v53, %v4367_v58 }
  0xea   : > { %1164 = vrot.lane.b32.xlu0 %v1157_v36, %s4169_s19  ;;  %v1304_v36 = vrot.slane %v4670_v63, %v4388_v14  ;;  %v4732_v31 = vpop.permute.xlu1 %294 }
  0xed   : > { %1162 = vrot.lane.b32.xlu1 %v1156_v2, %s4169_s19  ;;  %v1323_v2 = vrot.slane %v1308_v51, %v4232_v7  ;;  %v1412_v51 = vrot.slane %v1234_v53, %v4364_v56 }
  0xee   : > { %1214 = vrot.lane.b32.xlu0 %v1208_v9, %s4169_s19  ;;  %v1356_v9 = vrot.slane %v4670_v63, %v4394_v17  ;;  %v4760_v23 = vpop.permute.xlu1 %323 }
  0xef   : > { %v1326_v12 = vmul.f32 %v1323_v2, %v4579_v28  ;;  %v1427_v2 = vrot.slane %v1412_v51, %v4364_v56 }
  0xf0   : > { %v1371_v32 = vrot.slane %v1356_v9, %v4367_v58 }
  0xf1   : > { %1166 = vrot.lane.b32.xlu1 %v1158_v16, %s4169_s19  ;;  %v1319_v16 = vrot.slane %v1304_v36, %v4232_v7  ;;  %v1408_v36 = vrot.slane %v4670_v63, %v4431_v35 }
  0xf2   : > { %1218 = vrot.lane.b32.xlu0 %v1210_v24, %s4169_s19  ;;  %v1404_v24 = vrot.slane %v4670_v63, %v4364_v56 }
  0xf3   : > { %v1325_v49 = vmul.f32 %v1319_v16, %v4579_v28  ;;  %v1375_v28 = vrot.slane %v1360_v40, %v4367_v58  ;;  %v1447_v16 = vld [vmem:[#allocation2 + $0x8] sm:$0xf]  ;;  %v1430_v40 = vmul.f32 %v1427_v2, %v4598_v55 }
  0xf4   : > { %v1456_v63 = vmul.f32 %v4728_v10, %v1447_v16 }
  0xf5   : > { %1216 = vrot.lane.b32.xlu1 %v1209_v41, %s4169_s19  ;;  %v4744_v41 = vsel %vm1451_vm9, %v4728_v10, %v4623_v61  ;;  %v1419_v61 = vrot.slane %v1404_v24, %v4364_v56  ;;  %v1423_v24 = vrot.slane %v1408_v36, %v4364_v56 }
  0xf6   : > { %1279 = vrot.lane.b32.xlu0 %v1272_v42, %s4170_s20  ;;  %6213 = vst [vmem:[#allocation16_spill] sm:$0xff] %v4744_v41  ;;  %v1367_v42 = vrot.slane %v1352_v30, %v4367_v58  ;;  %v4755_v44 = vmul.f32 %v4744_v41, %v4376_v1  ;;  %v1378_v30 = vmul.f32 %v1375_v28, %v4609_v8 }
  0xf7   : > { %v1428_v53 = vmul.f32 %v1419_v61, %v4598_v55  ;;  %v1477_v61 = vrot.slane %v1456_v63, %v4229_v6  ;;  %v1530_v36 = vrot.slane %v1456_v63, %v4232_v7 }
  0xf8   : > { %v1473_v9 = vrot.slane %v4755_v44, %v4374_v0 }
  0xf9   : > { %1277 = vrot.lane.b32.xlu1 %v1271_v62, %s4170_s20  ;;  %v1377_v62 = vmul.f32 %v1371_v32, %v4609_v8  ;;  %v4781_v32 = vpop.permute.xlu1 %2001 }
  0xfa   : > { %1330 = vrot.lane.b32.xlu0 %v1324_v3, %s4170_s20  ;;  %v1376_v3 = vmul.f32 %v1367_v42, %v4609_v8  ;;  %v1488_v42 = vrot.slane %v1473_v9, %v4229_v6  ;;  %v1429_v8 = vmul.f32 %v1423_v24, %v4598_v55  ;;  %v1526_v55 = vrot.slane %v4755_v44, %v4388_v14 }
  0xfb   : > { %v1492_v9 = vrot.slane %v1477_v61, %v4229_v6  ;;  %v1545_v24 = vrot.slane %v1530_v36, %v4232_v7  ;;  %v1574_v61 = vrot.slane %v4755_v44, %v4367_v58 }
  0xfc   : > { %v1494_v2 = vmul.f32 %v1488_v42, %v4617_v5  ;;  %v1541_v42 = vrot.slane %v1526_v55, %v4232_v7  ;;  %v1582_v55 = vrot.slane %v1456_v63, %v4367_v58 }
  0xfd   : > { %1281 = vrot.lane.b32.xlu1 %v1273_v13, %s4170_s20  ;;  %v4772_v13 = vpop.permute.xlu0 %2053  ;;  %v1548_v36 = vmul.f32 %v1545_v24, %v4635_v26  ;;  %v1634_v24 = vrot.slane %v1456_v63, %v4364_v56 }
  0xfe   : > { %1334 = vrot.lane.b32.xlu0 %v1326_v12, %s4170_s20  ;;  %v1469_v12 = vrot.slane %v4755_v44, %v4229_v6 }
  0xff   : > { %v1649_v63 = vrot.slane %v1634_v24, %v4364_v56  ;;  %v1669_v24 = vld [vmem:[#allocation2 + $0x8] sm:$0xf] }
 0x101   : > { %1332 = vrot.lane.b32.xlu1 %v1325_v49, %s4170_s20  ;;  %v1522_v49 = vrot.slane %v4755_v44, %v4232_v7 }
 0x102   : > { %1384 = vrot.lane.b32.xlu0 %v1377_v62, %s4170_s20  ;;  %v1484_v62 = vrot.slane %v1469_v12, %v4229_v6 }
 0x104   : > { %v1493_v16 = vmul.f32 %v1484_v62, %v4617_v5 }
 0x105   : > { %1382 = vrot.lane.b32.xlu1 %v1376_v3, %s4170_s20  ;;  %v1537_v3 = vrot.slane %v1522_v49, %v4232_v7 }
 0x106   : > { %1434 = vrot.lane.b32.xlu0 %v1428_v53, %s4170_s20 }
 0x107   : > { %v1546_v12 = vmul.f32 %v1537_v3, %v4635_v26  ;;  %v1626_v3 = vrot.slane %v4755_v44, %v4364_v56 }
 0x108   : > { %v4787_v51 = vpop.permute.xlu0 %449 }
 0x109   : > { %1386 = vrot.lane.b32.xlu1 %v1378_v30, %s4170_s20 }
 0x10a   : > { %1438 = vrot.lane.b32.xlu0 %v1430_v40, %s4170_s20  ;;  %v1578_v40 = vrot.slane %v4755_v44, %v4394_v17 }
 0x10b   : > { %v4794_v28 = vpop.permute.xlu1 %396 }
 0x10c   : > { %v4799_v53 = vpop.permute.xlu0 %553 }
 0x10d   : > { %1436 = vrot.lane.b32.xlu1 %v1429_v8, %s4170_s20  ;;  %v1495_v8 = vmul.f32 %v1492_v9, %v4617_v5  ;;  %v1547_v5 = vmul.f32 %v1541_v42, %v4635_v26  ;;  %v1589_v9 = vrot.slane %v1574_v61, %v4367_v58  ;;  %v1630_v26 = vrot.slane %v4755_v44, %v4431_v35 }
 0x10e   : > { %1501 = vrot.lane.b32.xlu0 %v1494_v2, %s4171_s22  ;;  %v1593_v2 = vrot.slane %v1578_v40, %v4367_v58  ;;  %v1597_v42 = vrot.slane %v1582_v55, %v4367_v58  ;;  %v1652_v55 = vmul.f32 %v1649_v63, %v4654_v46  ;;  %v1706_v63 = vmul.f32 %v4643_v39, %v4417_v29 }
 0x10f   : > { %v4807_v30 = vpop.permute.xlu1 %501 }
 0x110   : > { %v4813_v49 = vpop.permute.xlu0 %394  ;;  %v1599_v40 = vmul.f32 %v1593_v2, %v4629_v20  ;;  %v1645_v2 = vrot.slane %v1630_v26, %v4364_v56  ;;  %v1600_v44 = vmul.f32 %v1597_v42, %v4629_v20  ;;  %v1707_v26 = vmul.f32 %v4643_v39, %v4403_v22 }
 0x111   : > { %1499 = vrot.lane.b32.xlu1 %v1493_v16, %s4171_s22  ;;  %v1743_v42 = vrot.slane %v1669_v24, %v4232_v7 }
 0x112   : > { %1552 = vrot.lane.b32.xlu0 %v1546_v12, %s4171_s22  ;;  %v1641_v12 = vrot.slane %v1626_v3, %v4364_v56 }
 0x113   : > { %v4821_v62 = vpop.permute.xlu1 %392 }
 0x114   : > { %v4827_v41 = vpop.permute.xlu0 %445 }
 0x115   : > { %1503 = vrot.lane.b32.xlu1 %v1495_v8, %s4171_s22  ;;  %v1598_v8 = vmul.f32 %v1589_v9, %v4629_v20  ;;  %v1690_v20 = vrot.slane %v1669_v24, %v4229_v6 }
 0x116   : > { %1556 = vrot.lane.b32.xlu0 %v1548_v36, %s4171_s22  ;;  %v1650_v36 = vmul.f32 %v1641_v12, %v4654_v46  ;;  %v1651_v12 = vmul.f32 %v1645_v2, %v4654_v46 }
 0x117   : > { %v4834_v16 = vpop.permute.xlu1 %447  ;;  %v1705_v2 = vrot.slane %v1690_v20, %v4229_v6 }
 0x118   : > { %v4839_v60 = vpop.permute.xlu0 %499 }
 0x119   : > { %1554 = vrot.lane.b32.xlu1 %v1547_v5, %s4171_s22  ;;  %v1708_v29 = vmul.f32 %v1705_v2, %v4643_v39  ;;  %v1812_v39 = vmul.f32 %v4663_v59, %v4436_v38  ;;  %v1863_v38 = vmul.f32 %v4713_v54, %v4452_v45 }
 0x11a   : > { %1606 = vrot.lane.b32.xlu0 %v1599_v40, %s4171_s22 }
 0x11b   : > { %v4847_v61 = vpop.permute.xlu1 %497 }
 0x11c   : > { %v4851_v3 = vpop.permute.xlu0 %549 }
 0x11d   : > { %1604 = vrot.lane.b32.xlu1 %v1598_v8, %s4171_s22 }
 0x11e   : > { %1656 = vrot.lane.b32.xlu0 %v1650_v36, %s4171_s22  ;;  %v1759_v36 = vmul.f32 %v4674_v18, %v4411_v27 }
 0x11f   : > { %v4857_v5 = vpop.permute.xlu1 %551 }
 0x120   : > { %v4860_v9 = vpop.permute.xlu0 %679 }
 0x121   : > { %1608 = vrot.lane.b32.xlu1 %v1600_v44, %s4171_s22  ;;  %v4885_v44 = vrot.slane %v4703_v37, 4 }
 0x122   : > { %1660 = vrot.lane.b32.xlu0 %v1652_v55, %s4171_s22  ;;  %v1758_v55 = vrot.slane %v1743_v42, %v4232_v7  ;;  %v1760_v42 = vmul.f32 %v4674_v18, %v4426_v33  ;;  %v1811_v33 = vmul.f32 %v4663_v59, %v4444_v4 }
 0x123   : > { %v4865_v40 = vpop.permute.xlu1 %626  ;;  %6214 = vst [vmem:[#allocation17_spill] sm:$0xff] %v4885_v44  ;;  %v4898_v20 = vsel %vm1884_vm10, %v4885_v44, %v4703_v37  ;;  %v1795_v37 = vrot.slane %v1669_v24, %v4367_v58 }
 0x124   : > { %v4869_v8 = vpop.permute.xlu0 %783  ;;  %v1761_v27 = vmul.f32 %v1758_v55, %v4674_v18  ;;  %6215 = vst [vmem:[#allocation18_spill] sm:$0xff] %v4898_v20  ;;  %v1847_v55 = vrot.slane %v1669_v24, %v4364_v56 }
 0x125   : > { %1658 = vrot.lane.b32.xlu1 %v1651_v12, %s4171_s22 }
 0x126   : > { %1714 = vrot.lane.b32.xlu0 %v1707_v26, %s4172_s23 }
 0x127   : > { %v4877_v46 = vpop.permute.xlu1 %731 }
 0x128   : > { %v4881_v22 = vpop.permute.xlu0 %624 }
 0x129   : > { %1712 = vrot.lane.b32.xlu1 %v1706_v63, %s4172_s23 }
 0x12a   : > { %1765 = vrot.lane.b32.xlu0 %v1759_v36, %s4172_s23  ;;  %v4910_v36 = vmul.f32 %v4898_v20, %v4376_v1  ;;  %v1810_v20 = vrot.slane %v1795_v37, %v4367_v58 }
 0x12b   : > { %v4891_v12 = vpop.permute.xlu1 %848 }
 0x12c   : > { %v4894_v26 = vpop.permute.xlu0 %675  ;;  %v1813_v4 = vmul.f32 %v1810_v20, %v4663_v59  ;;  %v1902_v45 = vrot.slane %v4910_v36, %v4229_v6  ;;  %v1955_v37 = vrot.slane %v4910_v36, %v4232_v7  ;;  %v1864_v59 = vmul.f32 %v4713_v54, %v4464_v50 }
 0x12d   : > { %1716 = vrot.lane.b32.xlu1 %v1708_v29, %s4172_s23  ;;  %v1906_v29 = vrot.slane %v4910_v36, %v4374_v0 }
 0x12e   : > { %1769 = vrot.lane.b32.xlu0 %v1761_v27, %s4172_s23  ;;  %v1917_v20 = vrot.slane %v1902_v45, %v4229_v6 }
 0x12f   : > { %v4904_v63 = vpop.permute.xlu1 %622  ;;  %v1921_v10 = vrot.slane %v1906_v29, %v4229_v6 }
 0x130   : > { %v4912_v2 = vpop.permute.xlu0 %729  ;;  %v1926_v50 = vmul.f32 %v1917_v20, %v4721_v11  ;;  %v2007_v20 = vrot.slane %v4910_v36, %v4367_v58 }
 0x131   : > { %1767 = vrot.lane.b32.xlu1 %v1760_v42, %s4172_s23  ;;  %v1862_v42 = vrot.slane %v1847_v55, %v4364_v56 }
 0x132   : > { %1819 = vrot.lane.b32.xlu0 %v1812_v39, %s4172_s23  ;;  %v1889_v39 = vmul.f32 %v4885_v44, %v1669_v24 }
 0x133   : > { %v4920_v18 = vpop.permute.xlu1 %677  ;;  %v1865_v47 = vmul.f32 %v1862_v42, %v4713_v54  ;;  %v1970_v42 = vrot.slane %v1955_v37, %v4232_v7  ;;  %v1959_v54 = vrot.slane %v4910_v36, %v4388_v14 }
 0x134   : > { %v4926_v27 = vpop.permute.xlu0 %779  ;;  %v1910_v24 = vrot.slane %v1889_v39, %v4229_v6  ;;  %v1963_v29 = vrot.slane %v1889_v39, %v4232_v7 }
 0x135   : > { %1817 = vrot.lane.b32.xlu1 %v1811_v33, %s4172_s23  ;;  %v1979_v37 = vmul.f32 %v1970_v42, %v4747_v57 }
 0x136   : > { %1869 = vrot.lane.b32.xlu0 %v1863_v38, %s4172_s23  ;;  %v1927_v38 = vmul.f32 %v1921_v10, %v4721_v11  ;;  %v2011_v10 = vrot.slane %v4910_v36, %v4394_v17  ;;  %v1978_v45 = vrot.slane %v1963_v29, %v4232_v7 }
 0x137   : > { %v4936_v34 = vpop.permute.xlu1 %727 }
 0x138   : > { %v4942_v33 = vpop.permute.xlu0 %846  ;;  %v2026_v48 = vrot.slane %v2011_v10, %v4367_v58  ;;  %v1981_v29 = vmul.f32 %v1978_v45, %v4747_v57 }
 0x139   : > { %1821 = vrot.lane.b32.xlu1 %v1813_v4, %s4172_s23 }
 0x13a   : > { %1873 = vrot.lane.b32.xlu0 %v1865_v47, %s4172_s23  ;;  %v1925_v47 = vrot.slane %v1910_v24, %v4229_v6  ;;  %v2032_v10 = vmul.f32 %v2026_v48, %v4781_v32  ;;  %v2063_v48 = vrot.slane %v4910_v36, %v4431_v35 }
 0x13b   : > { %v4950_v55 = vpop.permute.xlu1 %781 }
 0x13c   : > { %v4955_v44 = vpop.permute.xlu0 %897  ;;  %v1928_v24 = vmul.f32 %v1925_v47, %v4721_v11  ;;  %v2015_v11 = vrot.slane %v1889_v39, %v4367_v58  ;;  %v2022_v47 = vrot.slane %v2007_v20, %v4367_v58 }
 0x13d   : > { %1871 = vrot.lane.b32.xlu1 %v1864_v59, %s4172_s23 }
 0x13e   : > { %1934 = vrot.lane.b32.xlu0 %v1927_v38, %s4173_s24  ;;  %v1974_v38 = vrot.slane %v1959_v54, %v4232_v7  ;;  %v2031_v20 = vmul.f32 %v2022_v47, %v4781_v32 }
 0x13f   : > { %v4963_v4 = vpop.permute.xlu1 %844 }
 0x140   : > { %v4969_v59 = vpop.permute.xlu0 %901  ;;  %v1980_v54 = vmul.f32 %v1974_v38, %v4747_v57 }
 0x141   : > { %1932 = vrot.lane.b32.xlu1 %v1926_v50, %s4173_s24  ;;  %v2059_v50 = vrot.slane %v4910_v36, %v4364_v56 }
 0x142   : > { %1985 = vrot.lane.b32.xlu0 %v1979_v37, %s4173_s24 }
 0x143   : > { %v4977_v43 = vpop.permute.xlu1 %899  ;;  %v2074_v25 = vrot.slane %v2059_v50, %v4364_v56 }
 0x144   : > { %v4981_v42 = vpop.permute.xlu0 %951 }
 0x145   : > { %1936 = vrot.lane.b32.xlu1 %v1928_v24, %s4173_s24  ;;  %v2067_v24 = vrot.slane %v1889_v39, %v4364_v56  ;;  %v2083_v57 = vmul.f32 %v2074_v25, %v4772_v13  ;;  %v2078_v25 = vrot.slane %v2063_v48, %v4364_v56  ;;  %v4089_v48 = vld [vmem:[%s6169_s2 + $0x28] sm:$0xf] }
 0x146   : > { %1989 = vrot.lane.b32.xlu0 %v1981_v29, %s4173_s24  ;;  %v2030_v29 = vrot.slane %v2015_v11, %v4367_v58 }
 0x147   : > { %v4990_v37 = vpop.permute.xlu1 %949  ;;  %v2082_v39 = vrot.slane %v2067_v24, %v4364_v56  ;;  %v2084_v36 = vmul.f32 %v2078_v25, %v4772_v13 }
 0x148   : > { %v4993_v45 = vpop.permute.xlu0 %1001  ;;  %v2033_v50 = vmul.f32 %v2030_v29, %v4781_v32  ;;  %v4085_v32 = vld [vmem:[%s6169_s2 + $0x18] sm:$0xf] }
 0x149   : > { %1987 = vrot.lane.b32.xlu1 %v1980_v54, %s4173_s24  ;;  %v2085_v47 = vmul.f32 %v2082_v39, %v4772_v13 }
 0x14a   : > { %2039 = vrot.lane.b32.xlu0 %v2032_v10, %s4173_s24 }
 0x14b   : > { %v5001_v52 = vpop.permute.xlu1 %953 }
 0x14c   : > { %v5004_v38 = vpop.permute.xlu0 %1005 }
 0x14d   : > { %2037 = vrot.lane.b32.xlu1 %v2031_v20, %s4173_s24  ;;  %v4087_v20 = vld [vmem:[%s6169_s2 + $0x20] sm:$0xf] }
 0x14e   : > { %2089 = vrot.lane.b32.xlu0 %v2083_v57, %s4173_s24 }
 0x14f   : > { %v5012_v11 = vpop.permute.xlu1 %1003 }
 0x150   : > { %v5015_v54 = vpop.permute.xlu0 %1059 }
 0x151   : > { %2041 = vrot.lane.b32.xlu1 %v2033_v50, %s4173_s24 }
 0x152   : > { %2093 = vrot.lane.b32.xlu0 %v2085_v47, %s4173_s24  ;;  %v4091_v47 = vld [vmem:[%s6169_s2 + $0x30] sm:$0xf] }
 0x153   : > { %v5021_v10 = vpop.permute.xlu1 %1057 }
 0x154   : > { %6216 = vst [vmem:[#allocation19_spill] sm:$0xff] %v5021_v10  ;;  %v5026_v24 = vpop.permute.xlu0 %1110 }
 0x155   : > { %6217 = vst [vmem:[#allocation20_spill] sm:$0xff] %v5026_v24  ;;  %2091 = vrot.lane.b32.xlu1 %v2084_v36, %s4173_s24 }
 0x156   : > { %2366 = vperm.xlu0 %4143, %v4085_v32   ;;  %v4093_v32 = vld [vmem:[%s6169_s2 + $0x38] sm:$0xf] }
 0x157   : > { %v5029_v29 = vpop.permute.xlu1 %1061 }
 0x158   : > { %6218 = vst [vmem:[#allocation21_spill] sm:$0xff] %v5029_v29  ;;  %v5034_v57 = vpop.permute.xlu0 %1114 }
 0x159   : > { %6219 = vst [vmem:[#allocation22_spill] sm:$0xff] %v5034_v57 }
 0x15a   : > { %2472 = vperm.xlu0 %4143, %v4087_v20  }
 0x15b   : > { %v5036_v13 = vpop.permute.xlu1 %1112 }
 0x15c   : > { %6220 = vst [vmem:[#allocation23_spill] sm:$0xff] %v5036_v13  ;;  %v5041_v39 = vpop.permute.xlu0 %1164 }
 0x15d   : > { %6221 = vst [vmem:[#allocation24_spill] sm:$0xff] %v5041_v39 }
 0x15e   : > { %2578 = vperm.xlu0 %4143, %v4089_v48   ;;  %v4095_v48 = vld [vmem:[%s6169_s2 + $0x40] sm:$0xf] }
 0x15f   : > { %v5043_v50 = vpop.permute.xlu1 %1162 }
 0x160   : > { %6222 = vst [vmem:[#allocation25_spill] sm:$0xff] %v5043_v50  ;;  %v5048_v25 = vpop.permute.xlu0 %1214 }
 0x161   : > { %6223 = vst [vmem:[#allocation26_spill] sm:$0xff] %v5048_v25 }
 0x162   : > { %2686 = vperm.xlu0 %4143, %v4091_v47   ;;  %v4097_v47 = vld [vmem:[%s6169_s2 + $0x48] sm:$0xf] }
 0x163   : > { %v5050_v36 = vpop.permute.xlu1 %1166 }
 0x164   : > { %6224 = vst [vmem:[#allocation27_spill] sm:$0xff] %v5050_v36  ;;  %v5055_v20 = vpop.permute.xlu0 %1218 }
 0x165   : > { %6225 = vst [vmem:[#allocation28_spill] sm:$0xff] %v5055_v20 }
 0x166   : > { %2792 = vperm.xlu0 %4143, %v4093_v32   ;;  %v231_v32 = vmul.f32 %v4262_v21, %v4376_v1 }
 0x167   : > { %v5057_v39 = vpop.permute.xlu1 %1216 }
 0x168   : > { %6226 = vst [vmem:[#allocation29_spill] sm:$0xff] %v5057_v39  ;;  %v5062_v50 = vpop.permute.xlu0 %1279  ;;  %v4099_v39 = vld [vmem:[%s6169_s2 + $0x50] sm:$0xf]  ;;  %v246_v1 = vrot.slane %v231_v32, %v4374_v0 }
 0x169   : > { %6227 = vst [vmem:[#allocation30_spill] sm:$0xff] %v5062_v50 }
 0x16a   : > { %2898 = vperm.xlu0 %4143, %v4095_v48   ;;  %v275_v48 = vrot.slane %v231_v32, %v4388_v14 }
 0x16b   : > { %v5064_v25 = vpop.permute.xlu1 %1277 }
 0x16c   : > { %6228 = vst [vmem:[#allocation31_spill] sm:$0xff] %v5064_v25  ;;  %v5069_v36 = vpop.permute.xlu0 %1330  ;;  %v285_v21 = vrot.slane %v275_v48, %v4232_v7  ;;  %v242_v48 = vrot.slane %v231_v32, %v4229_v6 }
 0x16d   : > { %6229 = vst [vmem:[#allocation32_spill] sm:$0xff] %v5069_v36 }
 0x16e   : > { %3004 = vperm.xlu0 %4143, %v4097_v47   ;;  %v4101_v47 = vld [vmem:[%s6169_s2 + $0x58] sm:$0xf] }
 0x16f   : > { %v5073_v20 = vpop.permute.xlu1 %1281 }
 0x170   : > { %6230 = vst [vmem:[#allocation33_spill] sm:$0xff] %v5073_v20  ;;  %v5078_v50 = vpop.permute.xlu0 %1334  ;;  %v304_v20 = vrot.slane %v231_v32, %v4394_v17 }
 0x171   : > { %6231 = vst [vmem:[#allocation34_spill] sm:$0xff] %v5078_v50  ;;  %v256_v50 = vrot.slane %v246_v1, %v4229_v6  ;;  %v300_v1 = vrot.slane %v231_v32, %v4367_v58 }
 0x172   : > { %3110 = vperm.xlu0 %4143, %v4099_v39   ;;  %v4103_v39 = vld [vmem:[%s6169_s2 + $0x60] sm:$0xf]  ;;  %v314_v0 = vrot.slane %v304_v20, %v4367_v58 }
 0x173   : > { %v5081_v25 = vpop.permute.xlu1 %1332  ;;  %v258_v17 = vmul.f32 %v256_v50, %v4693_v15  ;;  %v252_v50 = vrot.slane %v242_v48, %v4229_v6 }
 0x174   : > { %6232 = vst [vmem:[#allocation35_spill] sm:$0xff] %v5081_v25  ;;  %v5086_v36 = vpop.permute.xlu0 %1384  ;;  %v271_v25 = vrot.slane %v231_v32, %v4232_v7  ;;  %v316_v13 = vmul.f32 %v314_v0, %v4732_v31 }
 0x175   : > { %6233 = vst [vmem:[#allocation36_spill] sm:$0xff] %v5086_v36  ;;  %v287_v36 = vmul.f32 %v285_v21, %v4682_v19  ;;  %v257_v0 = vmul.f32 %v252_v50, %v4693_v15  ;;  %v4109_v15 = vld [vmem:[%s6169_s2 + $0x78] sm:$0xf] }
 0x176   : > { %3216 = vperm.xlu0 %4143, %v4101_v47   ;;  %v333_v47 = vrot.slane %v231_v32, %v4431_v35  ;;  %v281_v21 = vrot.slane %v271_v25, %v4232_v7 }
 0x177   : > { %v5091_v57 = vpop.permute.xlu1 %1382  ;;  %v289_v35 = vadd.f32 %v287_v36, %v258_v17  ;;  %v4107_v17 = vld [vmem:[%s6169_s2 + $0x70] sm:$0xf]  ;;  %v310_v36 = vrot.slane %v300_v1, %v4367_v58 }
 0x178   : > { %6234 = vst [vmem:[#allocation37_spill] sm:$0xff] %v5091_v57  ;;  %v5096_v14 = vpop.permute.xlu0 %1434  ;;  %v286_v20 = vmul.f32 %v281_v21, %v4682_v19  ;;  %v400_v19 = vsel %vm398_vm11, %v4813_v49, %v4794_v28 }
 0x179   : > { %6235 = vst [vmem:[#allocation38_spill] sm:$0xff] %v5096_v14  ;;  %v4105_v14 = vld [vmem:[%s6169_s2 + $0x68] sm:$0xf] }
 0x17a   : > { %3324 = vperm.xlu0 %4143, %v4103_v39   ;;  %v343_v39 = vrot.slane %v333_v47, %v4364_v56  ;;  %v315_v47 = vmul.f32 %v310_v36, %v4732_v31  ;;  %v556_v36 = vsel %vm398_vm11, %v4857_v5, %v4799_v53 }
 0x17b   : > { %v5105_v57 = vpop.permute.xlu1 %1386 }
 0x17c   : > { %6236 = vst [vmem:[#allocation39_spill] sm:$0xff] %v5105_v57  ;;  %v5111_v24 = vpop.permute.xlu0 %1438  ;;  %v329_v57 = vrot.slane %v231_v32, %v4364_v56  ;;  %v345_v29 = vmul.f32 %v343_v39, %v4760_v23  ;;  %v288_v32 = vadd.f32 %v286_v20, %v257_v0  ;;  %v399_v20 = vsel %vm398_vm11, %v4821_v62, %v4813_v49 }
 0x17d   : > { %v451_v0 = vsel %vm398_vm11, %v4827_v41, %v4834_v16  ;;  %v503_v62 = vsel %vm398_vm11, %v4847_v61, %v4839_v60  ;;  %v630_v41 = vsel %vm628_vm12, %v4881_v22, %v4865_v40  ;;  %v4082_v61 = vld [vmem:[%s6169_s2 + $0xc] sm:$0xf]  ;;  %v629_v40 = vsel %vm628_vm12, %v4904_v63, %v4881_v22 }
 0x17e   : > { %3430 = vperm.xlu0 %4143, %v4105_v14   ;;  %v318_v14 = vadd.f32 %v316_v13, %v289_v35  ;;  %v339_v48 = vrot.slane %v329_v57, %v4364_v56  ;;  %v452_v35 = vsel %vm398_vm11, %v4834_v16, %v4787_v51  ;;  %v317_v31 = vadd.f32 %v315_v47, %v288_v32 }
 0x17f   : > { %v5120_v10 = vpop.permute.xlu1 %1436  ;;  %v504_v51 = vsel %vm398_vm11, %v4839_v60, %v4807_v30  ;;  %v4081_v30 = vld [vmem:[%s6169_s2 + $0x8] sm:$0xf]  ;;  %v555_v47 = vsel %vm398_vm11, %v4851_v3, %v4857_v5  ;;  %v733_v22 = vsel %vm628_vm12, %v4936_v34, %v4912_v2  ;;  %v786_v63 = vsel %vm628_vm12, %v4950_v55, %v4869_v8 }
 0x180   : > { %v5125_v25 = vpop.permute.xlu0 %1501  ;;  %v347_v21 = vadd.f32 %v345_v29, %v318_v14  ;;  %v344_v28 = vmul.f32 %v339_v48, %v4760_v23  ;;  %v4080_v29 = vld [vmem:[%s6169_s2 + $0x4] sm:$0xf]  ;;  %v682_v48 = vsel %vm628_vm12, %v4920_v18, %v4860_v9  ;;  %v681_v9 = vsel %vm628_vm12, %v4894_v26, %v4920_v18 }
 0x181   : > { %v785_v18 = vsel %vm628_vm12, %v4926_v27, %v4950_v55  ;;  %v851_v34 = vsel %vm850_vm13, %v4963_v4, %v4942_v33  ;;  %v903_v27 = vsel %vm850_vm13, %v4955_v44, %v4977_v43  ;;  %v904_v55 = vsel %vm850_vm13, %v4977_v43, %v4969_v59 }
 0x182   : > { %3536 = vperm.xlu0 %4143, %v4107_v17   ;;  %v404_v1 = vadd.f32 %v400_v19, %v347_v21  ;;  %v346_v23 = vadd.f32 %v344_v28, %v317_v31  ;;  %v734_v31 = vsel %vm628_vm12, %v4912_v2, %v4877_v46  ;;  %v955_v4 = vsel %vm850_vm13, %v4990_v37, %v4981_v42 }
 0x183   : > { %v5134_v39 = vpop.permute.xlu1 %1499  ;;  %v1007_v43 = vsel %vm850_vm13, %v4993_v45, %v5012_v11  ;;  %v1008_v59 = vsel %vm850_vm13, %v5012_v11, %v5004_v38  ;;  %v6241_v11 = vld [vmem:[#allocation22_spill] sm:$0xff] }
 0x184   : > { %v5142_v13 = vpop.permute.xlu0 %1552  ;;  %v456_v50 = vadd.f32 %v452_v35, %v404_v1  ;;  %v403_v14 = vadd.f32 %v399_v20, %v346_v23  ;;  %v852_v23 = vsel %vm850_vm13, %v4942_v33, %v4891_v12  ;;  %v956_v12 = vsel %vm850_vm13, %v4981_v42, %v5001_v52  ;;  %v6238_v42 = vld [vmem:[#allocation21_spill] sm:$0xff] }
 0x186   : > { %3642 = vperm.xlu0 %4143, %v4109_v15   ;;  %v508_v19 = vadd.f32 %v504_v51, %v456_v50  ;;  %v455_v53 = vadd.f32 %v451_v0, %v403_v14 }
 0x187   : > { %v5145_v57 = vpop.permute.xlu1 %1503 }
 0x188   : > { %v5156_v17 = vpop.permute.xlu0 %1556  ;;  %v560_v32 = vadd.f32 %v556_v36, %v508_v19  ;;  %v507_v21 = vadd.f32 %v503_v62, %v455_v53  ;;  %v1065_v53 = vsel %vm1063_vm14, %v5015_v54, %v6238_v42 }
 0x18a   : > { %2171 = vperm.xlu0 %4143, %v4080_v29   ;;  %v634_v15 = vadd.f32 %v630_v41, %v560_v32  ;;  %v559_v3 = vadd.f32 %v555_v47, %v507_v21  ;;  %v6237_v41 = vld [vmem:[#allocation19_spill] sm:$0xff]  ;;  %v6240_v21 = vld [vmem:[#allocation20_spill] sm:$0xff] }
 0x18b   : > { %v5164_v49 = vpop.permute.xlu1 %1554  ;;  %v1064_v52 = vsel %vm1063_vm14, %v6237_v41, %v5015_v54  ;;  %v6244_v54 = vld [vmem:[#allocation27_spill] sm:$0xff]  ;;  %v6253_v41 = vld [vmem:[#allocation34_spill] sm:$0xff] }
 0x18c   : > { %v5175_v16 = vpop.permute.xlu0 %1606  ;;  %v686_v5 = vadd.f32 %v682_v48, %v634_v15  ;;  %v633_v28 = vadd.f32 %v629_v40, %v559_v3  ;;  %v6239_v48 = vld [vmem:[#allocation23_spill] sm:$0xff] }
 0x18d   : > { %v1116_v38 = vsel %vm1063_vm14, %v6240_v21, %v6239_v48  ;;  %v1117_v15 = vsel %vm1063_vm14, %v6239_v48, %v6241_v11  ;;  %v6255_v48 = vld [vmem:[#allocation37_spill] sm:$0xff] }
 0x18e   : > { %2200 = vperm.xlu0 %4143, %v4081_v30   ;;  %v685_v29 = vadd.f32 %v681_v9, %v633_v28  ;;  %v738_v26 = vadd.f32 %v734_v31, %v686_v5  ;;  %v6242_v5 = vld [vmem:[#allocation24_spill] sm:$0xff]  ;;  %v6243_v9 = vld [vmem:[#allocation25_spill] sm:$0xff] }
 0x18f   : > { %v5183_v60 = vpop.permute.xlu1 %1604  ;;  %v1168_v28 = vsel %vm1063_vm14, %v6243_v9, %v6242_v5  ;;  %v1169_v31 = vsel %vm1063_vm14, %v6242_v5, %v6244_v54  ;;  %v6257_v5 = vld [vmem:[#allocation38_spill] sm:$0xff] }
 0x190   : > { %v5191_v35 = vpop.permute.xlu0 %1656  ;;  %v737_v20 = vadd.f32 %v733_v22, %v685_v29  ;;  %v790_v51 = vadd.f32 %v786_v63, %v738_v26  ;;  %v6245_v26 = vld [vmem:[#allocation29_spill] sm:$0xff]  ;;  %v1440_v9 = vsel %vm1283_vm15, %v6257_v5, %v5120_v10 }
 0x192   : > { %2229 = vperm.xlu0 %4143, %v4082_v61   ;;  %v789_v8 = vadd.f32 %v785_v18, %v737_v20  ;;  %v856_v36 = vadd.f32 %v852_v23, %v790_v51  ;;  %v6246_v18 = vld [vmem:[#allocation26_spill] sm:$0xff]  ;;  %v6247_v51 = vld [vmem:[#allocation28_spill] sm:$0xff] }
 0x193   : > { %v5196_v1 = vpop.permute.xlu1 %1608  ;;  %v1220_v20 = vsel %vm1063_vm14, %v6246_v18, %v6245_v26 }
 0x194   : > { %v5207_v50 = vpop.permute.xlu0 %1660  ;;  %v855_v0 = vadd.f32 %v851_v34, %v789_v8  ;;  %v908_v44 = vadd.f32 %v904_v55, %v856_v36  ;;  %v1221_v34 = vsel %vm1063_vm14, %v6245_v26, %v6247_v51  ;;  %v6248_v55 = vld [vmem:[#allocation30_spill] sm:$0xff]  ;;  %v1507_v26 = vsel %vm1505_vm1, %v5125_v25, %v5145_v57 }
 0x196   : > { %v907_v19 = vadd.f32 %v903_v27, %v855_v0  ;;  %v960_v62 = vadd.f32 %v956_v12, %v908_v44  ;;  %v6249_v0 = vld [vmem:[#allocation31_spill] sm:$0xff] }
 0x197   : > { %v5212_v46 = vpop.permute.xlu1 %1658  ;;  %v1284_v36 = vsel %vm1283_vm15, %v6249_v0, %v6248_v55 }
 0x198   : > { %v5217_v2 = vpop.permute.xlu0 %1714  ;;  %v959_v30 = vadd.f32 %v955_v4, %v907_v19  ;;  %v1012_v45 = vadd.f32 %v1008_v59, %v960_v62  ;;  %v6250_v4 = vld [vmem:[#allocation33_spill] sm:$0xff]  ;;  %v6251_v59 = vld [vmem:[#allocation35_spill] sm:$0xff] }
 0x199   : > { %v1285_v12 = vsel %vm1283_vm15, %v6248_v55, %v6250_v4 }
 0x19a   : > { %v1011_v47 = vadd.f32 %v1007_v43, %v959_v30  ;;  %v1069_v40 = vadd.f32 %v1065_v53, %v1012_v45  ;;  %v6252_v30 = vld [vmem:[#allocation32_spill] sm:$0xff] }
 0x19b   : > { %v5228_v14 = vpop.permute.xlu1 %1712  ;;  %v1336_v62 = vsel %vm1283_vm15, %v6252_v30, %v6251_v59  ;;  %v6254_v45 = vld [vmem:[#allocation36_spill] sm:$0xff] }
 0x19c   : > { %v5236_v33 = vpop.permute.xlu0 %1765  ;;  %v1068_v61 = vadd.f32 %v1064_v52, %v1011_v47  ;;  %v1121_v29 = vadd.f32 %v1117_v15, %v1069_v40  ;;  %v1337_v52 = vsel %vm1283_vm15, %v6251_v59, %v6253_v41  ;;  %v1388_v21 = vsel %vm1283_vm15, %v6255_v48, %v6254_v45 }
 0x19e   : > { %v1120_v63 = vadd.f32 %v1116_v38, %v1068_v61  ;;  %v1173_v23 = vadd.f32 %v1169_v31, %v1121_v29  ;;  %v6256_v38 = vld [vmem:[#allocation39_spill] sm:$0xff]  ;;  %v1506_v29 = vsel %vm1505_vm1, %v5134_v39, %v5125_v25  ;;  %v1610_v39 = vsel %vm1505_vm1, %v5183_v60, %v5175_v16 }
 0x19f   : > { %v5244_v37 = vpop.permute.xlu1 %1716  ;;  %v1389_v11 = vsel %vm1283_vm15, %v6254_v45, %v6256_v38  ;;  %v1611_v25 = vsel %vm1505_vm1, %v5175_v16, %v5196_v1  ;;  %v1719_v60 = vsel %vm1718_vm2, %v5228_v14, %v5217_v2 }
 0x1a0   : > { %v5252_v32 = vpop.permute.xlu0 %1769  ;;  %v1172_v8 = vadd.f32 %v1168_v28, %v1120_v63  ;;  %v1225_v43 = vadd.f32 %v1221_v34, %v1173_v23  ;;  %v1441_v28 = vsel %vm1283_vm15, %v5120_v10, %v5111_v24  ;;  %v1558_v34 = vsel %vm1505_vm1, %v5142_v13, %v5164_v49 }
 0x1a1   : > { %v1559_v10 = vsel %vm1505_vm1, %v5164_v49, %v5156_v17  ;;  %v1662_v13 = vsel %vm1505_vm1, %v5191_v35, %v5212_v46  ;;  %v1663_v17 = vsel %vm1505_vm1, %v5212_v46, %v5207_v50  ;;  %v1720_v16 = vsel %vm1718_vm2, %v5217_v2, %v5244_v37 }
 0x1a2   : > { %v1224_v44 = vadd.f32 %v1220_v20, %v1172_v8  ;;  %v1289_v53 = vadd.f32 %v1285_v12, %v1225_v43 }
 0x1a3   : > { %v1768_v3 = vpop.permute.xlu1 %1767 }
 0x1a4   : > { %v5266_v22 = vpop.permute.xlu0 %1819  ;;  %v1288_v42 = vadd.f32 %v1284_v36, %v1224_v44  ;;  %v1341_v40 = vadd.f32 %v1337_v52, %v1289_v53  ;;  %v1771_v35 = vsel %vm1718_vm2, %v5236_v33, %v1768_v3  ;;  %v1772_v50 = vsel %vm1718_vm2, %v1768_v3, %v5252_v32 }
 0x1a6   : > { %v1340_v61 = vadd.f32 %v1336_v62, %v1288_v42  ;;  %v1393_v31 = vadd.f32 %v1389_v11, %v1341_v40 }
 0x1a7   : > { %v1818_v27 = vpop.permute.xlu1 %1817 }
 0x1a8   : > { %v1870_v19 = vpop.permute.xlu0 %1869  ;;  %v1392_v54 = vadd.f32 %v1388_v21, %v1340_v61  ;;  %v1445_v51 = vadd.f32 %v1441_v28, %v1393_v31  ;;  %v1823_v30 = vsel %vm1718_vm2, %v1818_v27, %v5266_v22 }
 0x1aa   : > { %v1444_v20 = vadd.f32 %v1440_v9, %v1392_v54  ;;  %v1511_v8 = vadd.f32 %v1507_v26, %v1445_v51 }
 0x1ab   : > { %v1822_v47 = vpop.permute.xlu1 %1821 }
 0x1ac   : > { %v1874_v15 = vpop.permute.xlu0 %1873  ;;  %v1510_v24 = vadd.f32 %v1506_v29, %v1444_v20  ;;  %v1563_v0 = vadd.f32 %v1559_v10, %v1511_v8  ;;  %v1824_v14 = vsel %vm1718_vm2, %v5266_v22, %v1822_v47  ;;  %v4084_v10 = vld [vmem:[%s6169_s2 + $0x14] sm:$0xf]  ;;  %v4088_v8 = vld [vmem:[%s6169_s2 + $0x24] sm:$0xf] }
 0x1ae   : > { %v1562_v55 = vadd.f32 %v1558_v34, %v1510_v24  ;;  %v1615_v36 = vadd.f32 %v1611_v25, %v1563_v0  ;;  %v4083_v34 = vld [vmem:[%s6169_s2 + $0x10] sm:$0xf]  ;;  %v4086_v24 = vld [vmem:[%s6169_s2 + $0x1c] sm:$0xf]  ;;  %v4100_v0 = vld [vmem:[%s6169_s2 + $0x54] sm:$0xf] }
 0x1af   : > { %v1872_v63 = vpop.permute.xlu1 %1871  ;;  %v4094_v25 = vld [vmem:[%s6169_s2 + $0x3c] sm:$0xf] }
 0x1b0   : > { %v1935_v18 = vpop.permute.xlu0 %1934  ;;  %v1614_v49 = vadd.f32 %v1610_v39, %v1562_v55  ;;  %v1667_v44 = vadd.f32 %v1663_v17, %v1615_v36  ;;  %v1875_v41 = vsel %vm1718_vm2, %v1870_v19, %v1872_v63  ;;  %v1876_v33 = vsel %vm1718_vm2, %v1872_v63, %v1874_v15  ;;  %v4092_v39 = vld [vmem:[%s6169_s2 + $0x34] sm:$0xf]  ;;  %v4098_v55 = vld [vmem:[%s6169_s2 + $0x4c] sm:$0xf]  ;;  %v4104_v17 = vld [vmem:[%s6169_s2 + $0x64] sm:$0xf] }
 0x1b1   : > { %v4108_v36 = vld [vmem:[%s6169_s2 + $0x74] sm:$0xf] }
 0x1b2   : > { %v1666_v12 = vadd.f32 %v1662_v13, %v1614_v49  ;;  %v1724_v43 = vadd.f32 %v1720_v16, %v1667_v44  ;;  %v4102_v13 = vld [vmem:[%s6169_s2 + $0x5c] sm:$0xf]  ;;  %v4106_v49 = vld [vmem:[%s6169_s2 + $0x6c] sm:$0xf]  ;;  %v4111_v16 = vld [vmem:[%s6169_s2 + $0x80] sm:$0xf] }
 0x1b3   : > { %v1933_v23 = vpop.permute.xlu1 %1932 }
 0x1b4   : > { %v1986_v57 = vpop.permute.xlu0 %1985  ;;  %v1723_v46 = vadd.f32 %v1719_v60, %v1666_v12  ;;  %v1776_v37 = vadd.f32 %v1772_v50, %v1724_v43  ;;  %v1939_v3 = vsel %vm1938_vm3, %v1933_v23, %v1935_v18  ;;  %v4090_v23 = vld [vmem:[%s6169_s2 + $0x2c] sm:$0xf]  ;;  %v4110_v60 = vld [vmem:[%s6169_s2 + $0x7c] sm:$0xf] }
 0x1b5   : > { %v4114_v12 = vld [vmem:[%s6169_s2 + $0x8c] sm:$0xf] }
 0x1b6   : > { %v1775_v2 = vadd.f32 %v1771_v35, %v1723_v46  ;;  %v1828_v42 = vadd.f32 %v1824_v14, %v1776_v37 }
 0x1b7   : > { %v1937_v4 = vpop.permute.xlu1 %1936 }
 0x1b8   : > { %v1990_v1 = vpop.permute.xlu0 %1989  ;;  %v1827_v52 = vadd.f32 %v1823_v30, %v1775_v2  ;;  %v1940_v53 = vsel %vm1938_vm3, %v1935_v18, %v1937_v4  ;;  %v1880_v27 = vadd.f32 %v1876_v33, %v1828_v42  ;;  %v2138_v4 = vld [vmem:[%s6169_s2] sm:$0xf]  ;;  %v4113_v2 = vld [vmem:[%s6169_s2 + $0x88] sm:$0xf] }
 0x1ba   : > { %v1879_v45 = vadd.f32 %v1875_v41, %v1827_v52  ;;  %v1944_v38 = vadd.f32 %v1940_v53, %v1880_v27 }
 0x1bb   : > { %v1988_v59 = vpop.permute.xlu1 %1987 }
 0x1bc   : > { %v2040_v62 = vpop.permute.xlu0 %2039  ;;  %v1991_v22 = vsel %vm1938_vm3, %v1986_v57, %v1988_v59  ;;  %v1992_v47 = vsel %vm1938_vm3, %v1988_v59, %v1990_v1  ;;  %v1943_v21 = vadd.f32 %v1939_v3, %v1879_v45  ;;  %v4096_v57 = vld [vmem:[%s6169_s2 + $0x44] sm:$0xf] }
 0x1bd   : > { %v1996_v40 = vadd.f32 %v1992_v47, %v1944_v38  ;;  %v4112_v1 = vld [vmem:[%s6169_s2 + $0x84] sm:$0xf] }
 0x1be   : > { %v1995_v61 = vadd.f32 %v1991_v22, %v1943_v21 }
 0x1bf   : > { %v2038_v32 = vpop.permute.xlu1 %2037 }
 0x1c0   : > { %v2090_v48 = vpop.permute.xlu0 %2089  ;;  %v2043_v19 = vsel %vm1938_vm3, %v2038_v32, %v2040_v62 }
 0x1c1   : > { %v2047_v5 = vadd.f32 %v2043_v19, %v1995_v61 }
 0x1c3   : > { %v2042_v11 = vpop.permute.xlu1 %2041 }
 0x1c4   : > { %v2044_v15 = vsel %vm1938_vm3, %v2040_v62, %v2042_v11  ;;  %v2094_v28 = vpop.permute.xlu0 %2093 }
 0x1c5   : > { %v2048_v9 = vadd.f32 %v2044_v15, %v1996_v40 }
 0x1c7   : > { %v2092_v54 = vpop.permute.xlu1 %2091 }
 0x1c8   : > { %v2095_v31 = vsel %vm1938_vm3, %v2090_v48, %v2092_v54  ;;  %v2096_v63 = vsel %vm1938_vm3, %v2092_v54, %v2094_v28 }
 0x1c9   : > { %v2099_v29 = vadd.f32 %v2095_v31, %v2047_v5  ;;  %v2100_v26 = vadd.f32 %v2096_v63, %v2048_v9 }
 0x1cb   : > { %v2102_v18 = vsel %vm2101_vm6, %v2099_v29, 0.0  ;;  %v2103_v20 = vsel %vm2101_vm6, %v2100_v26, 0.0 }
 0x1cc   : > { %v2104_v51 = vadd.f32 %v2103_v20, %v2102_v18 }
 0x1ce   : > { %2105 = vadd.xlane.f32.xlu1 %v2104_v51 }
 0x1d5   : > { %v5410_v37 = vpop.permute.xlu0 %2366 }
 0x1d9   : > { %v5412_v41 = vpop.permute.xlu0 %2472 }
 0x1dd   : > { %v5414_v33 = vpop.permute.xlu0 %2578 }
 0x1df   : > { %2260 = vperm.xlu1 %4144, %v4083_v34  }
 0x1e1   : > { %v5416_v52 = vpop.permute.xlu0 %2686 }
 0x1e3   : > { %2314 = vperm.xlu1 %4144, %v4084_v10  }
 0x1e5   : > { %v5418_v42 = vpop.permute.xlu0 %2792 }
 0x1e7   : > { %2418 = vperm.xlu1 %4144, %v4086_v24  }
 0x1e9   : > { %v5420_v32 = vpop.permute.xlu0 %2898 }
 0x1eb   : > { %2526 = vperm.xlu1 %4144, %v4088_v8  }
 0x1ed   : > { %v5422_v3 = vpop.permute.xlu0 %3004 }
 0x1ef   : > { %2630 = vperm.xlu1 %4144, %v4090_v23  }
 0x1f1   : > { %v5424_v53 = vpop.permute.xlu0 %3110 }
 0x1f3   : > { %2740 = vperm.xlu1 %4144, %v4092_v39  }
 0x1f5   : > { %v5426_v45 = vpop.permute.xlu0 %3216 }
 0x1f7   : > { %2844 = vperm.xlu1 %4144, %v4094_v25  }
 0x1f9   : > { %v5428_v27 = vpop.permute.xlu0 %3324 }
 0x1fb   : > { %2952 = vperm.xlu1 %4144, %v4096_v57  }
 0x1fd   : > { %v5430_v48 = vpop.permute.xlu0 %3430 }
 0x1ff   : > { %3056 = vperm.xlu1 %4144, %v4098_v55  }
 0x201   : > { %v5432_v22 = vpop.permute.xlu0 %3536 }
 0x203   : > { %3164 = vperm.xlu1 %4144, %v4100_v0  }
 0x205   : > { %v5434_v47 = vpop.permute.xlu0 %3642 }
 0x207   : > { %3268 = vperm.xlu1 %4144, %v4102_v13  }
 0x209   : > { %v5436_v21 = vpop.permute.xlu0 %2171 }
 0x20b   : > { %3378 = vperm.xlu1 %4144, %v4104_v17  }
 0x20d   : > { %v5438_v38 = vpop.permute.xlu0 %2200 }
 0x20f   : > { %3482 = vperm.xlu1 %4144, %v4106_v49  }
 0x211   : > { %v5440_v11 = vpop.permute.xlu0 %2229 }
 0x213   : > { %3590 = vperm.xlu1 %4144, %v4108_v36  }
 0x217   : > { %2141 = vperm.xlu1 %4144, %v2138_v4  }
 0x21b   : > { %3694 = vperm.xlu1 %4144, %v4110_v60  }
 0x21f   : > { %3748 = vperm.xlu1 %4144, %v4111_v16  }
 0x223   : > { %3802 = vperm.xlu1 %4144, %v4112_v1  }
 0x227   : > { %3906 = vperm.xlu1 %4144, %v4114_v12  }
 0x25b   : > { %v2106_v44 = vpop.xlane.xlu1 %2105 }
 0x25c   : > { %v2108_v35 = vmul.f32 0.00390625, %v2106_v44 }
 0x25e   : > { %v2109_v50 = vsub.f32 %v2099_v29, %v2108_v35  ;;  %v2110_v46 = vsub.f32 %v2100_v26, %v2108_v35 }
 0x25f   : > { %v5443_v63 = vpop.permute.xlu1 %2260 }
 0x260   : > { %v2111_v43 = vmul.f32 %v2109_v50, %v2109_v50  ;;  %v2112_v59 = vmul.f32 %v2110_v46, %v2110_v46 }
 0x262   : > { %v2113_v30 = vsel %vm2101_vm6, %v2111_v43, 0.0  ;;  %v2114_v14 = vsel %vm2101_vm6, %v2112_v59, 0.0 }
 0x263   : > { %v2115_v62 = vadd.f32 %v2114_v14, %v2113_v30  ;;  %v5445_v29 = vpop.permute.xlu1 %2314 }
 0x265   : > { %2116 = vadd.xlane.f32.xlu0 %v2115_v62 }
 0x267   : > { %v5447_v26 = vpop.permute.xlu1 %2418 }
 0x26b   : > { %v5449_v18 = vpop.permute.xlu1 %2526 }
 0x26f   : > { %v5451_v20 = vpop.permute.xlu1 %2630 }
 0x273   : > { %v5453_v51 = vpop.permute.xlu1 %2740 }
 0x277   : > { %v5455_v34 = vpop.permute.xlu1 %2844 }
 0x27b   : > { %3854 = vperm.xlu0 %4143, %v4113_v2   ;;  %v5457_v10 = vpop.permute.xlu1 %2952 }
 0x27f   : > { %v5459_v24 = vpop.permute.xlu1 %3056 }
 0x283   : > { %v5463_v23 = vpop.permute.xlu1 %3164 }
 0x287   : > { %v5467_v55 = vpop.permute.xlu1 %3268 }
 0x28b   : > { %v5471_v13 = vpop.permute.xlu1 %3378 }
 0x28f   : > { %v5495_v30 = vpop.permute.xlu1 %3482 }
 0x2f2   : > { %v2117_v19 = vpop.xlane.xlu0 %2116 }
 0x2f3   : > { %v2118_v15 = vmul.f32 0.00390625, %v2117_v19 }
 0x2f5   : > { %v2119_v61 = vadd.f32 1e-05, %v2118_v15 }
 0x2f7   : > { %4145 = vrsqrt.f32 %v2119_v61 }
 0x2fa   : > { %v5461_v8 = vpop.permute.xlu0 %3854 }
 0x301   : > { %v4146_v40 = vpop.eup %4145 }
 0x302   : > { %v2121_v5 = vmul.f32 %v4146_v40, %v2109_v50  ;;  %v2122_v9 = vmul.f32 %v4146_v40, %v2110_v46 }
 0x304   : > { %v2123_v28 = vmax.f32 %v2121_v5, 0.0  ;;  %v2124_v54 = vmax.f32 %v2122_v9, 0.0  ;;  %v5511_v5 = vpop.permute.xlu1 %3590 }
 0x306   : > { %v2127_v31 = vcombine.low %v2123_v28, %v2124_v54 }
 0x308   : > { %2128 = vrot.lane.b32.xlu0 %v2127_v31, %s4159_s27 }
 0x37a   : > { %v2129_v39 = vpop.permute.xlu0 %2128 }
 0x37b   : > { %v2130_v25 = vrot.slane %v2129_v39, 4 }
 0x37d   : > { %v2131_v57 = vsel %vm210_vm4, %v2130_v25, %v2129_v39  ;;  %2135 = vst.msk [vmem:[#allocation2 + $0x8] sm:$0xf] %vm202_vm0, %v2130_v25 }
 0x37e   : > { %2134 = vst.msk [vmem:[#allocation2] sm:$0xff] %vm4355_vm5, %v2131_v57 }
 0x384   : > { %v5473_v17 = vld [vmem:[#allocation2 + $0x8] sm:$0xf] }
 0x385   : > { %v2328_v49 = vrot.slane %v5473_v17, %v4232_v7  ;;  %v2276_v36 = vrot.slane %v5473_v17, %v4229_v6  ;;  %v2432_v4 = vrot.slane %v5473_v17, %v4364_v56  ;;  %v2380_v60 = vrot.slane %v5473_v17, %v4367_v58  ;;  %v5483_v16 = vld [vmem:[#allocation2 + $0x8] sm:$0xf] }
 0x386   : > { %v2966_v44 = vrot.slane %v5483_v16, %v4232_v7  ;;  %v2914_v35 = vrot.slane %v5483_v16, %v4229_v6  ;;  %v3070_v14 = vrot.slane %v5483_v16, %v4364_v56  ;;  %v3018_v62 = vrot.slane %v5483_v16, %v4367_v58  ;;  %v5507_v40 = vld [vmem:[#allocation2 + $0x8] sm:$0xf] }
 0x387   : > { %v2343_v1 = vrot.slane %v2328_v49, %v4232_v7  ;;  %v2291_v12 = vrot.slane %v2276_v36, %v4229_v6  ;;  %v2447_v43 = vrot.slane %v2432_v4, %v4364_v56  ;;  %v2395_v59 = vrot.slane %v2380_v60, %v4367_v58  ;;  %v5525_v49 = vld [vmem:[#allocation2] sm:$0xff] }
 0x388   : > { %v2981_v15 = vrot.slane %v2966_v44, %v4232_v7  ;;  %v2929_v61 = vrot.slane %v2914_v35, %v4229_v6  ;;  %v3085_v9 = vrot.slane %v3070_v14, %v4364_v56  ;;  %v3033_v28 = vrot.slane %v3018_v62, %v4367_v58  ;;  %v6259_v44 = vld [vmem:[#allocation5_spill] sm:$0xff] }
 0x389   : > { %v2346_v50 = vmul.f32 %v2343_v1, %v5445_v29  ;;  %v2294_v46 = vmul.f32 %v2291_v12, %v5443_v63  ;;  %v2450_v2 = vmul.f32 %v2447_v43, %v5447_v26  ;;  %v2398_v19 = vmul.f32 %v2395_v59, %v5410_v37  ;;  %v5533_v12 = vpop.permute.xlu1 %2141 }
 0x38a   : > { %v2984_v54 = vmul.f32 %v2981_v15, %v5457_v10  ;;  %v2932_v31 = vmul.f32 %v2929_v61, %v5420_v32  ;;  %v3604_v39 = vrot.slane %v5507_v40, %v4232_v7  ;;  %v3552_v25 = vrot.slane %v5507_v40, %v4229_v6 }
 0x38b   : > { %2354 = vrot.lane.b32.xlu1 %v2346_v50, %s4166_s14  ;;  %2302 = vrot.lane.b32.xlu0 %v2294_v46, %s4166_s14  ;;  %v3088_v57 = vmul.f32 %v3085_v9, %v5459_v24  ;;  %v3036_v0 = vmul.f32 %v3033_v28, %v5422_v3  ;;  %v3708_v60 = vrot.slane %v5507_v40, %v4364_v56  ;;  %v6260_v28 = vld [vmem:[#allocation6_spill] sm:$0xff] }
 0x38c   : > { %v3619_v36 = vrot.slane %v3604_v39, %v4232_v7  ;;  %v3567_v4 = vrot.slane %v3552_v25, %v4229_v6  ;;  %v3656_v1 = vrot.slane %v5507_v40, %v4367_v58  ;;  %v2272_v35 = vrot.slane %v5525_v49, %v6259_v44 }
 0x38d   : > { %v2268_v50 = vrot.slane %v5525_v49, %v4229_v6  ;;  %v3723_v59 = vrot.slane %v3708_v60, %v4364_v56  ;;  %v5547_v62 = vpop.permute.xlu1 %3694 }
 0x38e   : > { %v3622_v46 = vmul.f32 %v3619_v36, %v5511_v5  ;;  %v3570_v43 = vmul.f32 %v3567_v4, %v5432_v22  ;;  %v3671_v14 = vrot.slane %v3656_v1, %v4367_v58  ;;  %v2372_v4 = vrot.slane %v5525_v49, %v4367_v58 }
 0x38f   : > { %2458 = vrot.lane.b32.xlu1 %v2450_v2, %s4166_s14  ;;  %2406 = vrot.lane.b32.xlu0 %v2398_v19, %s4166_s14  ;;  %v2287_v2 = vrot.slane %v2272_v35, %v4229_v6  ;;  %v2320_v19 = vrot.slane %v5525_v49, %v4232_v7  ;;  %v3726_v15 = vmul.f32 %v3723_v59, %v5547_v62 }
 0x390   : > { %v3674_v61 = vmul.f32 %v3671_v14, %v5434_v47  ;;  %v2283_v9 = vrot.slane %v2268_v50, %v4229_v6  ;;  %v2424_v1 = vrot.slane %v5525_v49, %v4364_v56  ;;  %v2387_v50 = vrot.slane %v2372_v4, %v4367_v58 }
 0x391   : > { %v2335_v39 = vrot.slane %v2320_v19, %v4232_v7 }
 0x392   : > { %v2292_v25 = vmul.f32 %v2283_v9, %v5443_v63  ;;  %v2396_v14 = vmul.f32 %v2387_v50, %v5410_v37  ;;  %v2439_v19 = vrot.slane %v2424_v1, %v4364_v56 }
 0x393   : > { %2992 = vrot.lane.b32.xlu1 %v2984_v54, %s4169_s19  ;;  %2940 = vrot.lane.b32.xlu0 %v2932_v31, %s4169_s19  ;;  %v2324_v54 = vrot.slane %v5525_v49, %v6260_v28  ;;  %v2293_v31 = vmul.f32 %v2287_v2, %v5443_v63  ;;  %v2344_v60 = vmul.f32 %v2335_v39, %v5445_v29 }
 0x397   : > { %3096 = vrot.lane.b32.xlu1 %v3088_v57, %s4169_s19  ;;  %3044 = vrot.lane.b32.xlu0 %v3036_v0, %s4169_s19  ;;  %v2339_v57 = vrot.slane %v2324_v54, %v4232_v7  ;;  %v6261_v0 = vld [vmem:[#allocation7_spill] sm:$0xff]  ;;  %v2931_v54 = vmul.f32 %v5420_v32, %v2287_v2 }
 0x398   : > { %v2376_v36 = vrot.slane %v5525_v49, %v6261_v0 }
 0x399   : > { %v2345_v35 = vmul.f32 %v2339_v57, %v5445_v29  ;;  %v2448_v29 = vmul.f32 %v2439_v19, %v5447_v26  ;;  %v3621_v1 = vmul.f32 %v5511_v5, %v2339_v57 }
 0x39a   : > { %v2391_v63 = vrot.slane %v2376_v36, %v4367_v58  ;;  %v3034_v36 = vmul.f32 %v5422_v3, %v2387_v50 }
 0x39b   : > { %3630 = vrot.lane.b32.xlu1 %v3622_v46, %s4172_s23  ;;  %3578 = vrot.lane.b32.xlu0 %v3570_v43, %s4172_s23  ;;  %v6262_v46 = vld [vmem:[#allocation9_spill] sm:$0xff] }
 0x39c   : > { %v2428_v43 = vrot.slane %v5525_v49, %v6262_v46  ;;  %v2397_v59 = vmul.f32 %v2391_v63, %v5410_v37  ;;  %v2930_v37 = vmul.f32 %v5420_v32, %v2283_v9  ;;  %v3086_v32 = vmul.f32 %v5459_v24, %v2439_v19 }
 0x39f   : > { %3734 = vrot.lane.b32.xlu1 %v3726_v15, %s4172_s23  ;;  %3682 = vrot.lane.b32.xlu0 %v3674_v61, %s4172_s23  ;;  %v2443_v15 = vrot.slane %v2428_v43, %v4364_v56 }
 0x3a1   : > { %v2449_v61 = vmul.f32 %v2443_v15, %v5447_v26  ;;  %v3035_v26 = vmul.f32 %v5422_v3, %v2391_v63  ;;  %v3087_v4 = vmul.f32 %v5459_v24, %v2443_v15  ;;  %v3620_v3 = vmul.f32 %v5511_v5, %v2335_v39 }
 0x3a2   : > { %v3673_v24 = vmul.f32 %v5434_v47, %v2391_v63  ;;  %v3724_v5 = vmul.f32 %v5547_v62, %v2439_v19 }
 0x3a3   : > { %2300 = vrot.lane.b32.xlu1 %v2293_v31, %s4166_s14  ;;  %2298 = vrot.lane.b32.xlu0 %v2292_v25, %s4166_s14  ;;  %v2982_v31 = vmul.f32 %v5457_v10, %v2335_v39  ;;  %v2983_v25 = vmul.f32 %v5457_v10, %v2339_v57  ;;  %v3569_v10 = vmul.f32 %v5432_v22, %v2287_v2  ;;  %v6264_v39 = vld [vmem:[#allocation11_spill] sm:$0xff] }
 0x3a4   : > { %v3672_v2 = vmul.f32 %v5434_v47, %v2387_v50 }
 0x3a7   : > { %2350 = vrot.lane.b32.xlu1 %v2344_v60, %s4166_s14  ;;  %2352 = vrot.lane.b32.xlu0 %v2345_v35, %s4166_s14  ;;  %v3568_v60 = vmul.f32 %v5432_v22, %v2283_v9  ;;  %v6263_v35 = vld [vmem:[#allocation8_spill] sm:$0xff] }
 0x3a8   : > { %v2467_v43 = vmul.f32 %v5473_v17, %v6263_v35  ;;  %v3725_v17 = vmul.f32 %v5547_v62, %v2443_v15 }
 0x3aa   : > { %v2540_v22 = vrot.slane %v2467_v43, %v4232_v7  ;;  %v2488_v9 = vrot.slane %v2467_v43, %v4229_v6  ;;  %v2644_v47 = vrot.slane %v2467_v43, %v4364_v56  ;;  %v2592_v50 = vrot.slane %v2467_v43, %v4367_v58 }
 0x3ab   : > { %2404 = vrot.lane.b32.xlu1 %v2397_v59, %s4166_s14  ;;  %2402 = vrot.lane.b32.xlu0 %v2396_v14, %s4166_s14  ;;  %v2679_v59 = vld [vmem:[#allocation2 + $0x8] sm:$0xf] }
 0x3ac   : > { %v2681_v57 = vmul.f32 %v2679_v59, %v6264_v39  ;;  %v2555_v14 = vrot.slane %v2540_v22, %v4232_v7  ;;  %v2503_v63 = vrot.slane %v2488_v9, %v4229_v6  ;;  %v6266_v9 = vld [vmem:[#allocation15_spill] sm:$0xff] }
 0x3ae   : > { %v2702_v19 = vrot.slane %v2681_v57, %v4229_v6  ;;  %v2558_v62 = vmul.f32 %v2555_v14, %v5449_v18  ;;  %v2506_v15 = vmul.f32 %v2503_v63, %v5412_v41 }
 0x3af   : > { %2454 = vrot.lane.b32.xlu1 %v2448_v29, %s4166_s14  ;;  %2456 = vrot.lane.b32.xlu0 %v2449_v61, %s4166_s14  ;;  %v2754_v29 = vrot.slane %v2681_v57, %v4232_v7  ;;  %v2659_v61 = vrot.slane %v2644_v47, %v4364_v56 }
 0x3b3   : > { %2938 = vrot.lane.b32.xlu1 %v2931_v54, %s4169_s19  ;;  %2936 = vrot.lane.b32.xlu0 %v2930_v37, %s4169_s19  ;;  %v2607_v54 = vrot.slane %v2592_v50, %v4367_v58  ;;  %v2769_v37 = vrot.slane %v2754_v29, %v4232_v7 }
 0x3b7   : > { %2988 = vrot.lane.b32.xlu1 %v2982_v31, %s4169_s19  ;;  %2990 = vrot.lane.b32.xlu0 %v2983_v25, %s4169_s19  ;;  %v2858_v31 = vrot.slane %v2681_v57, %v4364_v56  ;;  %v6265_v25 = vld [vmem:[#allocation13_spill] sm:$0xff] }
 0x3bb   : > { %3042 = vrot.lane.b32.xlu1 %v3035_v26, %s4169_s19  ;;  %3040 = vrot.lane.b32.xlu0 %v3034_v36, %s4169_s19  ;;  %v3105_v26 = vmul.f32 %v5483_v16, %v6265_v25  ;;  %v2662_v36 = vmul.f32 %v2659_v61, %v5451_v20  ;;  %v6267_v61 = vld [vmem:[#allocation17_spill] sm:$0xff] }
 0x3bd   : > { %v3178_v35 = vrot.slane %v3105_v26, %v4232_v7  ;;  %v3126_v43 = vrot.slane %v3105_v26, %v4229_v6  ;;  %v3282_v22 = vrot.slane %v3105_v26, %v4364_v56 }
 0x3bf   : > { %3092 = vrot.lane.b32.xlu1 %v3086_v32, %s4169_s19  ;;  %3094 = vrot.lane.b32.xlu0 %v3087_v4, %s4169_s19  ;;  %v2610_v32 = vmul.f32 %v2607_v54, %v5414_v33  ;;  %v2717_v4 = vrot.slane %v2702_v19, %v4229_v6  ;;  %v3141_v39 = vrot.slane %v3126_v43, %v4229_v6 }
 0x3c0   : > { %v3297_v29 = vrot.slane %v3282_v22, %v4364_v56  ;;  %v5677_v54 = vmul.f32 %v5507_v40, %v6267_v61 }
 0x3c1   : > { %v3144_v50 = vmul.f32 %v3141_v39, %v5424_v53 }
 0x3c3   : > { %3576 = vrot.lane.b32.xlu1 %v3569_v10, %s4172_s23  ;;  %3574 = vrot.lane.b32.xlu0 %v3568_v60, %s4172_s23  ;;  %v2806_v10 = vrot.slane %v2681_v57, %v4367_v58  ;;  %v2772_v60 = vmul.f32 %v2769_v37, %v5453_v51  ;;  %v3230_v57 = vrot.slane %v3105_v26, %v4367_v58 }
 0x3c4   : > { %v3300_v37 = vmul.f32 %v3297_v29, %v5467_v55 }
 0x3c5   : > { %v2821_v16 = vrot.slane %v2806_v10, %v4367_v58  ;;  %v3245_v19 = vrot.slane %v3230_v57, %v4367_v58 }
 0x3c7   : > { %3626 = vrot.lane.b32.xlu1 %v3620_v3, %s4172_s23  ;;  %3628 = vrot.lane.b32.xlu0 %v3621_v1, %s4172_s23  ;;  %v2873_v3 = vrot.slane %v2858_v31, %v4364_v56  ;;  %v2720_v1 = vmul.f32 %v2717_v4, %v5416_v52  ;;  %v3248_v31 = vmul.f32 %v3245_v19, %v5426_v45  ;;  %v6268_v4 = vld [vmem:[#allocation10_spill] sm:$0xff] }
 0x3c8   : > { %v2466_v40 = vmul.f32 %v5525_v49, %v6268_v4 }
 0x3ca   : > { %v2484_v43 = vrot.slane %v2466_v40, %v6259_v44  ;;  %v2636_v4 = vrot.slane %v2466_v40, %v4364_v56 }
 0x3cb   : > { %3680 = vrot.lane.b32.xlu1 %v3673_v24, %s4172_s23  ;;  %3678 = vrot.lane.b32.xlu0 %v3672_v2, %s4172_s23  ;;  %v3317_v24 = vld [vmem:[#allocation2 + $0x8] sm:$0xf]  ;;  %v2876_v2 = vmul.f32 %v2873_v3, %v5455_v34  ;;  %v3816_v3 = vrot.slane %v5677_v54, %v4232_v7 }
 0x3cc   : > { %v3319_v59 = vmul.f32 %v3317_v24, %v6266_v9  ;;  %v3868_v9 = vrot.slane %v5677_v54, %v4367_v58 }
 0x3ce   : > { %v3392_v14 = vrot.slane %v3319_v59, %v4232_v7  ;;  %v3340_v63 = vrot.slane %v3319_v59, %v4229_v6  ;;  %v3444_v26 = vrot.slane %v3319_v59, %v4367_v58 }
 0x3cf   : > { %3730 = vrot.lane.b32.xlu1 %v3724_v5, %s4172_s23  ;;  %3732 = vrot.lane.b32.xlu0 %v3725_v17, %s4172_s23  ;;  %v2824_v5 = vmul.f32 %v2821_v16, %v5418_v42  ;;  %v3193_v17 = vrot.slane %v3178_v35, %v4232_v7  ;;  %v5695_v16 = vpop.permute.xlu1 %3748 }
 0x3d0   : > { %v3355_v25 = vrot.slane %v3340_v63, %v4229_v6  ;;  %v3883_v63 = vrot.slane %v3868_v9, %v4367_v58 }
 0x3d1   : > { %v3196_v47 = vmul.f32 %v3193_v17, %v5463_v23  ;;  %v2480_v17 = vrot.slane %v2466_v40, %v4229_v6 }
 0x3d2   : > { %v3358_v10 = vmul.f32 %v3355_v25, %v5428_v27  ;;  %v3886_v19 = vmul.f32 %v3883_v63, %v5461_v8 }
 0x3d3   : > { %2566 = vrot.lane.b32.xlu1 %v2558_v62, %s4167_s17  ;;  %2514 = vrot.lane.b32.xlu0 %v2506_v15, %s4167_s17  ;;  %v3407_v62 = vrot.slane %v3392_v14, %v4232_v7  ;;  %v3496_v15 = vrot.slane %v3319_v59, %v4364_v56  ;;  %v5708_v59 = vpop.permute.xlu1 %3802  ;;  %v2499_v14 = vrot.slane %v2484_v43, %v4229_v6 }
 0x3d5   : > { %v2505_v29 = vmul.f32 %v2499_v14, %v5412_v41 }
 0x3d7   : > { %2670 = vrot.lane.b32.xlu1 %v2662_v36, %s4167_s17  ;;  %2618 = vrot.lane.b32.xlu0 %v2610_v32, %s4167_s17  ;;  %v3410_v36 = vmul.f32 %v3407_v62, %v5471_v13  ;;  %v3511_v32 = vrot.slane %v3496_v15, %v4364_v56  ;;  %v2495_v62 = vrot.slane %v2480_v17, %v4229_v6 }
 0x3d8   : > { %v2536_v15 = vrot.slane %v2466_v40, %v6260_v28 }
 0x3d9   : > { %v3514_v35 = vmul.f32 %v3511_v32, %v5495_v30 }
 0x3da   : > { %v2551_v32 = vrot.slane %v2536_v15, %v4232_v7 }
 0x3db   : > { %2780 = vrot.lane.b32.xlu1 %v2772_v60, %s4168_s18  ;;  %2728 = vrot.lane.b32.xlu0 %v2720_v1, %s4168_s18  ;;  %v3459_v60 = vrot.slane %v3444_v26, %v4367_v58  ;;  %v3764_v1 = vrot.slane %v5677_v54, %v4229_v6  ;;  %v5732_v26 = vpop.permute.xlu1 %3906 }
 0x3dd   : > { %v3462_v24 = vmul.f32 %v3459_v60, %v5430_v48  ;;  %v3779_v22 = vrot.slane %v3764_v1, %v4229_v6  ;;  %v6270_v1 = vld [vmem:[#allocation3_spill] sm:$0xff] }
 0x3df   : > { %2884 = vrot.lane.b32.xlu1 %v2876_v2, %s4168_s18  ;;  %2832 = vrot.lane.b32.xlu0 %v2824_v5, %s4168_s18  ;;  %v3831_v2 = vrot.slane %v3816_v3, %v4232_v7  ;;  %v2532_v5 = vrot.slane %v2466_v40, %v4232_v7  ;;  %v3782_v57 = vmul.f32 %v3779_v22, %v5695_v16 }
 0x3e0   : > { %v2640_v3 = vrot.slane %v2466_v40, %v6262_v46  ;;  %v2651_v22 = vrot.slane %v2636_v4, %v4364_v56 }
 0x3e1   : > { %v3834_v39 = vmul.f32 %v3831_v2, %v5708_v59  ;;  %v2557_v2 = vmul.f32 %v2551_v32, %v5449_v18 }
 0x3e3   : > { %3204 = vrot.lane.b32.xlu1 %v3196_v47, %s4170_s20  ;;  %3152 = vrot.lane.b32.xlu0 %v3144_v50, %s4170_s20  ;;  %v2547_v47 = vrot.slane %v2532_v5, %v4232_v7  ;;  %v2588_v50 = vrot.slane %v2466_v40, %v6261_v0 }
 0x3e5   : > { %v2556_v61 = vmul.f32 %v2547_v47, %v5449_v18  ;;  %v2660_v47 = vmul.f32 %v2651_v22, %v5451_v20 }
 0x3e7   : > { %3308 = vrot.lane.b32.xlu1 %v3300_v37, %s4170_s20  ;;  %3256 = vrot.lane.b32.xlu0 %v3248_v31, %s4170_s20  ;;  %v2603_v37 = vrot.slane %v2588_v50, %v4367_v58  ;;  %v6269_v31 = vld [vmem:[#allocation12_spill] sm:$0xff] }
 0x3e8   : > { %v5730_v25 = vmul.f32 %v5525_v49, %v6269_v31 }
 0x3ea   : > { %v2698_v60 = vrot.slane %v5730_v25, %v6259_v44  ;;  %v2746_v5 = vrot.slane %v5730_v25, %v4232_v7 }
 0x3eb   : > { %3418 = vrot.lane.b32.xlu1 %v3410_v36, %s4171_s22  ;;  %3366 = vrot.lane.b32.xlu0 %v3358_v10, %s4171_s22  ;;  %v2504_v36 = vmul.f32 %v2495_v62, %v5412_v41  ;;  %v2584_v10 = vrot.slane %v2466_v40, %v4367_v58  ;;  %v2694_v40 = vrot.slane %v5730_v25, %v4229_v6 }
 0x3ec   : > { %v2713_v17 = vrot.slane %v2698_v60, %v4229_v6  ;;  %v2761_v62 = vrot.slane %v2746_v5, %v4232_v7 }
 0x3ed   : > { %v2599_v9 = vrot.slane %v2584_v10, %v4367_v58  ;;  %v2709_v15 = vrot.slane %v2694_v40, %v4229_v6  ;;  %v2750_v10 = vrot.slane %v5730_v25, %v6260_v28 }
 0x3ef   : > { %3522 = vrot.lane.b32.xlu1 %v3514_v35, %s4171_s22  ;;  %3470 = vrot.lane.b32.xlu0 %v3462_v24, %s4171_s22  ;;  %v5745_v35 = vmul.f32 %v5525_v49, %v6270_v1  ;;  %v2609_v24 = vmul.f32 %v2603_v37, %v5414_v33  ;;  %v2608_v50 = vmul.f32 %v2599_v9, %v5414_v33 }
 0x3f0   : > { %v2719_v37 = vmul.f32 %v2713_v17, %v5416_v52  ;;  %v2770_v1 = vmul.f32 %v2761_v62, %v5453_v51  ;;  %v2850_v9 = vrot.slane %v5730_v25, %v4364_v56  ;;  %v6271_v17 = vld [vmem:[#allocation14_spill] sm:$0xff] }
 0x3f1   : > { %v2152_v18 = vrot.slane %v5745_v35, %v6259_v44  ;;  %v2206_v22 = vrot.slane %v5745_v35, %v4367_v58  ;;  %v2239_v62 = vrot.slane %v5745_v35, %v6262_v46 }
 0x3f3   : > { %3842 = vrot.lane.b32.xlu1 %v3834_v39, %s4173_s24  ;;  %3790 = vrot.lane.b32.xlu0 %v3782_v57, %s4173_s24  ;;  %v2655_v39 = vrot.slane %v2640_v3, %v4364_v56  ;;  %v2181_v57 = vrot.slane %v5745_v35, %v6260_v28  ;;  %v2162_v33 = vrot.slane %v2152_v18, %v4229_v6 }
 0x3f5   : > { %v2191_v31 = vrot.slane %v2181_v57, %v4232_v7  ;;  %v2661_v4 = vmul.f32 %v2655_v39, %v5451_v20  ;;  %v2164_v5 = vmul.f32 %v2162_v33, %v5533_v12  ;;  %v5810_v39 = vmul.f32 %v5525_v49, %v6271_v17 }
 0x3f7   : > { %2512 = vrot.lane.b32.xlu1 %v2505_v29, %s4167_s17  ;;  %3894 = vrot.lane.b32.xlu0 %v3886_v19, %s4173_s24  ;;  %v2148_v29 = vrot.slane %v5745_v35, %v4229_v6  ;;  %v2177_v19 = vrot.slane %v5745_v35, %v4232_v7  ;;  %v2193_v40 = vmul.f32 %v2191_v31, %v5436_v21 }
 0x3f9   : > { %v2158_v60 = vrot.slane %v2148_v29, %v4229_v6  ;;  %v2187_v3 = vrot.slane %v2177_v19, %v4232_v7  ;;  %v2195_v33 = vadd.f32 %v2193_v40, %v2164_v5 }
 0x3fb   : > { %2562 = vrot.lane.b32.xlu1 %v2556_v61, %s4167_s17  ;;  %2510 = vrot.lane.b32.xlu0 %v2504_v36, %s4167_s17  ;;  %v2802_v61 = vrot.slane %v5730_v25, %v6261_v0  ;;  %v2192_v29 = vmul.f32 %v2187_v3, %v5436_v21  ;;  %v3122_v21 = vrot.slane %v5810_v39, %v6259_v44 }
 0x3fd   : > { %v5747_v41 = vpop.permute.xlu1 %2354  ;;  %v5749_v43 = vpop.permute.xlu0 %2302  ;;  %v2817_v20 = vrot.slane %v2802_v61, %v4367_v58  ;;  %v2235_v61 = vrot.slane %v5745_v35, %v4364_v56 }
 0x3ff   : > { %2616 = vrot.lane.b32.xlu1 %v2609_v24, %s4167_s17  ;;  %2564 = vrot.lane.b32.xlu0 %v2557_v2, %s4167_s17  ;;  %v2210_v24 = vrot.slane %v5745_v35, %v6261_v0  ;;  %v2718_v2 = vmul.f32 %v2709_v15, %v5416_v52  ;;  %v2765_v52 = vrot.slane %v2750_v10, %v4232_v7 }
 0x400   : > { %v2216_v15 = vrot.slane %v2206_v22, %v4367_v58 }
 0x401   : > { %v5767_v14 = vpop.permute.xlu1 %2458  ;;  %v5769_v63 = vpop.permute.xlu0 %2406  ;;  %v2220_v19 = vrot.slane %v2210_v24, %v4367_v58  ;;  %v2771_v10 = vmul.f32 %v2765_v52, %v5453_v51  ;;  %v2249_v24 = vrot.slane %v2239_v62, %v4364_v56  ;;  %v3137_v51 = vrot.slane %v3122_v21, %v4229_v6 }
 0x403   : > { %2666 = vrot.lane.b32.xlu1 %v2660_v47, %s4167_s17  ;;  %2614 = vrot.lane.b32.xlu0 %v2608_v50, %s4167_s17  ;;  %v2798_v47 = vrot.slane %v5730_v25, %v4367_v58  ;;  %v2163_v50 = vmul.f32 %v2158_v60, %v5533_v12  ;;  %v2854_v12 = vrot.slane %v5730_v25, %v6262_v46 }
 0x404   : > { %v2865_v60 = vrot.slane %v2850_v9, %v4364_v56  ;;  %v2221_v25 = vmul.f32 %v2216_v15, %v5438_v38  ;;  %v3170_v9 = vrot.slane %v5810_v39, %v4232_v7  ;;  %v3143_v62 = vmul.f32 %v3137_v51, %v5424_v53 }
 0x405   : > { %v5786_v36 = vpop.permute.xlu1 %2992  ;;  %v5788_v32 = vpop.permute.xlu0 %2940  ;;  %v2813_v3 = vrot.slane %v2798_v47, %v4367_v58  ;;  %v2194_v35 = vadd.f32 %v2192_v29, %v2163_v50  ;;  %v2869_v22 = vrot.slane %v2854_v12, %v4364_v56  ;;  %v2251_v50 = vmul.f32 %v2249_v24, %v5440_v11 }
 0x406   : > { %v2874_v17 = vmul.f32 %v2865_v60, %v5455_v34  ;;  %v3226_v12 = vrot.slane %v5810_v39, %v6261_v0  ;;  %v3222_v24 = vrot.slane %v5810_v39, %v4367_v58 }
 0x407   : > { %2726 = vrot.lane.b32.xlu1 %v2719_v37, %s4168_s18  ;;  %2668 = vrot.lane.b32.xlu0 %v2661_v4, %s4167_s17  ;;  %v2823_v37 = vmul.f32 %v2817_v20, %v5418_v42  ;;  %v2822_v52 = vmul.f32 %v2813_v3, %v5418_v42  ;;  %v2223_v47 = vadd.f32 %v2221_v25, %v2194_v35  ;;  %s197_s17 = scalar_lea.vmem %s6171_s4, %s4117_s21 }
 0x408   : > { %v2875_v15 = vmul.f32 %v2869_v22, %v5455_v34  ;;  %v6272_v22 = vld [vmem:[#allocation16_spill] sm:$0xff] }
 0x409   : > { %v5812_v18 = vpop.permute.xlu1 %3096  ;;  %v5814_v57 = vpop.permute.xlu0 %3044 }
 0x40b   : > { %2776 = vrot.lane.b32.xlu1 %v2770_v1, %s4168_s18  ;;  %2724 = vrot.lane.b32.xlu0 %v2718_v2, %s4168_s18  ;;  %v2222_v1 = vmul.f32 %v2220_v19, %v5438_v38  ;;  %v2245_v2 = vrot.slane %v2235_v61, %v4364_v56  ;;  %v3118_v38 = vrot.slane %v5810_v39, %v4229_v6 }
 0x40c   : > { %v3185_v61 = vrot.slane %v3170_v9, %v4232_v7  ;;  %v5886_v9 = vmul.f32 %v5525_v49, %v6272_v22 }
 0x40d   : > { %v5834_v31 = vpop.permute.xlu1 %3630  ;;  %v5836_v4 = vpop.permute.xlu0 %3578  ;;  %v2224_v20 = vadd.f32 %v2222_v1, %v2195_v33  ;;  %v2250_v29 = vmul.f32 %v2245_v2, %v5440_v11  ;;  %v3133_v21 = vrot.slane %v3118_v38, %v4229_v6  ;;  %v3274_v1 = vrot.slane %v5810_v39, %v4364_v56 }
 0x40e   : > { %v3194_v35 = vmul.f32 %v3185_v61, %v5463_v23  ;;  %v3336_v61 = vrot.slane %v5886_v9, %v6259_v44 }
 0x40f   : > { %2830 = vrot.lane.b32.xlu1 %v2823_v37, %s4168_s18  ;;  %2778 = vrot.lane.b32.xlu0 %v2771_v10, %s4168_s18  ;;  %v2253_v19 = vadd.f32 %v2251_v50, %v2224_v20  ;;  %v2252_v33 = vadd.f32 %v2250_v29, %v2223_v47  ;;  %v3174_v10 = vrot.slane %v5810_v39, %v6260_v28 }
 0x410   : > { %v3241_v20 = vrot.slane %v3226_v12, %v4367_v58  ;;  %v3237_v50 = vrot.slane %v3222_v24, %v4367_v58  ;;  %v3440_v24 = vrot.slane %v5886_v9, %v6261_v0 }
 0x411   : > { %v5851_v5 = vpop.permute.xlu1 %3734  ;;  %v5853_v40 = vpop.permute.xlu0 %3682  ;;  %v3189_v51 = vrot.slane %v3174_v10, %v4232_v7 }
 0x413   : > { %2880 = vrot.lane.b32.xlu1 %v2874_v17, %s4168_s18  ;;  %2828 = vrot.lane.b32.xlu0 %v2822_v52, %s4168_s18 }
 0x415   : > { %v2301_v42 = vpop.permute.xlu1 %2300  ;;  %v2299_v37 = vpop.permute.xlu0 %2298 }
 0x416   : > { %v2305_v11 = vsel %vm398_vm11, %v2301_v42, %v5749_v43  ;;  %v2304_v60 = vsel %vm398_vm11, %v2299_v37, %v2301_v42  ;;  %v3142_v43 = vmul.f32 %v3133_v21, %v5424_v53  ;;  %v3289_v53 = vrot.slane %v3274_v1, %v4364_v56 }
 0x417   : > { %v2309_v3 = vadd.f32 %v2305_v11, %v2253_v19  ;;  %v2308_v34 = vadd.f32 %v2304_v60, %v2252_v33  ;;  %3150 = vrot.lane.b32.xlu1 %v3143_v62, %s4170_s20  ;;  %2882 = vrot.lane.b32.xlu0 %v2875_v15, %s4168_s18  ;;  %v3247_v62 = vmul.f32 %v3241_v20, %v5426_v45 }
 0x418   : > { %v3195_v15 = vmul.f32 %v3189_v51, %v5463_v23  ;;  %v3298_v12 = vmul.f32 %v3289_v53, %v5467_v55  ;;  %v3246_v23 = vmul.f32 %v3237_v50, %v5426_v45  ;;  %v3351_v60 = vrot.slane %v3336_v61, %v4229_v6 }
 0x419   : > { %v2351_v25 = vpop.permute.xlu1 %2350  ;;  %v2353_v2 = vpop.permute.xlu0 %2352 }
 0x41a   : > { %v2356_v17 = vsel %vm398_vm11, %v2351_v25, %v2353_v2  ;;  %v2357_v52 = vsel %vm398_vm11, %v2353_v2, %v5747_v41  ;;  %v3278_v41 = vrot.slane %v5810_v39, %v6262_v46  ;;  %v3388_v25 = vrot.slane %v5886_v9, %v6260_v28 }
 0x41b   : > { %v2360_v47 = vadd.f32 %v2356_v17, %v2308_v34  ;;  %v2361_v38 = vadd.f32 %v2357_v52, %v2309_v3  ;;  %3200 = vrot.lane.b32.xlu1 %v3194_v35, %s4170_s20  ;;  %3148 = vrot.lane.b32.xlu0 %v3142_v43, %s4170_s20  ;;  %v3332_v3 = vrot.slane %v5886_v9, %v4229_v6 }
 0x41c   : > { %v3293_v39 = vrot.slane %v3278_v41, %v4364_v56  ;;  %v3357_v20 = vmul.f32 %v3351_v60, %v5428_v27 }
 0x41d   : > { %v2405_v29 = vpop.permute.xlu1 %2404  ;;  %v2403_v19 = vpop.permute.xlu0 %2402  ;;  %v3347_v22 = vrot.slane %v3332_v3, %v4229_v6 }
 0x41e   : > { %v2409_v42 = vsel %vm398_vm11, %v2405_v29, %v5769_v63  ;;  %v2408_v37 = vsel %vm398_vm11, %v2403_v19, %v2405_v29  ;;  %v3384_v63 = vrot.slane %v5886_v9, %v4232_v7  ;;  %v3436_v19 = vrot.slane %v5886_v9, %v4367_v58 }
 0x41f   : > { %v2413_v33 = vadd.f32 %v2409_v42, %v2361_v38  ;;  %v2412_v21 = vadd.f32 %v2408_v37, %v2360_v47  ;;  %3254 = vrot.lane.b32.xlu1 %v3247_v62, %s4170_s20  ;;  %3202 = vrot.lane.b32.xlu0 %v3195_v15, %s4170_s20  ;;  %v3455_v47 = vrot.slane %v3440_v24, %v4367_v58  ;;  %v6273_v62 = vld [vmem:[#allocation18_spill] sm:$0xff] }
 0x420   : > { %v3399_v51 = vrot.slane %v3384_v63, %v4232_v7  ;;  %v3403_v38 = vrot.slane %v3388_v25, %v4232_v7  ;;  %v5950_v15 = vmul.f32 %v5525_v49, %v6273_v62  ;;  %v3920_v62 = vrot.slane %v5677_v54, %v4364_v56 }
 0x421   : > { %v2455_v10 = vpop.permute.xlu1 %2454  ;;  %v2457_v11 = vpop.permute.xlu0 %2456 }
 0x422   : > { %v2460_v34 = vsel %vm398_vm11, %v2455_v10, %v2457_v11  ;;  %v2461_v35 = vsel %vm398_vm11, %v2457_v11, %v5767_v14  ;;  %v3299_v14 = vmul.f32 %v3293_v39, %v5467_v55  ;;  %v3488_v55 = vrot.slane %v5886_v9, %v4364_v56 }
 0x423   : > { %v5917_v1 = vadd.f32 %v2460_v34, %v2412_v21  ;;  %v5919_v45 = vadd.f32 %v2461_v35, %v2413_v33  ;;  %3304 = vrot.lane.b32.xlu1 %v3298_v12, %s4170_s20  ;;  %3252 = vrot.lane.b32.xlu0 %v3246_v23, %s4170_s20  ;;  %v3408_v29 = vmul.f32 %v3399_v51, %v5471_v13 }
 0x424   : > { %v3503_v42 = vrot.slane %v3488_v55, %v4364_v56  ;;  %v3409_v49 = vmul.f32 %v3403_v38, %v5471_v13  ;;  %v3451_v21 = vrot.slane %v3436_v19, %v4367_v58  ;;  %v3760_v12 = vrot.slane %v5950_v15, %v6259_v44 }
 0x425   : > { %v2939_v2 = vpop.permute.xlu1 %2938  ;;  %v2937_v43 = vpop.permute.xlu0 %2936  ;;  %v3808_v11 = vrot.slane %v5950_v15, %v4232_v7  ;;  %v3756_v63 = vrot.slane %v5950_v15, %v4229_v6  ;;  %v3812_v35 = vrot.slane %v5950_v15, %v6260_v28  ;;  %v3860_v38 = vrot.slane %v5950_v15, %v4367_v58 }
 0x426   : > { %v5933_v17 = vsel %vm1063_vm14, %v2939_v2, %v5788_v32  ;;  %v5936_v52 = vsel %vm1063_vm14, %v2937_v43, %v2939_v2  ;;  %v3356_v32 = vmul.f32 %v3347_v22, %v5428_v27  ;;  %v3461_v27 = vmul.f32 %v3455_v47, %v5430_v48 }
 0x427   : > { %3364 = vrot.lane.b32.xlu1 %v3357_v20, %s4171_s22  ;;  %3306 = vrot.lane.b32.xlu0 %v3299_v14, %s4170_s20  ;;  %v3512_v13 = vmul.f32 %v3503_v42, %v5495_v30  ;;  %v3775_v39 = vrot.slane %v3760_v12, %v4229_v6  ;;  %v3823_v20 = vrot.slane %v3808_v11, %v4232_v7 }
 0x428   : > { %v3875_v19 = vrot.slane %v3860_v38, %v4367_v58 }
 0x429   : > { %v2989_v53 = vpop.permute.xlu1 %2988  ;;  %v2991_v50 = vpop.permute.xlu0 %2990  ;;  %v3781_v2 = vmul.f32 %v3775_v39, %v5695_v16 }
 0x42a   : > { %v5953_v61 = vsel %vm1063_vm14, %v2989_v53, %v2991_v50  ;;  %v5957_v41 = vsel %vm1063_vm14, %v2991_v50, %v5786_v36  ;;  %v3492_v36 = vrot.slane %v5886_v9, %v6262_v46  ;;  %v3460_v9 = vmul.f32 %v3451_v21, %v5430_v48 }
 0x42b   : > { %3414 = vrot.lane.b32.xlu1 %v3408_v29, %s4171_s22  ;;  %3362 = vrot.lane.b32.xlu0 %v3356_v32, %s4171_s22  ;;  %v3864_v48 = vrot.slane %v5950_v15, %v6261_v0  ;;  %v3884_v54 = vmul.f32 %v3875_v19, %v5461_v8 }
 0x42d   : > { %v3043_v37 = vpop.permute.xlu1 %3042  ;;  %v3041_v33 = vpop.permute.xlu0 %3040  ;;  %v3879_v28 = vrot.slane %v3864_v48, %v4367_v58 }
 0x42e   : > { %v5971_v23 = vsel %vm1063_vm14, %v3043_v37, %v5814_v57  ;;  %v5974_v10 = vsel %vm1063_vm14, %v3041_v33, %v3043_v37  ;;  %v3507_v57 = vrot.slane %v3492_v36, %v4364_v56  ;;  %v3935_v33 = vrot.slane %v3920_v62, %v4364_v56 }
 0x42f   : > { %3468 = vrot.lane.b32.xlu1 %v3461_v27, %s4171_s22  ;;  %3416 = vrot.lane.b32.xlu0 %v3409_v49, %s4171_s22  ;;  %v3885_v50 = vmul.f32 %v3879_v28, %v5461_v8 }
 0x430   : > { %v3513_v43 = vmul.f32 %v3507_v57, %v5495_v30  ;;  %v3912_v30 = vrot.slane %v5950_v15, %v4364_v56  ;;  %v3938_v12 = vmul.f32 %v3935_v33, %v5732_v26 }
 0x431   : > { %v3093_v44 = vpop.permute.xlu1 %3092  ;;  %v3095_v60 = vpop.permute.xlu0 %3094 }
 0x432   : > { %v5987_v3 = vsel %vm1063_vm14, %v3093_v44, %v3095_v60  ;;  %v5991_v34 = vsel %vm1063_vm14, %v3095_v60, %v5812_v18  ;;  %v3771_v18 = vrot.slane %v3756_v63, %v4229_v6  ;;  %v3832_v6 = vmul.f32 %v3823_v20, %v5708_v59 }
 0x433   : > { %3518 = vrot.lane.b32.xlu1 %v3512_v13, %s4171_s22  ;;  %3466 = vrot.lane.b32.xlu0 %v3460_v9, %s4171_s22 }
 0x434   : > { %v3780_v47 = vmul.f32 %v3771_v18, %v5695_v16  ;;  %v3927_v16 = vrot.slane %v3912_v30, %v4364_v56 }
 0x435   : > { %v3577_v24 = vpop.permute.xlu1 %3576  ;;  %v3575_v25 = vpop.permute.xlu0 %3574 }
 0x436   : > { %v6005_v14 = vsel %vm1718_vm2, %v3577_v24, %v5836_v4  ;;  %v6008_v51 = vsel %vm1718_vm2, %v3575_v25, %v3577_v24  ;;  %v3827_v4 = vrot.slane %v3812_v35, %v4232_v7  ;;  %v3936_v58 = vmul.f32 %v3927_v16, %v5732_v26 }
 0x437   : > { %3788 = vrot.lane.b32.xlu1 %v3781_v2, %s4173_s24  ;;  %3520 = vrot.lane.b32.xlu0 %v3513_v43, %s4171_s22 }
 0x438   : > { %v3833_v32 = vmul.f32 %v3827_v4, %v5708_v59 }
 0x439   : > { %v3627_v0 = vpop.permute.xlu1 %3626  ;;  %v3629_v22 = vpop.permute.xlu0 %3628 }
 0x43a   : > { %v6021_v55 = vsel %vm1718_vm2, %v3627_v0, %v3629_v22  ;;  %v6025_v53 = vsel %vm1718_vm2, %v3629_v22, %v5834_v31  ;;  %v3916_v31 = vrot.slane %v5950_v15, %v6262_v46 }
 0x43b   : > { %3838 = vrot.lane.b32.xlu1 %v3832_v6, %s4173_s24  ;;  %3786 = vrot.lane.b32.xlu0 %v3780_v47, %s4173_s24 }
 0x43c   : > { %v3931_v46 = vrot.slane %v3916_v31, %v4364_v56 }
 0x43d   : > { %v3681_v29 = vpop.permute.xlu1 %3680  ;;  %v3679_v7 = vpop.permute.xlu0 %3678 }
 0x43e   : > { %v6039_v27 = vsel %vm1718_vm2, %v3681_v29, %v5853_v40  ;;  %v6042_v42 = vsel %vm1718_vm2, %v3679_v7, %v3681_v29  ;;  %v3937_v8 = vmul.f32 %v3931_v46, %v5732_v26 }
 0x43f   : > { %3892 = vrot.lane.b32.xlu1 %v3885_v50, %s4173_s24  ;;  %3840 = vrot.lane.b32.xlu0 %v3833_v32, %s4173_s24 }
 0x441   : > { %v3731_v59 = vpop.permute.xlu1 %3730  ;;  %v3733_v37 = vpop.permute.xlu0 %3732 }
 0x442   : > { %v6051_v40 = vsel %vm1718_vm2, %v3731_v59, %v3733_v37  ;;  %v6055_v15 = vsel %vm1718_vm2, %v3733_v37, %v5851_v5 }
 0x443   : > { %3942 = vrot.lane.b32.xlu1 %v3936_v58, %s4173_s24  ;;  %3890 = vrot.lane.b32.xlu0 %v3884_v54, %s4173_s24 }
 0x445   : > { %v2567_v49 = vpop.permute.xlu1 %2566  ;;  %v2515_v21 = vpop.permute.xlu0 %2514 }
 0x447   : > { %3946 = vrot.lane.b32.xlu1 %v3938_v12, %s4173_s24  ;;  %3944 = vrot.lane.b32.xlu0 %v3937_v8, %s4173_s24 }
 0x449   : > { %v2671_v56 = vpop.permute.xlu1 %2670  ;;  %v2619_v36 = vpop.permute.xlu0 %2618 }
 0x44d   : > { %v2781_v13 = vpop.permute.xlu1 %2780  ;;  %v2729_v11 = vpop.permute.xlu0 %2728 }
 0x451   : > { %v2885_v5 = vpop.permute.xlu1 %2884  ;;  %v2833_v44 = vpop.permute.xlu0 %2832 }
 0x455   : > { %v6063_v60 = vpop.permute.xlu1 %3204  ;;  %v6065_v9 = vpop.permute.xlu0 %3152 }
 0x459   : > { %v6067_v39 = vpop.permute.xlu1 %3308  ;;  %v6069_v57 = vpop.permute.xlu0 %3256 }
 0x45d   : > { %v6071_v63 = vpop.permute.xlu1 %3418  ;;  %v6073_v26 = vpop.permute.xlu0 %3366 }
 0x461   : > { %v6075_v48 = vpop.permute.xlu1 %3522  ;;  %v6077_v35 = vpop.permute.xlu0 %3470 }
 0x465   : > { %v6079_v24 = vpop.permute.xlu1 %3842  ;;  %v6081_v25 = vpop.permute.xlu0 %3790 }
 0x469   : > { %v2513_v2 = vpop.permute.xlu1 %2512  ;;  %v6083_v43 = vpop.permute.xlu0 %3894 }
 0x46a   : > { %v2517_v28 = vsel %vm628_vm12, %v2513_v2, %v2515_v21 }
 0x46b   : > { %v2521_v30 = vadd.f32 %v2517_v28, %v5919_v45 }
 0x46d   : > { %v2563_v20 = vpop.permute.xlu1 %2562  ;;  %v2511_v18 = vpop.permute.xlu0 %2510 }
 0x46e   : > { %v2516_v32 = vsel %vm628_vm12, %v2511_v18, %v2513_v2 }
 0x46f   : > { %v2520_v45 = vadd.f32 %v2516_v32, %v5917_v1 }
 0x471   : > { %v2617_v0 = vpop.permute.xlu1 %2616  ;;  %v2565_v22 = vpop.permute.xlu0 %2564 }
 0x472   : > { %v2569_v6 = vsel %vm628_vm12, %v2565_v22, %v2567_v49  ;;  %v2621_v50 = vsel %vm628_vm12, %v2617_v0, %v2619_v36  ;;  %v2568_v31 = vsel %vm628_vm12, %v2563_v20, %v2565_v22 }
 0x473   : > { %v2573_v47 = vadd.f32 %v2569_v6, %v2521_v30  ;;  %v2572_v54 = vadd.f32 %v2568_v31, %v2520_v45 }
 0x475   : > { %v2667_v4 = vpop.permute.xlu1 %2666  ;;  %v2615_v38 = vpop.permute.xlu0 %2614  ;;  %v2625_v7 = vadd.f32 %v2621_v50, %v2573_v47 }
 0x476   : > { %v2620_v58 = vsel %vm628_vm12, %v2615_v38, %v2617_v0 }
 0x477   : > { %v2624_v49 = vadd.f32 %v2620_v58, %v2572_v54 }
 0x479   : > { %v2727_v16 = vpop.permute.xlu1 %2726  ;;  %v2669_v29 = vpop.permute.xlu0 %2668 }
 0x47a   : > { %v2673_v19 = vsel %vm628_vm12, %v2669_v29, %v2671_v56  ;;  %v2731_v33 = vsel %vm850_vm13, %v2727_v16, %v2729_v11  ;;  %v2672_v46 = vsel %vm628_vm12, %v2667_v4, %v2669_v29 }
 0x47b   : > { %v2677_v62 = vadd.f32 %v2673_v19, %v2625_v7  ;;  %v2676_v2 = vadd.f32 %v2672_v46, %v2624_v49 }
 0x47d   : > { %v2777_v59 = vpop.permute.xlu1 %2776  ;;  %v2725_v37 = vpop.permute.xlu0 %2724  ;;  %v2735_v8 = vadd.f32 %v2731_v33, %v2677_v62 }
 0x47e   : > { %v2730_v56 = vsel %vm850_vm13, %v2725_v37, %v2727_v16 }
 0x47f   : > { %v2734_v18 = vadd.f32 %v2730_v56, %v2676_v2 }
 0x481   : > { %v2831_v21 = vpop.permute.xlu1 %2830  ;;  %v2779_v12 = vpop.permute.xlu0 %2778 }
 0x482   : > { %v2783_v36 = vsel %vm850_vm13, %v2779_v12, %v2781_v13  ;;  %v2782_v1 = vsel %vm850_vm13, %v2777_v59, %v2779_v12  ;;  %v2835_v22 = vsel %vm850_vm13, %v2831_v21, %v2833_v44 }
 0x483   : > { %v2787_v20 = vadd.f32 %v2783_v36, %v2735_v8  ;;  %v2786_v11 = vadd.f32 %v2782_v1, %v2734_v18 }
 0x485   : > { %v2881_v28 = vpop.permute.xlu1 %2880  ;;  %v2829_v30 = vpop.permute.xlu0 %2828  ;;  %v2839_v38 = vadd.f32 %v2835_v22, %v2787_v20 }
 0x486   : > { %v2834_v0 = vsel %vm850_vm13, %v2829_v30, %v2831_v21 }
 0x487   : > { %v2838_v6 = vadd.f32 %v2834_v0, %v2786_v11 }
 0x489   : > { %v3151_v47 = vpop.permute.xlu1 %3150  ;;  %v2883_v4 = vpop.permute.xlu0 %2882 }
 0x48a   : > { %v2886_v50 = vsel %vm850_vm13, %v2881_v28, %v2883_v4  ;;  %v2887_v13 = vsel %vm850_vm13, %v2883_v4, %v2885_v5 }
 0x48b   : > { %v2890_v16 = vadd.f32 %v2886_v50, %v2838_v6  ;;  %v2891_v29 = vadd.f32 %v2887_v13, %v2839_v38 }
 0x48d   : > { %v2946_v7 = vadd.f32 %v5936_v52, %v2890_v16  ;;  %v2947_v32 = vadd.f32 %v5933_v17, %v2891_v29  ;;  %v3201_v19 = vpop.permute.xlu1 %3200  ;;  %v3149_v62 = vpop.permute.xlu0 %3148  ;;  %v3155_v52 = vsel %vm1283_vm15, %v3151_v47, %v6065_v9 }
 0x48f   : > { %v2998_v31 = vadd.f32 %v5953_v61, %v2946_v7  ;;  %v2999_v44 = vadd.f32 %v5957_v41, %v2947_v32  ;;  %v3154_v61 = vsel %vm1283_vm15, %v3149_v62, %v3151_v47 }
 0x491   : > { %v3050_v45 = vadd.f32 %v5974_v10, %v2998_v31  ;;  %v3255_v59 = vpop.permute.xlu1 %3254  ;;  %v3203_v37 = vpop.permute.xlu0 %3202  ;;  %v3051_v58 = vadd.f32 %v5971_v23, %v2999_v44 }
 0x492   : > { %v3207_v41 = vsel %vm1283_vm15, %v3203_v37, %v6063_v60  ;;  %v3259_v23 = vsel %vm1283_vm15, %v3255_v59, %v6069_v57 }
 0x493   : > { %v3102_v5 = vadd.f32 %v5987_v3, %v3050_v45  ;;  %v3103_v54 = vadd.f32 %v5991_v34, %v3051_v58  ;;  %v3206_v34 = vsel %vm1283_vm15, %v3201_v19, %v3203_v37 }
 0x495   : > { %v3159_v17 = vadd.f32 %v3155_v52, %v3103_v54  ;;  %v3305_v33 = vpop.permute.xlu1 %3304  ;;  %v3253_v46 = vpop.permute.xlu0 %3252  ;;  %v3158_v10 = vadd.f32 %v3154_v61, %v3102_v5 }
 0x496   : > { %v3258_v1 = vsel %vm1283_vm15, %v3253_v46, %v3255_v59 }
 0x497   : > { %v3211_v49 = vadd.f32 %v3207_v41, %v3159_v17  ;;  %v3210_v8 = vadd.f32 %v3206_v34, %v3158_v10 }
 0x499   : > { %v3365_v21 = vpop.permute.xlu1 %3364  ;;  %v3307_v3 = vpop.permute.xlu0 %3306  ;;  %v3263_v12 = vadd.f32 %v3259_v23, %v3211_v49  ;;  %v3262_v18 = vadd.f32 %v3258_v1, %v3210_v8 }
 0x49a   : > { %v3311_v9 = vsel %vm1283_vm15, %v3307_v3, %v6067_v39  ;;  %v3369_v36 = vsel %vm1505_vm1, %v3365_v21, %v6073_v26  ;;  %v3310_v57 = vsel %vm1283_vm15, %v3305_v33, %v3307_v3 }
 0x49b   : > { %v3315_v56 = vadd.f32 %v3311_v9, %v3263_v12  ;;  %v3314_v11 = vadd.f32 %v3310_v57, %v3262_v18 }
 0x49d   : > { %v3415_v2 = vpop.permute.xlu1 %3414  ;;  %v3363_v60 = vpop.permute.xlu0 %3362  ;;  %v3373_v20 = vadd.f32 %v3369_v36, %v3315_v56 }
 0x49e   : > { %v3368_v0 = vsel %vm1505_vm1, %v3363_v60, %v3365_v21 }
 0x49f   : > { %v3372_v47 = vadd.f32 %v3368_v0, %v3314_v11 }
 0x4a1   : > { %v3469_v28 = vpop.permute.xlu1 %3468  ;;  %v3417_v30 = vpop.permute.xlu0 %3416 }
 0x4a2   : > { %v3421_v39 = vsel %vm1505_vm1, %v3417_v30, %v6071_v63  ;;  %v3473_v26 = vsel %vm1505_vm1, %v3469_v28, %v6077_v35  ;;  %v3420_v6 = vsel %vm1505_vm1, %v3415_v2, %v3417_v30 }
 0x4a3   : > { %v3425_v22 = vadd.f32 %v3421_v39, %v3373_v20  ;;  %v3424_v16 = vadd.f32 %v3420_v6, %v3372_v47  ;;  %v4149_v47 = vld [vmem:[%s4226_s26] sm:$0xff] }
 0x4a5   : > { %v3519_v4 = vpop.permute.xlu1 %3518  ;;  %v3467_v38 = vpop.permute.xlu0 %3466  ;;  %v3477_v50 = vadd.f32 %v3473_v26, %v3425_v22 }
 0x4a6   : > { %v3472_v13 = vsel %vm1505_vm1, %v3467_v38, %v3469_v28 }
 0x4a7   : > { %v3476_v29 = vadd.f32 %v3472_v13, %v3424_v16 }
 0x4a9   : > { %v3789_v7 = vpop.permute.xlu1 %3788  ;;  %v3521_v32 = vpop.permute.xlu0 %3520 }
 0x4aa   : > { %v3524_v19 = vsel %vm1505_vm1, %v3519_v4, %v3521_v32  ;;  %v3525_v63 = vsel %vm1505_vm1, %v3521_v32, %v6075_v48 }
 0x4ab   : > { %v3528_v62 = vadd.f32 %v3524_v19, %v3476_v29  ;;  %v3529_v31 = vadd.f32 %v3525_v63, %v3477_v50 }
 0x4ad   : > { %v3584_v35 = vadd.f32 %v6008_v51, %v3528_v62  ;;  %v3585_v44 = vadd.f32 %v6005_v14, %v3529_v31  ;;  %v3839_v45 = vpop.permute.xlu1 %3838  ;;  %v3787_v59 = vpop.permute.xlu0 %3786  ;;  %v3793_v51 = vsel %vm1938_vm3, %v3789_v7, %v6081_v25 }
 0x4ae   : > { %v3792_v14 = vsel %vm1938_vm3, %v3787_v59, %v3789_v7 }
 0x4af   : > { %v3636_v37 = vadd.f32 %v6021_v55, %v3584_v35  ;;  %v3637_v58 = vadd.f32 %v6025_v53, %v3585_v44 }
 0x4b1   : > { %v3688_v5 = vadd.f32 %v6042_v42, %v3636_v37  ;;  %v3893_v54 = vpop.permute.xlu1 %3892  ;;  %v3841_v52 = vpop.permute.xlu0 %3840  ;;  %v3689_v17 = vadd.f32 %v6039_v27, %v3637_v58 }
 0x4b2   : > { %v3844_v53 = vsel %vm1938_vm3, %v3839_v45, %v3841_v52  ;;  %v3845_v42 = vsel %vm1938_vm3, %v3841_v52, %v6079_v24 }
 0x4b3   : > { %v3740_v48 = vadd.f32 %v6051_v40, %v3688_v5  ;;  %v3741_v33 = vadd.f32 %v6055_v15, %v3689_v17  ;;  %v3897_v40 = vsel %vm1938_vm3, %v3893_v54, %v6083_v43 }
 0x4b5   : > { %v3796_v46 = vadd.f32 %v3792_v14, %v3740_v48  ;;  %v3797_v61 = vadd.f32 %v3793_v51, %v3741_v33  ;;  %v3943_v55 = vpop.permute.xlu1 %3942  ;;  %v3891_v41 = vpop.permute.xlu0 %3890 }
 0x4b6   : > { %v3896_v15 = vsel %vm1938_vm3, %v3891_v41, %v3893_v54 }
 0x4b7   : > { %v3848_v10 = vadd.f32 %v3844_v53, %v3796_v46  ;;  %v3849_v27 = vadd.f32 %v3845_v42, %v3797_v61 }
 0x4b9   : > { %v3900_v49 = vadd.f32 %v3896_v15, %v3848_v10  ;;  %v3947_v25 = vpop.permute.xlu1 %3946  ;;  %v3945_v23 = vpop.permute.xlu0 %3944  ;;  %v3901_v21 = vadd.f32 %v3897_v40, %v3849_v27 }
 0x4ba   : > { %v3948_v3 = vsel %vm1938_vm3, %v3943_v55, %v3945_v23  ;;  %v3949_v12 = vsel %vm1938_vm3, %v3945_v23, %v3947_v25 }
 0x4bb   : > { %v3952_v34 = vadd.f32 %v3948_v3, %v3900_v49  ;;  %v3953_v9 = vadd.f32 %v3949_v12, %v3901_v21 }
 0x4bd   : > { %v3954_v8 = vsel %vm2101_vm6, %v3952_v34, 0.0  ;;  %v3955_v24 = vsel %vm2101_vm6, %v3953_v9, 0.0 }
 0x4be   : > { %v3956_v56 = vadd.f32 %v3955_v24, %v3954_v8 }
 0x4c0   : > { %3957 = vadd.xlane.f32.xlu0 %v3956_v56 }
 0x54d   : > { %v3958_v36 = vpop.xlane.xlu0 %3957 }
 0x54e   : > { %v3959_v43 = vmul.f32 0.00390625, %v3958_v36 }
 0x550   : > { %v3960_v2 = vsub.f32 %v3952_v34, %v3959_v43  ;;  %v3961_v60 = vsub.f32 %v3953_v9, %v3959_v43 }
 0x552   : > { %v3962_v20 = vmul.f32 %v3960_v2, %v3960_v2  ;;  %v3963_v1 = vmul.f32 %v3961_v60, %v3961_v60 }
 0x554   : > { %v3964_v18 = vsel %vm2101_vm6, %v3962_v20, 0.0  ;;  %v3965_v57 = vsel %vm2101_vm6, %v3963_v1, 0.0 }
 0x555   : > { %v3966_v28 = vadd.f32 %v3965_v57, %v3964_v18 }
 0x557   : > { %3967 = vadd.xlane.f32.xlu1 %v3966_v28 }
 0x5e4   : > { %v3968_v30 = vpop.xlane.xlu1 %3967 }
 0x5e5   : > { %v3969_v0 = vmul.f32 0.00390625, %v3968_v30 }
 0x5e7   : > { %v3970_v39 = vadd.f32 1e-05, %v3969_v0 }
 0x5e9   : > { %4147 = vrsqrt.f32 %v3970_v39 }
 0x5f3   : > { %v4148_v11 = vpop.eup %4147 }
 0x5f4   : > { %v3972_v22 = vmul.f32 %v4148_v11, %v3960_v2  ;;  %v3973_v26 = vmul.f32 %v4148_v11, %v3961_v60 }
 0x5f6   : > { %v3976_v6 = vcombine.low %v3972_v22, %v3973_v26 }
 0x5f8   : > { %v3978_v4 = vadd.f32 %v4149_v47, %v3976_v6 }
 0x5fa   : > { %3979 = vst [vmem:[%s197_s17] sm:$0xff] %v3978_v4 }
 0x5fb PF: > { %s14_s15 = sadd.s32 1, %s4156_s15  }
 0x5fc   : > { %p11_p4 = scmp.ge.s32.totalorder %s14_s15, 4  }
 0x5fe   :  { %13 = sbr.rel (!%p11_p4) target bundleno = 1 (0x1), region = 137 }

</bundles_post_ra>
